<compile_context>
chip_gen: v7x
topology: tpu7x:2x2x1
jax: 0.10.0
libtpu: 0.0.40
codegen_flags: <defaults>
</compile_context>

<pallas_src>
import numpy as np

import jax
import jax.numpy as jnp
from jax.experimental import pallas as pl
from jax.experimental.pallas import tpu as pltpu


# ----------------------------------------------------------------------------
# Synthetic "config" (mirrors the PyTorch Encoder config):
#   initial      = Conv2d(3, 8, kernel_size=3, stride=1, padding=1)
#   downsampling = [DownBlock(8, 16), DownBlock(16, 32)]
#   out_side=4, out_ch=32, hidden=32       (for 16x16 inputs)
# ----------------------------------------------------------------------------
CONFIG = dict(
    initial=(3, 8, 3, 1, 1),
    downsampling=[(8, 16), (16, 32)],
    out_side=4,
    out_ch=32,
    hidden=32,
)


# ----------------------------------------------------------------------------
# Static plan: per-layer geometry of the flattened padded grids.
# ----------------------------------------------------------------------------
def _build_plan(config, in_side):
    c_in0, c_out0, k0, s0, p0 = config["initial"]
    assert k0 == 3 and p0 == 1 and s0 == 1, "fused kernel assumes 3x3/pad1/stride1 initial conv"
    specs = [dict(cin=c_in0, cout=c_out0, stride=s0, relu=False)]
    # TODO(synk): DownBlock is not defined in the provided source; assumed to be
    #             Conv2d(in, out, kernel_size=3, stride=2, padding=1) + ReLU.
    for ci, co in config["downsampling"]:
        specs.append(dict(cin=ci, cout=co, stride=2, relu=True))
    assert len(specs) >= 2

    side = in_side
    for lyr in specs:
        hp = side + 2                      # zero-padded grid side
        lyr["side_in"] = side
        lyr["hp"] = hp
        lyr["rg"] = hp * hp                # flattened padded-grid rows
        lyr["extra"] = hp                  # top/bottom margin for +-hp row taps
        side = (side + 2 - 3) // lyr["stride"] + 1
        lyr["side_out"] = side

    assert side == config["out_side"]
    assert specs[-1]["cout"] == config["out_ch"]

    last = specs[-1]
    s, hp, so = last["stride"], last["hp"], last["side_out"]
    # valid conv outputs of the last layer live at grid rows (s*r+1, s*c+1)
    head_rows = [(s * r + 1) * hp + (s * c + 1) for r in range(so) for c in range(so)]
    return specs, head_rows


def _build_constants(layers):
    """mask: zeroes the pad ring of the stride-1 layer's output grid.
       sel:  constant 0/1 matrix doing stride-2 decimation + re-padding of a
             full-grid response into the next layer's padded grid, as a matmul."""
    hp1, rg1 = layers[1]["hp"], layers[1]["rg"]
    mask = np.zeros((rg1, 1), np.float32)
    for r in range(1, hp1 - 1):
        mask[r * hp1 + 1: r * hp1 + hp1 - 1, 0] = 1.0

    sels = []
    for li in range(1, len(layers) - 1):
        cur, nxt = layers[li], layers[li + 1]
        hp_c, hp_n, s = cur["hp"], nxt["hp"], cur["stride"]
        p = np.zeros((nxt["rg"], cur["rg"]), np.float32)
        for r2 in range(1, hp_n - 1):
            for c2 in range(1, hp_n - 1):
                src = (s * (r2 - 1) + 1) * hp_c + (s * (c2 - 1) + 1)
                p[r2 * hp_n + c2, src] = 1.0
        sels.append(jnp.asarray(p))
    return jnp.asarray(mask), sels


# ----------------------------------------------------------------------------
# The single fused kernel (one image per grid step).
# ----------------------------------------------------------------------------
def _make_encoder_kernel(layers, head_rows, hidden):
    n_layers = len(layers)

    def kernel(*refs):
        idx = 0
        patches_ref = refs[idx]; idx += 1
        w_refs, b_refs = [], []
        for _ in range(n_layers):
            w_refs.append(refs[idx]); b_refs.append(refs[idx + 1]); idx += 2
        mask_ref = refs[idx]; idx += 1
        sel_refs = list(refs[idx: idx + n_layers - 2]); idx += n_layers - 2
        wh_ref, bh_ref, eps_ref = refs[idx], refs[idx + 1], refs[idx + 2]; idx += 3
        z_ref, mean_ref, logvar_ref = refs[idx], refs[idx + 1], refs[idx + 2]; idx += 3
        bufs = list(refs[idx:])            # per-layer lane-packed "trip" scratch

        # ---- layer 0: one im2col GEMM over the whole padded grid (K = 9*cin)
        acc = jnp.dot(patches_ref[...], w_refs[0][...],
                      preferred_element_type=jnp.float32) + b_refs[0][...]
        grid_vals = acc * mask_ref[...]          # zero the pad ring -> layer-1 grid

        for li in range(1, n_layers):
            lyr = layers[li]
            hp, rg, ex, cin = lyr["hp"], lyr["rg"], lyr["extra"], lyr["cin"]
            buf = bufs[li - 1]
            # Zero the scratch every step (pad ring + shift margins must be
            # finite/zero; per-core scratch means a pid==0-only init is unsafe
            # when the batch grid is sharded across cores).
            buf[...] = jnp.zeros_like(buf)
            # Lane-pack the next grid as [grid[t-1] | grid[t] | grid[t+1]]:
            # same value stored three times at row offsets +1/0/-1 and lane
            # blocks 0/1/2 (masked sub-lane stores).
            buf[ex + 1: ex + 1 + rg, 0:cin] = grid_vals
            buf[ex:     ex + rg,     cin:2 * cin] = grid_vals
            buf[ex - 1: ex - 1 + rg, 2 * cin:3 * cin] = grid_vals

            # 3 row-tap GEMMs, each contracting the 3*cin packed lanes on MXU.
            acc = b_refs[li][...]
            for di in range(3):
                base = ex + (di - 1) * hp
                acc = acc + jnp.dot(buf[base: base + rg, :], w_refs[li][di],
                                    preferred_element_type=jnp.float32)
            if lyr["relu"]:
                acc = jnp.maximum(acc, 0.0)
            if li < n_layers - 1:
                # stride-2 decimation + re-pad for the next grid: one 0/1 matmul
                grid_vals = jnp.dot(sel_refs[li - 1][...], acc,
                                    preferred_element_type=jnp.float32)

        feat = acc                               # (rg_last, out_ch), in VMEM/vregs

        # Fused head: single mean||logvar GEMM weight (PyTorch Flatten order
        # folded into wh) accumulated over the valid output pixels, then the
        # reparametrization.
        head = bh_ref[...]                                       # (1, 2*hidden)
        for p, row in enumerate(head_rows):
            head = head + jnp.dot(feat[row: row + 1, :], wh_ref[p],
                                  preferred_element_type=jnp.float32)
        mean = head[:, :hidden]
        logvar = head[:, hidden:]
        z_ref[...] = mean + eps_ref[...] * jnp.exp(0.5 * logvar)
        mean_ref[...] = mean
        logvar_ref[...] = logvar

    return kernel


# ----------------------------------------------------------------------------
# Wrapper: parameter repacking + single pallas_call.
# ----------------------------------------------------------------------------
def encoder_forward(params, x_nchw, eps, config):
    n, c_in, h, w_sz = x_nchw.shape
    assert h == w_sz, "square inputs only"
    hidden = config["hidden"]
    layers, head_rows = _build_plan(config, h)
    n_layers = len(layers)

    # ---- layer-0 im2col built with plain XLA ops (tiny input) --------------
    hp0, rg0 = layers[0]["hp"], layers[0]["rg"]
    x_nhwc = jnp.transpose(x_nchw, (0, 2, 3, 1)).astype(jnp.float32)
    xp2 = jnp.pad(x_nhwc, ((0, 0), (2, 2), (2, 2), (0, 0)))
    patches = jnp.concatenate(
        [xp2[:, a:a + hp0, b:b + hp0, :] for a in range(3) for b in range(3)],
        axis=-1).reshape(n, rg0, 9 * c_in)

    # ---- conv weights: layer 0 as (9*cin, cout); later layers as 3 row-taps
    #      of (3*cin, cout) matching the lane-packed trip buffers ------------
    conv_inputs = []
    all_wb = [params["conv0"]] + list(params["down"])
    for li, (w_oihw, b) in enumerate(all_wb):
        cout, cin = int(w_oihw.shape[0]), int(w_oihw.shape[1])
        w_t = jnp.transpose(w_oihw, (2, 3, 1, 0))          # (kh, kw, cin, cout)
        if li == 0:
            conv_inputs.append(w_t.reshape(9 * cin, cout))
        else:
            conv_inputs.append(w_t.reshape(3, 3 * cin, cout))
        conv_inputs.append(b.reshape(1, cout))

    mask, sels = _build_constants(layers)

    # ---- head: concat mean/logvar weights; fold PyTorch NCHW-Flatten order --
    side, out_ch = config["out_side"], config["out_ch"]
    (wm, bm), (wl, bl) = params["mean"], params["logvar"]
    wcat = jnp.concatenate([wm, wl], axis=1)                 # (feat, 2*hidden)
    w_head = wcat.reshape(out_ch, side, side, 2 * hidden)
    w_head = jnp.transpose(w_head, (1, 2, 0, 3)).reshape(side * side, out_ch,
                                                         2 * hidden)
    b_head = jnp.concatenate([bm, bl]).reshape(1, 2 * hidden)

    eps3 = eps.reshape(n, 1, hidden)

    inputs = [patches] + conv_inputs + [mask] + sels + [w_head, b_head, eps3]

    def fixed_spec(arr):
        shape = tuple(int(d) for d in arr.shape)
        zero = (0,) * len(shape)
        return pl.BlockSpec(shape, lambda i, _z=zero: _z)

    in_specs = [pl.BlockSpec((None, rg0, 9 * c_in), lambda i: (i, 0, 0))]
    in_specs += [fixed_spec(a) for a in conv_inputs + [mask] + sels + [w_head, b_head]]
    in_specs += [pl.BlockSpec((None, 1, hidden), lambda i: (i, 0, 0))]

    out_sd = jax.ShapeDtypeStruct((n, 1, hidden), jnp.float32)
    out_spec = pl.BlockSpec((None, 1, hidden), lambda i: (i, 0, 0))

    scratch = [pltpu.VMEM((lyr["rg"] + 2 * lyr["extra"], 3 * lyr["cin"]), jnp.float32)
               for lyr in layers[1:]]

    kernel = _make_encoder_kernel(layers, head_rows, hidden)

    z, mean, logvar = pl.pallas_call(
        kernel,
        out_shape=(out_sd, out_sd, out_sd),
        grid=(n,),
        in_specs=in_specs,
        out_specs=(out_spec, out_spec, out_spec),
        scratch_shapes=scratch,
        compiler_params=pltpu.CompilerParams(
            dimension_semantics=("parallel",)),
    )(*inputs)

    return (z.reshape(n, hidden), mean.reshape(n, hidden),
            logvar.reshape(n, hidden))


# ----------------------------------------------------------------------------
# Parameter init (PyTorch-style fan-in uniform; linear weights stored [in, out]).
# ----------------------------------------------------------------------------
def init_params(key, config):
    def conv_init(k, cin, cout, ksz):
        kw_, kb_ = jax.random.split(k)
        scale = 1.0 / float(np.sqrt(cin * ksz * ksz))
        w = jax.random.uniform(kw_, (cout, cin, ksz, ksz), jnp.float32, -scale, scale)
        b = jax.random.uniform(kb_, (cout,), jnp.float32, -scale, scale)
        return w, b

    def linear_init(k, fin, fout):
        kw_, kb_ = jax.random.split(k)
        scale = 1.0 / float(np.sqrt(fin))
        w = jax.random.uniform(kw_, (fin, fout), jnp.float32, -scale, scale)
        b = jax.random.uniform(kb_, (fout,), jnp.float32, -scale, scale)
        return w, b

    keys = jax.random.split(key, 1 + len(config["downsampling"]) + 2)
    cin, cout, ksz, _, _ = config["initial"]
    params = {"conv0": conv_init(keys[0], cin, cout, ksz), "down": []}
    for i, (ci, co) in enumerate(config["downsampling"]):
        params["down"].append(conv_init(keys[1 + i], ci, co, 3))
    feat = config["out_side"] ** 2 * config["out_ch"]
    params["mean"] = linear_init(keys[-2], feat, config["hidden"])
    params["logvar"] = linear_init(keys[-1], feat, config["hidden"])
    return params


if __name__ == "__main__":
    root = jax.random.PRNGKey(0)
    k_param, k_input, k_eps = jax.random.split(root, 3)

    params = init_params(k_param, CONFIG)
    x = jax.random.normal(k_input, (2, 3, 16, 16), jnp.float32)   # NCHW input
    # torch.randn_like-equivalent reparametrization noise; generated host-side
    # for determinism at this tiny size (at scale, draw it in-kernel with
    # pltpu.prng_seed / pltpu.prng_random_bits instead).
    eps = jax.random.normal(k_eps, (2, CONFIG["hidden"]), jnp.float32)

    z, mean, logvar = encoder_forward(params, x, eps, CONFIG)
    jax.block_until_ready((z, mean, logvar))

    assert z.shape == (2, CONFIG["hidden"])
    assert mean.shape == (2, CONFIG["hidden"])
    assert logvar.shape == (2, CONFIG["hidden"])
    print("KERNEL_OK")
</pallas_src>

<mosaic_0001>
module attributes {stable_mosaic.version = 11 : i64} {
  func.func @kernel(%arg0: i32, %arg1: memref<1x324x27xf32, #tpu.memory_space<vmem>>, %arg2: memref<27x8xf32, #tpu.memory_space<vmem>>, %arg3: memref<1x8xf32, #tpu.memory_space<vmem>>, %arg4: memref<3x24x16xf32, #tpu.memory_space<vmem>>, %arg5: memref<1x16xf32, #tpu.memory_space<vmem>>, %arg6: memref<3x48x32xf32, #tpu.memory_space<vmem>>, %arg7: memref<1x32xf32, #tpu.memory_space<vmem>>, %arg8: memref<324x1xf32, #tpu.memory_space<vmem>>, %arg9: memref<100x324xf32, #tpu.memory_space<vmem>>, %arg10: memref<16x32x64xf32, #tpu.memory_space<vmem>>, %arg11: memref<1x64xf32, #tpu.memory_space<vmem>>, %arg12: memref<1x1x32xf32, #tpu.memory_space<vmem>>, %arg13: memref<1x1x32xf32, #tpu.memory_space<vmem>>, %arg14: memref<1x1x32xf32, #tpu.memory_space<vmem>>, %arg15: memref<1x1x32xf32, #tpu.memory_space<vmem>>, %arg16: memref<360x24xf32, #tpu.memory_space<vmem>>, %arg17: memref<120x48xf32, #tpu.memory_space<vmem>>) attributes {dimension_semantics = [#tpu.dimension_semantics<parallel>], iteration_bounds = array<i64: 2>, scalar_prefetch = 0 : i64, scratch_operands = 2 : i64, tpu.core_type = #tpu.core_type<tc>, window_params = [{transform_indices = @transform_0, window_bounds = array<i64: 1, 324, 27>}, {pipeline_mode = #tpu.pipeline_mode<synchronous>, transform_indices = @transform_1, window_bounds = array<i64: 27, 8>}, {pipeline_mode = #tpu.pipeline_mode<synchronous>, transform_indices = @transform_2, window_bounds = array<i64: 1, 8>}, {pipeline_mode = #tpu.pipeline_mode<synchronous>, transform_indices = @transform_3, window_bounds = array<i64: 3, 24, 16>}, {pipeline_mode = #tpu.pipeline_mode<synchronous>, transform_indices = @transform_4, window_bounds = array<i64: 1, 16>}, {pipeline_mode = #tpu.pipeline_mode<synchronous>, transform_indices = @transform_5, window_bounds = array<i64: 3, 48, 32>}, {pipeline_mode = #tpu.pipeline_mode<synchronous>, transform_indices = @transform_6, window_bounds = array<i64: 1, 32>}, {pipeline_mode = #tpu.pipeline_mode<synchronous>, transform_indices = @transform_7, window_bounds = array<i64: 324, 1>}, {pipeline_mode = #tpu.pipeline_mode<synchronous>, transform_indices = @transform_8, window_bounds = array<i64: 100, 324>}, {pipeline_mode = #tpu.pipeline_mode<synchronous>, transform_indices = @transform_9, window_bounds = array<i64: 16, 32, 64>}, {pipeline_mode = #tpu.pipeline_mode<synchronous>, transform_indices = @transform_10, window_bounds = array<i64: 1, 64>}, {transform_indices = @transform_11, window_bounds = array<i64: 1, 1, 32>}, {transform_indices = @transform_12, window_bounds = array<i64: 1, 1, 32>}, {transform_indices = @transform_13, window_bounds = array<i64: 1, 1, 32>}, {transform_indices = @transform_14, window_bounds = array<i64: 1, 1, 32>}]} {
    %c0 = arith.constant 0 : index
    %c0_0 = arith.constant 0 : index
    %c0_1 = arith.constant 0 : index
    %0 = vector.load %arg1[%c0, %c0_0, %c0_1] : memref<1x324x27xf32, #tpu.memory_space<vmem>>, vector<1x324x27xf32>
    %1 = vector.shape_cast %0 : vector<1x324x27xf32> to vector<324x27xf32>
    %c0_2 = arith.constant 0 : index
    %c0_3 = arith.constant 0 : index
    %2 = vector.load %arg2[%c0_2, %c0_3] : memref<27x8xf32, #tpu.memory_space<vmem>>, vector<27x8xf32>
    %cst = arith.constant dense<0.000000e+00> : vector<324x8xf32>
    %3 = tpu.matmul %1, %2, %cst {dimension_numbers = #tpu.dot_dimension_numbers<[1], [0], [0], [1], [0, 0, 1, 1], [], []>} : vector<324x27xf32>, vector<27x8xf32>, vector<324x8xf32> -> vector<324x8xf32>
    %c0_4 = arith.constant 0 : index
    %c0_5 = arith.constant 0 : index
    %4 = vector.load %arg3[%c0_4, %c0_5] : memref<1x8xf32, #tpu.memory_space<vmem>>, vector<1x8xf32>
    %5 = vector.broadcast %4 : vector<1x8xf32> to vector<324x8xf32>
    %6 = arith.addf %3, %5 : vector<324x8xf32>
    %c0_6 = arith.constant 0 : index
    %c0_7 = arith.constant 0 : index
    %7 = vector.load %arg8[%c0_6, %c0_7] : memref<324x1xf32, #tpu.memory_space<vmem>>, vector<324x1xf32>
    %8 = vector.broadcast %7 : vector<324x1xf32> to vector<324x8xf32>
    %9 = arith.mulf %6, %8 : vector<324x8xf32>
    %cst_8 = arith.constant 0.000000e+00 : f32
    %10 = vector.broadcast %cst_8 : f32 to vector<360x24xf32>
    %c0_9 = arith.constant 0 : index
    %c0_10 = arith.constant 0 : index
    %11 = vector.load %arg16[%c0_9, %c0_10] : memref<360x24xf32, #tpu.memory_space<vmem>>, vector<360x24xf32>
    tpu.vector_store %arg16[%c0_9, %c0_10], %10 {strides = array<i32>} : memref<360x24xf32, #tpu.memory_space<vmem>>, vector<360x24xf32>,
    %c19 = arith.constant 19 : index
    %c0_11 = arith.constant 0 : index
    %12 = vector.load %arg16[%c19, %c0_11] : memref<360x24xf32, #tpu.memory_space<vmem>>, vector<324x8xf32>
    tpu.vector_store %arg16[%c19, %c0_11], %9 {strides = array<i32>} : memref<360x24xf32, #tpu.memory_space<vmem>>, vector<324x8xf32>,
    %c18 = arith.constant 18 : index
    %c8 = arith.constant 8 : index
    %13 = vector.load %arg16[%c18, %c8] : memref<360x24xf32, #tpu.memory_space<vmem>>, vector<324x8xf32>
    tpu.vector_store %arg16[%c18, %c8], %9 {strides = array<i32>} : memref<360x24xf32, #tpu.memory_space<vmem>>, vector<324x8xf32>,
    %c17 = arith.constant 17 : index
    %c16 = arith.constant 16 : index
    %14 = vector.load %arg16[%c17, %c16] : memref<360x24xf32, #tpu.memory_space<vmem>>, vector<324x8xf32>
    tpu.vector_store %arg16[%c17, %c16], %9 {strides = array<i32>} : memref<360x24xf32, #tpu.memory_space<vmem>>, vector<324x8xf32>,
    %c0_12 = arith.constant 0 : index
    %c0_13 = arith.constant 0 : index
    %15 = vector.load %arg5[%c0_12, %c0_13] : memref<1x16xf32, #tpu.memory_space<vmem>>, vector<1x16xf32>
    %c0_14 = arith.constant 0 : index
    %c0_15 = arith.constant 0 : index
    %16 = vector.load %arg16[%c0_14, %c0_15] : memref<360x24xf32, #tpu.memory_space<vmem>>, vector<324x24xf32>
    %c0_16 = arith.constant 0 : index
    %c0_17 = arith.constant 0 : index
    %c0_18 = arith.constant 0 : index
    %17 = vector.load %arg4[%c0_16, %c0_17, %c0_18] : memref<3x24x16xf32, #tpu.memory_space<vmem>>, vector<1x24x16xf32>
    %18 = vector.shape_cast %17 : vector<1x24x16xf32> to vector<24x16xf32>
    %cst_19 = arith.constant dense<0.000000e+00> : vector<324x16xf32>
    %19 = tpu.matmul %16, %18, %cst_19 {dimension_numbers = #tpu.dot_dimension_numbers<[1], [0], [0], [1], [0, 0, 1, 1], [], []>} : vector<324x24xf32>, vector<24x16xf32>, vector<324x16xf32> -> vector<324x16xf32>
    %20 = vector.broadcast %15 : vector<1x16xf32> to vector<324x16xf32>
    %21 = arith.addf %20, %19 : vector<324x16xf32>
    %c18_20 = arith.constant 18 : index
    %c0_21 = arith.constant 0 : index
    %22 = vector.load %arg16[%c18_20, %c0_21] : memref<360x24xf32, #tpu.memory_space<vmem>>, vector<324x24xf32>
    %c1 = arith.constant 1 : index
    %c0_22 = arith.constant 0 : index
    %c0_23 = arith.constant 0 : index
    %23 = vector.load %arg4[%c1, %c0_22, %c0_23] : memref<3x24x16xf32, #tpu.memory_space<vmem>>, vector<1x24x16xf32>
    %24 = vector.shape_cast %23 : vector<1x24x16xf32> to vector<24x16xf32>
    %cst_24 = arith.constant dense<0.000000e+00> : vector<324x16xf32>
    %25 = tpu.matmul %22, %24, %cst_24 {dimension_numbers = #tpu.dot_dimension_numbers<[1], [0], [0], [1], [0, 0, 1, 1], [], []>} : vector<324x24xf32>, vector<24x16xf32>, vector<324x16xf32> -> vector<324x16xf32>
    %26 = arith.addf %21, %25 : vector<324x16xf32>
    %c36 = arith.constant 36 : index
    %c0_25 = arith.constant 0 : index
    %27 = vector.load %arg16[%c36, %c0_25] : memref<360x24xf32, #tpu.memory_space<vmem>>, vector<324x24xf32>
    %c2 = arith.constant 2 : index
    %c0_26 = arith.constant 0 : index
    %c0_27 = arith.constant 0 : index
    %28 = vector.load %arg4[%c2, %c0_26, %c0_27] : memref<3x24x16xf32, #tpu.memory_space<vmem>>, vector<1x24x16xf32>
    %29 = vector.shape_cast %28 : vector<1x24x16xf32> to vector<24x16xf32>
    %cst_28 = arith.constant dense<0.000000e+00> : vector<324x16xf32>
    %30 = tpu.matmul %27, %29, %cst_28 {dimension_numbers = #tpu.dot_dimension_numbers<[1], [0], [0], [1], [0, 0, 1, 1], [], []>} : vector<324x24xf32>, vector<24x16xf32>, vector<324x16xf32> -> vector<324x16xf32>
    %31 = arith.addf %26, %30 : vector<324x16xf32>
    %cst_29 = arith.constant 0.000000e+00 : f32
    %32 = vector.broadcast %cst_29 : f32 to vector<324x16xf32>
    %33 = arith.maximumf %31, %32 : vector<324x16xf32>
    %c0_30 = arith.constant 0 : index
    %c0_31 = arith.constant 0 : index
    %34 = vector.load %arg9[%c0_30, %c0_31] : memref<100x324xf32, #tpu.memory_space<vmem>>, vector<100x324xf32>
    %cst_32 = arith.constant dense<0.000000e+00> : vector<100x16xf32>
    %35 = tpu.matmul %34, %33, %cst_32 {dimension_numbers = #tpu.dot_dimension_numbers<[1], [0], [0], [1], [0, 0, 1, 1], [], []>} : vector<100x324xf32>, vector<324x16xf32>, vector<100x16xf32> -> vector<100x16xf32>
    %cst_33 = arith.constant 0.000000e+00 : f32
    %36 = vector.broadcast %cst_33 : f32 to vector<120x48xf32>
    %c0_34 = arith.constant 0 : index
    %c0_35 = arith.constant 0 : index
    %37 = vector.load %arg17[%c0_34, %c0_35] : memref<120x48xf32, #tpu.memory_space<vmem>>, vector<120x48xf32>
    tpu.vector_store %arg17[%c0_34, %c0_35], %36 {strides = array<i32>} : memref<120x48xf32, #tpu.memory_space<vmem>>, vector<120x48xf32>,
    %c11 = arith.constant 11 : index
    %c0_36 = arith.constant 0 : index
    %38 = vector.load %arg17[%c11, %c0_36] : memref<120x48xf32, #tpu.memory_space<vmem>>, vector<100x16xf32>
    tpu.vector_store %arg17[%c11, %c0_36], %35 {strides = array<i32>} : memref<120x48xf32, #tpu.memory_space<vmem>>, vector<100x16xf32>,
    %c10 = arith.constant 10 : index
    %c16_37 = arith.constant 16 : index
    %39 = vector.load %arg17[%c10, %c16_37] : memref<120x48xf32, #tpu.memory_space<vmem>>, vector<100x16xf32>
    tpu.vector_store %arg17[%c10, %c16_37], %35 {strides = array<i32>} : memref<120x48xf32, #tpu.memory_space<vmem>>, vector<100x16xf32>,
    %c9 = arith.constant 9 : index
    %c32 = arith.constant 32 : index
    %40 = vector.load %arg17[%c9, %c32] : memref<120x48xf32, #tpu.memory_space<vmem>>, vector<100x16xf32>
    tpu.vector_store %arg17[%c9, %c32], %35 {strides = array<i32>} : memref<120x48xf32, #tpu.memory_space<vmem>>, vector<100x16xf32>,
    %c0_38 = arith.constant 0 : index
    %c0_39 = arith.constant 0 : index
    %41 = vector.load %arg7[%c0_38, %c0_39] : memref<1x32xf32, #tpu.memory_space<vmem>>, vector<1x32xf32>
    %c0_40 = arith.constant 0 : index
    %c0_41 = arith.constant 0 : index
    %42 = vector.load %arg17[%c0_40, %c0_41] : memref<120x48xf32, #tpu.memory_space<vmem>>, vector<100x48xf32>
    %c0_42 = arith.constant 0 : index
    %c0_43 = arith.constant 0 : index
    %c0_44 = arith.constant 0 : index
    %43 = vector.load %arg6[%c0_42, %c0_43, %c0_44] : memref<3x48x32xf32, #tpu.memory_space<vmem>>, vector<1x48x32xf32>
    %44 = vector.shape_cast %43 : vector<1x48x32xf32> to vector<48x32xf32>
    %cst_45 = arith.constant dense<0.000000e+00> : vector<100x32xf32>
    %45 = tpu.matmul %42, %44, %cst_45 {dimension_numbers = #tpu.dot_dimension_numbers<[1], [0], [0], [1], [0, 0, 1, 1], [], []>} : vector<100x48xf32>, vector<48x32xf32>, vector<100x32xf32> -> vector<100x32xf32>
    %46 = vector.broadcast %41 : vector<1x32xf32> to vector<100x32xf32>
    %47 = arith.addf %46, %45 : vector<100x32xf32>
    %c10_46 = arith.constant 10 : index
    %c0_47 = arith.constant 0 : index
    %48 = vector.load %arg17[%c10_46, %c0_47] : memref<120x48xf32, #tpu.memory_space<vmem>>, vector<100x48xf32>
    %c1_48 = arith.constant 1 : index
    %c0_49 = arith.constant 0 : index
    %c0_50 = arith.constant 0 : index
    %49 = vector.load %arg6[%c1_48, %c0_49, %c0_50] : memref<3x48x32xf32, #tpu.memory_space<vmem>>, vector<1x48x32xf32>
    %50 = vector.shape_cast %49 : vector<1x48x32xf32> to vector<48x32xf32>
    %cst_51 = arith.constant dense<0.000000e+00> : vector<100x32xf32>
    %51 = tpu.matmul %48, %50, %cst_51 {dimension_numbers = #tpu.dot_dimension_numbers<[1], [0], [0], [1], [0, 0, 1, 1], [], []>} : vector<100x48xf32>, vector<48x32xf32>, vector<100x32xf32> -> vector<100x32xf32>
    %52 = arith.addf %47, %51 : vector<100x32xf32>
    %c20 = arith.constant 20 : index
    %c0_52 = arith.constant 0 : index
    %53 = vector.load %arg17[%c20, %c0_52] : memref<120x48xf32, #tpu.memory_space<vmem>>, vector<100x48xf32>
    %c2_53 = arith.constant 2 : index
    %c0_54 = arith.constant 0 : index
    %c0_55 = arith.constant 0 : index
    %54 = vector.load %arg6[%c2_53, %c0_54, %c0_55] : memref<3x48x32xf32, #tpu.memory_space<vmem>>, vector<1x48x32xf32>
    %55 = vector.shape_cast %54 : vector<1x48x32xf32> to vector<48x32xf32>
    %cst_56 = arith.constant dense<0.000000e+00> : vector<100x32xf32>
    %56 = tpu.matmul %53, %55, %cst_56 {dimension_numbers = #tpu.dot_dimension_numbers<[1], [0], [0], [1], [0, 0, 1, 1], [], []>} : vector<100x48xf32>, vector<48x32xf32>, vector<100x32xf32> -> vector<100x32xf32>
    %57 = arith.addf %52, %56 : vector<100x32xf32>
    %cst_57 = arith.constant 0.000000e+00 : f32
    %58 = vector.broadcast %cst_57 : f32 to vector<100x32xf32>
    %59 = arith.maximumf %57, %58 : vector<100x32xf32>
    %c0_58 = arith.constant 0 : index
    %c0_59 = arith.constant 0 : index
    %60 = vector.load %arg11[%c0_58, %c0_59] : memref<1x64xf32, #tpu.memory_space<vmem>>, vector<1x64xf32>
    %61 = vector.extract_strided_slice %59 {offsets = [11, 0], sizes = [1, 32], strides = [1, 1]} : vector<100x32xf32> to vector<1x32xf32>
    %c0_60 = arith.constant 0 : index
    %c0_61 = arith.constant 0 : index
    %c0_62 = arith.constant 0 : index
    %62 = vector.load %arg10[%c0_60, %c0_61, %c0_62] : memref<16x32x64xf32, #tpu.memory_space<vmem>>, vector<1x32x64xf32>
    %63 = vector.shape_cast %62 : vector<1x32x64xf32> to vector<32x64xf32>
    %cst_63 = arith.constant dense<0.000000e+00> : vector<1x64xf32>
    %64 = tpu.matmul %61, %63, %cst_63 {dimension_numbers = #tpu.dot_dimension_numbers<[1], [0], [0], [1], [0, 0, 1, 1], [], []>} : vector<1x32xf32>, vector<32x64xf32>, vector<1x64xf32> -> vector<1x64xf32>
    %65 = arith.addf %60, %64 : vector<1x64xf32>
    %66 = vector.extract_strided_slice %59 {offsets = [13, 0], sizes = [1, 32], strides = [1, 1]} : vector<100x32xf32> to vector<1x32xf32>
    %c1_64 = arith.constant 1 : index
    %c0_65 = arith.constant 0 : index
    %c0_66 = arith.constant 0 : index
    %67 = vector.load %arg10[%c1_64, %c0_65, %c0_66] : memref<16x32x64xf32, #tpu.memory_space<vmem>>, vector<1x32x64xf32>
    %68 = vector.shape_cast %67 : vector<1x32x64xf32> to vector<32x64xf32>
    %cst_67 = arith.constant dense<0.000000e+00> : vector<1x64xf32>
    %69 = tpu.matmul %66, %68, %cst_67 {dimension_numbers = #tpu.dot_dimension_numbers<[1], [0], [0], [1], [0, 0, 1, 1], [], []>} : vector<1x32xf32>, vector<32x64xf32>, vector<1x64xf32> -> vector<1x64xf32>
    %70 = arith.addf %65, %69 : vector<1x64xf32>
    %71 = vector.extract_strided_slice %59 {offsets = [15, 0], sizes = [1, 32], strides = [1, 1]} : vector<100x32xf32> to vector<1x32xf32>
    %c2_68 = arith.constant 2 : index
    %c0_69 = arith.constant 0 : index
    %c0_70 = arith.constant 0 : index
    %72 = vector.load %arg10[%c2_68, %c0_69, %c0_70] : memref<16x32x64xf32, #tpu.memory_space<vmem>>, vector<1x32x64xf32>
    %73 = vector.shape_cast %72 : vector<1x32x64xf32> to vector<32x64xf32>
    %cst_71 = arith.constant dense<0.000000e+00> : vector<1x64xf32>
    %74 = tpu.matmul %71, %73, %cst_71 {dimension_numbers = #tpu.dot_dimension_numbers<[1], [0], [0], [1], [0, 0, 1, 1], [], []>} : vector<1x32xf32>, vector<32x64xf32>, vector<1x64xf32> -> vector<1x64xf32>
    %75 = arith.addf %70, %74 : vector<1x64xf32>
    %76 = vector.extract_strided_slice %59 {offsets = [17, 0], sizes = [1, 32], strides = [1, 1]} : vector<100x32xf32> to vector<1x32xf32>
    %c3 = arith.constant 3 : index
    %c0_72 = arith.constant 0 : index
    %c0_73 = arith.constant 0 : index
    %77 = vector.load %arg10[%c3, %c0_72, %c0_73] : memref<16x32x64xf32, #tpu.memory_space<vmem>>, vector<1x32x64xf32>
    %78 = vector.shape_cast %77 : vector<1x32x64xf32> to vector<32x64xf32>
    %cst_74 = arith.constant dense<0.000000e+00> : vector<1x64xf32>
    %79 = tpu.matmul %76, %78, %cst_74 {dimension_numbers = #tpu.dot_dimension_numbers<[1], [0], [0], [1], [0, 0, 1, 1], [], []>} : vector<1x32xf32>, vector<32x64xf32>, vector<1x64xf32> -> vector<1x64xf32>
    %80 = arith.addf %75, %79 : vector<1x64xf32>
    %81 = vector.extract_strided_slice %59 {offsets = [31, 0], sizes = [1, 32], strides = [1, 1]} : vector<100x32xf32> to vector<1x32xf32>
    %c4 = arith.constant 4 : index
    %c0_75 = arith.constant 0 : index
    %c0_76 = arith.constant 0 : index
    %82 = vector.load %arg10[%c4, %c0_75, %c0_76] : memref<16x32x64xf32, #tpu.memory_space<vmem>>, vector<1x32x64xf32>
    %83 = vector.shape_cast %82 : vector<1x32x64xf32> to vector<32x64xf32>
    %cst_77 = arith.constant dense<0.000000e+00> : vector<1x64xf32>
    %84 = tpu.matmul %81, %83, %cst_77 {dimension_numbers = #tpu.dot_dimension_numbers<[1], [0], [0], [1], [0, 0, 1, 1], [], []>} : vector<1x32xf32>, vector<32x64xf32>, vector<1x64xf32> -> vector<1x64xf32>
    %85 = arith.addf %80, %84 : vector<1x64xf32>
    %86 = vector.extract_strided_slice %59 {offsets = [33, 0], sizes = [1, 32], strides = [1, 1]} : vector<100x32xf32> to vector<1x32xf32>
    %c5 = arith.constant 5 : index
    %c0_78 = arith.constant 0 : index
    %c0_79 = arith.constant 0 : index
    %87 = vector.load %arg10[%c5, %c0_78, %c0_79] : memref<16x32x64xf32, #tpu.memory_space<vmem>>, vector<1x32x64xf32>
    %88 = vector.shape_cast %87 : vector<1x32x64xf32> to vector<32x64xf32>
    %cst_80 = arith.constant dense<0.000000e+00> : vector<1x64xf32>
    %89 = tpu.matmul %86, %88, %cst_80 {dimension_numbers = #tpu.dot_dimension_numbers<[1], [0], [0], [1], [0, 0, 1, 1], [], []>} : vector<1x32xf32>, vector<32x64xf32>, vector<1x64xf32> -> vector<1x64xf32>
    %90 = arith.addf %85, %89 : vector<1x64xf32>
    %91 = vector.extract_strided_slice %59 {offsets = [35, 0], sizes = [1, 32], strides = [1, 1]} : vector<100x32xf32> to vector<1x32xf32>
    %c6 = arith.constant 6 : index
    %c0_81 = arith.constant 0 : index
    %c0_82 = arith.constant 0 : index
    %92 = vector.load %arg10[%c6, %c0_81, %c0_82] : memref<16x32x64xf32, #tpu.memory_space<vmem>>, vector<1x32x64xf32>
    %93 = vector.shape_cast %92 : vector<1x32x64xf32> to vector<32x64xf32>
    %cst_83 = arith.constant dense<0.000000e+00> : vector<1x64xf32>
    %94 = tpu.matmul %91, %93, %cst_83 {dimension_numbers = #tpu.dot_dimension_numbers<[1], [0], [0], [1], [0, 0, 1, 1], [], []>} : vector<1x32xf32>, vector<32x64xf32>, vector<1x64xf32> -> vector<1x64xf32>
    %95 = arith.addf %90, %94 : vector<1x64xf32>
    %96 = vector.extract_strided_slice %59 {offsets = [37, 0], sizes = [1, 32], strides = [1, 1]} : vector<100x32xf32> to vector<1x32xf32>
    %c7 = arith.constant 7 : index
    %c0_84 = arith.constant 0 : index
    %c0_85 = arith.constant 0 : index
    %97 = vector.load %arg10[%c7, %c0_84, %c0_85] : memref<16x32x64xf32, #tpu.memory_space<vmem>>, vector<1x32x64xf32>
    %98 = vector.shape_cast %97 : vector<1x32x64xf32> to vector<32x64xf32>
    %cst_86 = arith.constant dense<0.000000e+00> : vector<1x64xf32>
    %99 = tpu.matmul %96, %98, %cst_86 {dimension_numbers = #tpu.dot_dimension_numbers<[1], [0], [0], [1], [0, 0, 1, 1], [], []>} : vector<1x32xf32>, vector<32x64xf32>, vector<1x64xf32> -> vector<1x64xf32>
    %100 = arith.addf %95, %99 : vector<1x64xf32>
    %101 = vector.extract_strided_slice %59 {offsets = [51, 0], sizes = [1, 32], strides = [1, 1]} : vector<100x32xf32> to vector<1x32xf32>
    %c8_87 = arith.constant 8 : index
    %c0_88 = arith.constant 0 : index
    %c0_89 = arith.constant 0 : index
    %102 = vector.load %arg10[%c8_87, %c0_88, %c0_89] : memref<16x32x64xf32, #tpu.memory_space<vmem>>, vector<1x32x64xf32>
    %103 = vector.shape_cast %102 : vector<1x32x64xf32> to vector<32x64xf32>
    %cst_90 = arith.constant dense<0.000000e+00> : vector<1x64xf32>
    %104 = tpu.matmul %101, %103, %cst_90 {dimension_numbers = #tpu.dot_dimension_numbers<[1], [0], [0], [1], [0, 0, 1, 1], [], []>} : vector<1x32xf32>, vector<32x64xf32>, vector<1x64xf32> -> vector<1x64xf32>
    %105 = arith.addf %100, %104 : vector<1x64xf32>
    %106 = vector.extract_strided_slice %59 {offsets = [53, 0], sizes = [1, 32], strides = [1, 1]} : vector<100x32xf32> to vector<1x32xf32>
    %c9_91 = arith.constant 9 : index
    %c0_92 = arith.constant 0 : index
    %c0_93 = arith.constant 0 : index
    %107 = vector.load %arg10[%c9_91, %c0_92, %c0_93] : memref<16x32x64xf32, #tpu.memory_space<vmem>>, vector<1x32x64xf32>
    %108 = vector.shape_cast %107 : vector<1x32x64xf32> to vector<32x64xf32>
    %cst_94 = arith.constant dense<0.000000e+00> : vector<1x64xf32>
    %109 = tpu.matmul %106, %108, %cst_94 {dimension_numbers = #tpu.dot_dimension_numbers<[1], [0], [0], [1], [0, 0, 1, 1], [], []>} : vector<1x32xf32>, vector<32x64xf32>, vector<1x64xf32> -> vector<1x64xf32>
    %110 = arith.addf %105, %109 : vector<1x64xf32>
    %111 = vector.extract_strided_slice %59 {offsets = [55, 0], sizes = [1, 32], strides = [1, 1]} : vector<100x32xf32> to vector<1x32xf32>
    %c10_95 = arith.constant 10 : index
    %c0_96 = arith.constant 0 : index
    %c0_97 = arith.constant 0 : index
    %112 = vector.load %arg10[%c10_95, %c0_96, %c0_97] : memref<16x32x64xf32, #tpu.memory_space<vmem>>, vector<1x32x64xf32>
    %113 = vector.shape_cast %112 : vector<1x32x64xf32> to vector<32x64xf32>
    %cst_98 = arith.constant dense<0.000000e+00> : vector<1x64xf32>
    %114 = tpu.matmul %111, %113, %cst_98 {dimension_numbers = #tpu.dot_dimension_numbers<[1], [0], [0], [1], [0, 0, 1, 1], [], []>} : vector<1x32xf32>, vector<32x64xf32>, vector<1x64xf32> -> vector<1x64xf32>
    %115 = arith.addf %110, %114 : vector<1x64xf32>
    %116 = vector.extract_strided_slice %59 {offsets = [57, 0], sizes = [1, 32], strides = [1, 1]} : vector<100x32xf32> to vector<1x32xf32>
    %c11_99 = arith.constant 11 : index
    %c0_100 = arith.constant 0 : index
    %c0_101 = arith.constant 0 : index
    %117 = vector.load %arg10[%c11_99, %c0_100, %c0_101] : memref<16x32x64xf32, #tpu.memory_space<vmem>>, vector<1x32x64xf32>
    %118 = vector.shape_cast %117 : vector<1x32x64xf32> to vector<32x64xf32>
    %cst_102 = arith.constant dense<0.000000e+00> : vector<1x64xf32>
    %119 = tpu.matmul %116, %118, %cst_102 {dimension_numbers = #tpu.dot_dimension_numbers<[1], [0], [0], [1], [0, 0, 1, 1], [], []>} : vector<1x32xf32>, vector<32x64xf32>, vector<1x64xf32> -> vector<1x64xf32>
    %120 = arith.addf %115, %119 : vector<1x64xf32>
    %121 = vector.extract_strided_slice %59 {offsets = [71, 0], sizes = [1, 32], strides = [1, 1]} : vector<100x32xf32> to vector<1x32xf32>
    %c12 = arith.constant 12 : index
    %c0_103 = arith.constant 0 : index
    %c0_104 = arith.constant 0 : index
    %122 = vector.load %arg10[%c12, %c0_103, %c0_104] : memref<16x32x64xf32, #tpu.memory_space<vmem>>, vector<1x32x64xf32>
    %123 = vector.shape_cast %122 : vector<1x32x64xf32> to vector<32x64xf32>
    %cst_105 = arith.constant dense<0.000000e+00> : vector<1x64xf32>
    %124 = tpu.matmul %121, %123, %cst_105 {dimension_numbers = #tpu.dot_dimension_numbers<[1], [0], [0], [1], [0, 0, 1, 1], [], []>} : vector<1x32xf32>, vector<32x64xf32>, vector<1x64xf32> -> vector<1x64xf32>
    %125 = arith.addf %120, %124 : vector<1x64xf32>
    %126 = vector.extract_strided_slice %59 {offsets = [73, 0], sizes = [1, 32], strides = [1, 1]} : vector<100x32xf32> to vector<1x32xf32>
    %c13 = arith.constant 13 : index
    %c0_106 = arith.constant 0 : index
    %c0_107 = arith.constant 0 : index
    %127 = vector.load %arg10[%c13, %c0_106, %c0_107] : memref<16x32x64xf32, #tpu.memory_space<vmem>>, vector<1x32x64xf32>
    %128 = vector.shape_cast %127 : vector<1x32x64xf32> to vector<32x64xf32>
    %cst_108 = arith.constant dense<0.000000e+00> : vector<1x64xf32>
    %129 = tpu.matmul %126, %128, %cst_108 {dimension_numbers = #tpu.dot_dimension_numbers<[1], [0], [0], [1], [0, 0, 1, 1], [], []>} : vector<1x32xf32>, vector<32x64xf32>, vector<1x64xf32> -> vector<1x64xf32>
    %130 = arith.addf %125, %129 : vector<1x64xf32>
    %131 = vector.extract_strided_slice %59 {offsets = [75, 0], sizes = [1, 32], strides = [1, 1]} : vector<100x32xf32> to vector<1x32xf32>
    %c14 = arith.constant 14 : index
    %c0_109 = arith.constant 0 : index
    %c0_110 = arith.constant 0 : index
    %132 = vector.load %arg10[%c14, %c0_109, %c0_110] : memref<16x32x64xf32, #tpu.memory_space<vmem>>, vector<1x32x64xf32>
    %133 = vector.shape_cast %132 : vector<1x32x64xf32> to vector<32x64xf32>
    %cst_111 = arith.constant dense<0.000000e+00> : vector<1x64xf32>
    %134 = tpu.matmul %131, %133, %cst_111 {dimension_numbers = #tpu.dot_dimension_numbers<[1], [0], [0], [1], [0, 0, 1, 1], [], []>} : vector<1x32xf32>, vector<32x64xf32>, vector<1x64xf32> -> vector<1x64xf32>
    %135 = arith.addf %130, %134 : vector<1x64xf32>
    %136 = vector.extract_strided_slice %59 {offsets = [77, 0], sizes = [1, 32], strides = [1, 1]} : vector<100x32xf32> to vector<1x32xf32>
    %c15 = arith.constant 15 : index
    %c0_112 = arith.constant 0 : index
    %c0_113 = arith.constant 0 : index
    %137 = vector.load %arg10[%c15, %c0_112, %c0_113] : memref<16x32x64xf32, #tpu.memory_space<vmem>>, vector<1x32x64xf32>
    %138 = vector.shape_cast %137 : vector<1x32x64xf32> to vector<32x64xf32>
    %cst_114 = arith.constant dense<0.000000e+00> : vector<1x64xf32>
    %139 = tpu.matmul %136, %138, %cst_114 {dimension_numbers = #tpu.dot_dimension_numbers<[1], [0], [0], [1], [0, 0, 1, 1], [], []>} : vector<1x32xf32>, vector<32x64xf32>, vector<1x64xf32> -> vector<1x64xf32>
    %140 = arith.addf %135, %139 : vector<1x64xf32>
    %141 = vector.extract_strided_slice %140 {offsets = [0, 0], sizes = [1, 32], strides = [1, 1]} : vector<1x64xf32> to vector<1x32xf32>
    %142 = vector.extract_strided_slice %140 {offsets = [0, 32], sizes = [1, 32], strides = [1, 1]} : vector<1x64xf32> to vector<1x32xf32>
    %c0_115 = arith.constant 0 : index
    %c0_116 = arith.constant 0 : index
    %c0_117 = arith.constant 0 : index
    %143 = vector.load %arg12[%c0_115, %c0_116, %c0_117] : memref<1x1x32xf32, #tpu.memory_space<vmem>>, vector<1x1x32xf32>
    %144 = vector.shape_cast %143 : vector<1x1x32xf32> to vector<1x32xf32>
    %cst_118 = arith.constant 5.000000e-01 : f32
    %145 = vector.broadcast %cst_118 : f32 to vector<1x32xf32>
    %146 = arith.mulf %145, %142 : vector<1x32xf32>
    %147 = math.exp %146 : vector<1x32xf32>
    %148 = arith.mulf %144, %147 : vector<1x32xf32>
    %149 = arith.addf %141, %148 : vector<1x32xf32>
    %c0_119 = arith.constant 0 : index
    %c0_120 = arith.constant 0 : index
    %c0_121 = arith.constant 0 : index
    %150 = vector.load %arg13[%c0_119, %c0_120, %c0_121] : memref<1x1x32xf32, #tpu.memory_space<vmem>>, vector<1x1x32xf32>
    %151 = vector.shape_cast %150 : vector<1x1x32xf32> to vector<1x32xf32>
    %152 = vector.shape_cast %149 : vector<1x32xf32> to vector<1x1x32xf32>
    tpu.vector_store %arg13[%c0_119, %c0_120, %c0_121], %152 {strides = array<i32>} : memref<1x1x32xf32, #tpu.memory_space<vmem>>, vector<1x1x32xf32>,
    %c0_122 = arith.constant 0 : index
    %c0_123 = arith.constant 0 : index
    %c0_124 = arith.constant 0 : index
    %153 = vector.load %arg14[%c0_122, %c0_123, %c0_124] : memref<1x1x32xf32, #tpu.memory_space<vmem>>, vector<1x1x32xf32>
    %154 = vector.shape_cast %153 : vector<1x1x32xf32> to vector<1x32xf32>
    %155 = vector.shape_cast %141 : vector<1x32xf32> to vector<1x1x32xf32>
    tpu.vector_store %arg14[%c0_122, %c0_123, %c0_124], %155 {strides = array<i32>} : memref<1x1x32xf32, #tpu.memory_space<vmem>>, vector<1x1x32xf32>,
    %c0_125 = arith.constant 0 : index
    %c0_126 = arith.constant 0 : index
    %c0_127 = arith.constant 0 : index
    %156 = vector.load %arg15[%c0_125, %c0_126, %c0_127] : memref<1x1x32xf32, #tpu.memory_space<vmem>>, vector<1x1x32xf32>
    %157 = vector.shape_cast %156 : vector<1x1x32xf32> to vector<1x32xf32>
    %158 = vector.shape_cast %142 : vector<1x32xf32> to vector<1x1x32xf32>
    tpu.vector_store %arg15[%c0_125, %c0_126, %c0_127], %158 {strides = array<i32>} : memref<1x1x32xf32, #tpu.memory_space<vmem>>, vector<1x1x32xf32>,
    return
  }
  func.func @transform_0(%arg0: i32) -> (i32, i32, i32) {
    %c0_i32 = arith.constant 0 : i32
    %c0_i32_0 = arith.constant 0 : i32
    %c0_i32_1 = arith.constant 0 : i32
    return %arg0, %c0_i32, %c0_i32_0 : i32, i32, i32
  }
  func.func @transform_1(%arg0: i32) -> (i32, i32) {
    %c0_i32 = arith.constant 0 : i32
    %c0_i32_0 = arith.constant 0 : i32
    %c0_i32_1 = arith.constant 0 : i32
    return %c0_i32, %c0_i32_0 : i32, i32
  }
  func.func @transform_2(%arg0: i32) -> (i32, i32) {
    %c0_i32 = arith.constant 0 : i32
    %c0_i32_0 = arith.constant 0 : i32
    %c0_i32_1 = arith.constant 0 : i32
    return %c0_i32, %c0_i32_0 : i32, i32
  }
  func.func @transform_3(%arg0: i32) -> (i32, i32, i32) {
    %c0_i32 = arith.constant 0 : i32
    %c0_i32_0 = arith.constant 0 : i32
    %c0_i32_1 = arith.constant 0 : i32
    %c0_i32_2 = arith.constant 0 : i32
    return %c0_i32, %c0_i32_0, %c0_i32_1 : i32, i32, i32
  }
  func.func @transform_4(%arg0: i32) -> (i32, i32) {
    %c0_i32 = arith.constant 0 : i32
    %c0_i32_0 = arith.constant 0 : i32
    %c0_i32_1 = arith.constant 0 : i32
    return %c0_i32, %c0_i32_0 : i32, i32
  }
  func.func @transform_5(%arg0: i32) -> (i32, i32, i32) {
    %c0_i32 = arith.constant 0 : i32
    %c0_i32_0 = arith.constant 0 : i32
    %c0_i32_1 = arith.constant 0 : i32
    %c0_i32_2 = arith.constant 0 : i32
    return %c0_i32, %c0_i32_0, %c0_i32_1 : i32, i32, i32
  }
  func.func @transform_6(%arg0: i32) -> (i32, i32) {
    %c0_i32 = arith.constant 0 : i32
    %c0_i32_0 = arith.constant 0 : i32
    %c0_i32_1 = arith.constant 0 : i32
    return %c0_i32, %c0_i32_0 : i32, i32
  }
  func.func @transform_7(%arg0: i32) -> (i32, i32) {
    %c0_i32 = arith.constant 0 : i32
    %c0_i32_0 = arith.constant 0 : i32
    %c0_i32_1 = arith.constant 0 : i32
    return %c0_i32, %c0_i32_0 : i32, i32
  }
  func.func @transform_8(%arg0: i32) -> (i32, i32) {
    %c0_i32 = arith.constant 0 : i32
    %c0_i32_0 = arith.constant 0 : i32
    %c0_i32_1 = arith.constant 0 : i32
    return %c0_i32, %c0_i32_0 : i32, i32
  }
  func.func @transform_9(%arg0: i32) -> (i32, i32, i32) {
    %c0_i32 = arith.constant 0 : i32
    %c0_i32_0 = arith.constant 0 : i32
    %c0_i32_1 = arith.constant 0 : i32
    %c0_i32_2 = arith.constant 0 : i32
    return %c0_i32, %c0_i32_0, %c0_i32_1 : i32, i32, i32
  }
  func.func @transform_10(%arg0: i32) -> (i32, i32) {
    %c0_i32 = arith.constant 0 : i32
    %c0_i32_0 = arith.constant 0 : i32
    %c0_i32_1 = arith.constant 0 : i32
    return %c0_i32, %c0_i32_0 : i32, i32
  }
  func.func @transform_11(%arg0: i32) -> (i32, i32, i32) {
    %c0_i32 = arith.constant 0 : i32
    %c0_i32_0 = arith.constant 0 : i32
    %c0_i32_1 = arith.constant 0 : i32
    return %arg0, %c0_i32, %c0_i32_0 : i32, i32, i32
  }
  func.func @transform_12(%arg0: i32) -> (i32, i32, i32) {
    %c0_i32 = arith.constant 0 : i32
    %c0_i32_0 = arith.constant 0 : i32
    %c0_i32_1 = arith.constant 0 : i32
    return %arg0, %c0_i32, %c0_i32_0 : i32, i32, i32
  }
  func.func @transform_13(%arg0: i32) -> (i32, i32, i32) {
    %c0_i32 = arith.constant 0 : i32
    %c0_i32_0 = arith.constant 0 : i32
    %c0_i32_1 = arith.constant 0 : i32
    return %arg0, %c0_i32, %c0_i32_0 : i32, i32, i32
  }
  func.func @transform_14(%arg0: i32) -> (i32, i32, i32) {
    %c0_i32 = arith.constant 0 : i32
    %c0_i32_0 = arith.constant 0 : i32
    %c0_i32_1 = arith.constant 0 : i32
    return %arg0, %c0_i32, %c0_i32_0 : i32, i32, i32
  }
}

</mosaic_0001>

<bundles_post_ra>
// kernel: tpu_custom_call.1
= control target key start
LH: loop header
LB: loop body
LE: loop exit
PB: predicated region body
PF: predicated region fallthrough
CT: control target
= control target key end

     0   :  { %s10292_s0 = inlined_call_operand.vmem [shape: f32[2,324,27], index: 0, kind: input, shape index: {}]   ;;  %s10293_s1 = inlined_call_operand.vmem [shape: f32[27,8], index: 1, kind: input, shape index: {}]   ;;  %s10294_s2 = inlined_call_operand.vmem [shape: f32[1,8], index: 2, kind: input, shape index: {}]   ;;  %s10295_s3 = inlined_call_operand.vmem [shape: f32[3,24,16], index: 3, kind: input, shape index: {}]   ;;  %s10296_s4 = inlined_call_operand.vmem [shape: f32[1,16], index: 4, kind: input, shape index: {}]   ;;  %s10297_s5 = inlined_call_operand.vmem [shape: f32[3,48,32], index: 5, kind: input, shape index: {}]   ;;  %s10298_s6 = inlined_call_operand.vmem [shape: f32[1,32], index: 6, kind: input, shape index: {}]   ;;  %s10299_s7 = inlined_call_operand.vmem [shape: f32[324,1], index: 7, kind: input, shape index: {}]   ;;  %s10300_s8 = inlined_call_operand.vmem [shape: f32[100,324], index: 8, kind: input, shape index: {}]   ;;  %s10301_s9 = inlined_call_operand.vmem [shape: f32[16,32,64], index: 9, kind: input, shape index: {}]   ;;  %s10302_s10 = inlined_call_operand.vmem [shape: f32[1,64], index: 10, kind: input, shape index: {}]   ;;  %s10303_s11 = inlined_call_operand.vmem [shape: f32[2,1,32], index: 11, kind: input, shape index: {}]   ;;  %s10304_s12 = inlined_call_operand.hbm [shape: f32[2,1,32], index: 12, kind: output, shape index: {0}]   ;;  %s10305_s13 = inlined_call_operand.hbm [shape: f32[2,1,32], index: 13, kind: output, shape index: {1}]   ;;  %s10306_s14 = inlined_call_operand.hbm [shape: f32[2,1,32], index: 14, kind: output, shape index: {2}]  }
   0x1   :  { %10311 = sst [smem:[#allocation12_spill]] %s10292_s0 }
   0x2   :  { %10312 = sst [smem:[#allocation13_spill]] %s10293_s1 }
   0x3   :  { %10313 = sst [smem:[#allocation14_spill]] %s10294_s2 }
   0x4   :  { %10314 = sst [smem:[#allocation15_spill]] %s10295_s3 }
   0x5   :  { %10315 = sst [smem:[#allocation16_spill]] %s10296_s4 }
   0x6   :  { %20 = vsyncpa [#allocation5], 0 }
   0x7   :  { %22 = vsyncpa [#allocation5 + $0x1], 0 }
   0x8   :  { %23 = vsyncpa [#allocation7], 0 }
   0x9   :  { %25 = vsyncpa [#allocation7 + $0x1], 0  ;;  %s8096_s29 = smov 0   ;;  %s8098_s30 = smov 0  }
   0xa   :  { %s8100_s15 = smov 0   ;;  %s8102_s16 = smov 0  }
   0xb LB: > { %s8117_s17 = sadd.s32 4294967295, %s8007_s16   ;;  %s10307_s18 = sadd.s32 4294967294, %s8007_s16   ;;  %s8007_s16 = sphi %s8102_s16, %s10331_s16   ;;  %s8003_s15 = sphi %s8100_s15, %s10330_s15   ;;  %s7999_s30 = sphi %s8098_s30, %s10329_s30   ;;  %s7995_s29 = sphi %s8096_s29, %s10328_s29  }
   0xc   : > { %s8121_s19 = sadd.s32 1, %s8007_s16   ;;  %s300_s20 = sadd.s32 1, %s8003_s15 }
   0xd   : > { %s297_s21 = ssub.s32 %s8007_s16, %s8121_s19  ;;  %p310_p0 = scmp.ne.s32.totalorder %s8003_s15, %s7999_s30 }
   0xe   : > { %p298_p1 = scmp.eq.s32.totalorder %s297_s21, 0  ;;  %p311_p2 = scmp.eq.s32.totalorder %s8117_s17, 1 }
   0xf   : > { %p316_p3 = scmp.ne.s32.totalorder %s7999_s30, %s7995_s29  ;;  %p317_p4 = scmp.eq.s32.totalorder %s10307_s18, 1 }
  0x10   : > { %s8134_s22 = scalar_select %p298_p1, %s8003_s15, %s300_s20  }
  0x11   : > { %p8136_p5 = por %p311_p2, %p310_p0  ;;  %p8140_p6 = por %p317_p4, %p316_p3 }
  0x12   : > { %10316 = sst [smem:[#allocation11_spill]] %s8134_s22  ;;  %p5725_p7 = scmp.ge.s32.totalorder %s8007_s16, 1 }
  0x13   : > { %p431_p8 = scmp.lt.s32.totalorder %s8007_s16, 3 }
  0x15   : > { %p432_p9 = pnand %p5725_p7, %p431_p8 }
  0x16   : > { %s10319_s1 = sld [smem:[#allocation13_spill]] (!%p432_p9)  ;;  %vm671_vm0 = vcmask (!%p432_p9), 1042432   ;;  %v8009_v3 = vmov (!%p432_p9), 0.0|0.0   ;;  %p487_p10 = scmp.lt.s32.totalorder (!%p432_p9), %s8117_s17, 1  ;;  %vm8010_vm1 = vmmov (!%p432_p9), 0   ;;  %v8011_v6 = vmov (!%p432_p9), 0.0  }
  0x17   : > { %435 = sbr.rel (%p432_p9) target bundleno = 2314 (0x90a), region = 68  ;;  %7358 = vmatprep.subr.bf16.mxu0 (!%p432_p9), %v8009_v3  ;;  %7541 = vmatprep.subr.bf16.mxu1 (!%p432_p9), %v8009_v3  ;;  %v945_v8 = vld [vmem:[%s10299_s7] sm:$0xff] (!%p432_p9)  ;;  %v947_v9 = vld [vmem:[%s10299_s7 + $0x10] sm:$0xff] (!%p432_p9)  ;;  %vm8012_vm2 = vmmov (!%p432_p9), 1   ;;  %v8013_v10 = vmov (!%p432_p9), 0   ;;  %s10320_s0 = sld [smem:[#allocation12_spill]] (!%p432_p9) }
  0x18   : > { %6462 = vmatprep.mubr.msk.f32.mxu0 (!%p432_p9), %vm8010_vm1, %v8011_v6  ;;  %6564 = vmatprep.mubr.msk.f32.mxu1 (!%p432_p9), %vm8010_vm1, %v8011_v6  ;;  %vm7363_vm3 = vmpackc.low (!%p432_p9), %vm671_vm0, %vm8012_vm2  ;;  %vm547_vm4 = vcmask (!%p432_p9), 220160   ;;  %v946_v13 = vld [vmem:[%s10299_s7 + $0x8] sm:$0xff] (!%p432_p9)  ;;  %v948_v14 = vld [vmem:[%s10299_s7 + $0x18] sm:$0xff] (!%p432_p9)  ;;  %vm1232_vm5 = vcmask (!%p432_p9), 195584   ;;  %s10321_s3 = sld [smem:[#allocation15_spill]] (!%p432_p9)  ;;  %s10322_s2 = sld [smem:[#allocation14_spill]] (!%p432_p9) }
  0x19   : > { %7880 = vset.pattern.permute.xlu0 (!%p432_p9), %v8013_v10  ;;  %7881 = vset.pattern.permute.xlu1 (!%p432_p9), %v8013_v10  ;;  %v949_v17 = vld [vmem:[%s10299_s7 + $0x20] sm:$0xff] (!%p432_p9)  ;;  %v950_v18 = vld [vmem:[%s10299_s7 + $0x28] sm:$0xff] (!%p432_p9)  ;;  %v951_v21 = vld [vmem:[%s10299_s7 + $0x30] sm:$0xff] (!%p432_p9)  ;;  %1235 = vst.msk [vmem:[#allocation2 + $0x10] sm:$0xff] (!%p432_p9), %vm1232_vm5, %v8011_v6  ;;  %vm1278_vm6 = vcmask (!%p432_p9), 64512   ;;  %s8014_s18 = smov (!%p432_p9), 8  }
  0x1a   : > { %988 = vperm.xlu0 (!%p432_p9), %7880, %v945_v8   ;;  %998 = vperm.xlu1 (!%p432_p9), %7881, %v947_v9   ;;  %v952_v22 = vld [vmem:[%s10299_s7 + $0x38] sm:$0xff] (!%p432_p9)  ;;  %v953_v25 = vld [vmem:[%s10299_s7 + $0x40] sm:$0xff] (!%p432_p9)  ;;  %v954_v26 = vld [vmem:[%s10299_s7 + $0x48] sm:$0xff] (!%p432_p9)  ;;  %1236 = vst.msk [vmem:[#allocation2 + $0x18] sm:$0xff] (!%p432_p9), %vm1232_vm5, %v8011_v6  ;;  %s10308_s20 = smov (!%p432_p9), 16   ;;  %vm1485_vm7 = vcmask (!%p432_p9), 130112  }
  0x1b   : > { %v955_v28 = vld [vmem:[%s10299_s7 + $0x50] sm:$0xff] (!%p432_p9)  ;;  %v956_v29 = vld [vmem:[%s10299_s7 + $0x58] sm:$0xff] (!%p432_p9)  ;;  %v957_v31 = vld [vmem:[%s10299_s7 + $0x60] sm:$0xff] (!%p432_p9)  ;;  %1233 = vst.msk [vmem:[#allocation2] sm:$0xff] (!%p432_p9), %vm1232_vm5, %v8011_v6  ;;  %vm1651_vm8 = vcmask (!%p432_p9), 195712   ;;  %vm1319_vm9 = vcmask (!%p432_p9), 60416  }
  0x1c   : > { %v536_v0 = vld [vmem:[%s10319_s1] sm:$0xff] (!%p432_p9)  ;;  %v537_v1 = vld [vmem:[%s10319_s1 + $0x8] sm:$0xff] (!%p432_p9)  ;;  %v538_v2 = vld [vmem:[%s10319_s1 + $0x10] sm:$0xff] (!%p432_p9)  ;;  %1234 = vst.msk [vmem:[#allocation2 + $0x8] sm:$0xff] (!%p432_p9), %vm1232_vm5, %v8011_v6  ;;  %vm1526_vm10 = vcmask (!%p432_p9), 126016   ;;  %vm1692_vm11 = vcmask (!%p432_p9), 191616  }
  0x1d   : > { %v7359_v4 = vpack.c.bf16 (!%p432_p9), %v537_v1, %v536_v0  ;;  %v539_v5 = vld [vmem:[%s10319_s1 + $0x18] sm:$0x7] (!%p432_p9)  ;;  %v958_v32 = vld [vmem:[%s10299_s7 + $0x68] sm:$0xff] (!%p432_p9)  ;;  %v959_v34 = vld [vmem:[%s10299_s7 + $0x70] sm:$0xff] (!%p432_p9)  ;;  %1237 = vst.msk [vmem:[#allocation2 + $0x20] sm:$0xff] (!%p432_p9), %vm1232_vm5, %v8011_v6  ;;  %s10323_s4 = sld [smem:[#allocation16_spill]] (!%p432_p9) }
  0x1e   : > { %v7362_v7 = vpack.c.bf16 %v539_v5, %v538_v2  ;;  %s8166_s26 = scalar_select %p487_p10, %s8117_s17, 1  ;;  %993 = vperm.xlu0 %7880, %v946_v13   ;;  %1003 = vperm.xlu1 %7881, %v948_v14   ;;  %v960_v35 = vld [vmem:[%s10299_s7 + $0x78] sm:$0xff]  ;;  %v961_v37 = vld [vmem:[%s10299_s7 + $0x80] sm:$0xff]  ;;  %v963_v38 = vld [vmem:[%s10299_s7 + $0x90] sm:$0xff]  ;;  %1238 = vst.msk [vmem:[#allocation2 + $0x28] sm:$0xff] %vm1232_vm5, %v8011_v6  ;;  %vm3257_vm12 = vcmask 1043456  }
  0x1f   : > { %7360 = vmatpush3.bf16.msra.mxu0 %v7359_v4  ;;  %7543 = vmatpush3.bf16.msra.mxu1 %v7359_v4  ;;  %v962_v40 = vld [vmem:[%s10299_s7 + $0x88] sm:$0xff]  ;;  %v965_v41 = vld [vmem:[%s10299_s7 + $0xa0] sm:$0xff]  ;;  %v964_v43 = vld [vmem:[%s10299_s7 + $0x98] sm:$0xff]  ;;  %1239 = vst.msk [vmem:[#allocation2 + $0x30] sm:$0xff] %vm1232_vm5, %v8011_v6  ;;  %vm3217_vm13 = vcmask 556032   ;;  %vm3521_vm14 = vcmask 392192  }
  0x20   : > { %7361 = vmatprep.subr.bf16.mxu0 %v8009_v3  ;;  %7542 = vmatprep.subr.bf16.mxu1 %v8009_v3  ;;  %s7821_s21 = smul.u32 328, %s8166_s26  ;;  %v967_v44 = vld [vmem:[%s10299_s7 + $0xb0] sm:$0xff]  ;;  %v966_v46 = vld [vmem:[%s10299_s7 + $0xa8] sm:$0xff]  ;;  %v969_v47 = vld [vmem:[%s10299_s7 + $0xc0] sm:$0xff]  ;;  %1240 = vst.msk [vmem:[#allocation2 + $0x38] sm:$0xff] %vm1232_vm5, %v8011_v6  ;;  %vm3537_vm15 = vcmask 130048  }
  0x21   : > { %v968_v49 = vld [vmem:[%s10299_s7 + $0xb8] sm:$0xff]  ;;  %v971_v50 = vld [vmem:[%s10299_s7 + $0xd0] sm:$0xff]  ;;  %v970_v52 = vld [vmem:[%s10299_s7 + $0xc8] sm:$0xff]  ;;  %1241 = vst.msk [vmem:[#allocation2 + $0x40] sm:$0xff] %vm1232_vm5, %v8011_v6  ;;  %s8016_s25 = smov 32   ;;  %vm3550_vm0 = vcmask 125952  }
  0x22   : > { %s8181_s28 = scalar_lea.vmem %s10320_s0, %s7821_s21  ;;  %1008 = vperm.xlu0 %7880, %v949_v17   ;;  %1013 = vperm.xlu1 %7881, %v950_v18   ;;  %v973_v53 = vld [vmem:[%s10299_s7 + $0xe0] sm:$0xff]  ;;  %v972_v55 = vld [vmem:[%s10299_s7 + $0xd8] sm:$0xff]  ;;  %v975_v56 = vld [vmem:[%s10299_s7 + $0xf0] sm:$0xff]  ;;  %1242 = vst.msk [vmem:[#allocation2 + $0x48] sm:$0xff] %vm1232_vm5, %v8011_v6  ;;  %vm3604_vm2 = vcmask 261248   ;;  %s10160_s0 = sand.u32 1, %s7999_s30  }
  0x23   : > { %7364 = vmatpush3.bf16.msk.msra.mxu0 %vm7363_vm3, %v7362_v7  ;;  %7544 = vmatpush3.bf16.msk.msra.mxu1 %vm7363_vm3, %v7362_v7  ;;  %v495_v11 = vld [vmem:[%s8181_s28] sm:$0xff]  ;;  %v529_v12 = vld [vmem:[%s8181_s28 + $0x110] sm:$0xff]  ;;  %v496_v15 = vld [vmem:[%s8181_s28 + $0x8] sm:$0xff]  ;;  %1243 = vst.msk [vmem:[#allocation2 + $0x50] sm:$0xff] %vm1232_vm5, %v8011_v6  ;;  %vm3658_vm3 = vcmask 392448   ;;  %s480_s21 = scalar_lea.vmem [#allocation6], %s10160_s0 }
  0x24   : > { %7365 = vmatprep.subr.bf16.mxu1 %v8009_v3  ;;  %v530_v16 = vld [vmem:[%s8181_s28 + $0x118] sm:$0xff]  ;;  %v497_v19 = vld [vmem:[%s8181_s28 + $0x10] sm:$0xff]  ;;  %v531_v20 = vld [vmem:[%s8181_s28 + $0x120] sm:$0xff]  ;;  %1244 = vst.msk [vmem:[#allocation2 + $0x58] sm:$0xff] %vm1232_vm5, %v8011_v6  ;;  %s10310_s1 = smov 96   ;;  %s5562_s22 = sand.u32 1, %s8117_s17  }
  0x25   : > { %v498_v23 = vld [vmem:[%s8181_s28 + $0x18] sm:$0xff]  ;;  %v532_v24 = vld [vmem:[%s8181_s28 + $0x128] sm:$0xff]  ;;  %v499_v27 = vld [vmem:[%s8181_s28 + $0x20] sm:$0xff]  ;;  %1245 = vst.msk [vmem:[#allocation2 + $0x60] sm:$0xff] %vm1232_vm5, %v8011_v6 }
  0x26   : > { %6463 = vmatmul.mubr.msk.f32.vlgmr.msra.gmra.mrb[0].mxu0 %vm547_vm4, %v495_v11  ;;  %6565 = vmatmul.mubr.msk.f32.vlgmr.msra.gmra.mrb[0].mxu1 %vm547_vm4, %v529_v12  ;;  %v500_v30 = vld [vmem:[%s8181_s28 + $0x28] sm:$0xff]  ;;  %v501_v33 = vld [vmem:[%s8181_s28 + $0x30] sm:$0xff]  ;;  %v502_v36 = vld [vmem:[%s8181_s28 + $0x38] sm:$0xff]  ;;  %1246 = vst.msk [vmem:[#allocation2 + $0x68] sm:$0xff] %vm1232_vm5, %v8011_v6 }
  0x27   : > { %6465 = vmatprep.mubr.msk.f32.mxu0 %vm8010_vm1, %v8011_v6  ;;  %6567 = vmatprep.mubr.msk.f32.mxu1 %vm8010_vm1, %v8011_v6  ;;  %v503_v39 = vld [vmem:[%s8181_s28 + $0x40] sm:$0xff]  ;;  %v504_v42 = vld [vmem:[%s8181_s28 + $0x48] sm:$0xff]  ;;  %v505_v45 = vld [vmem:[%s8181_s28 + $0x50] sm:$0xff]  ;;  %1247 = vst.msk [vmem:[#allocation2 + $0x70] sm:$0xff] %vm1232_vm5, %v8011_v6 }
  0x28   : > { %1018 = vperm.xlu0 %7880, %v951_v21   ;;  %1023 = vperm.xlu1 %7881, %v952_v22   ;;  %v506_v48 = vld [vmem:[%s8181_s28 + $0x58] sm:$0xff]  ;;  %v507_v51 = vld [vmem:[%s8181_s28 + $0x60] sm:$0xff]  ;;  %v508_v54 = vld [vmem:[%s8181_s28 + $0x68] sm:$0xff]  ;;  %1248 = vst.msk [vmem:[#allocation2 + $0x78] sm:$0xff] %vm1232_vm5, %v8011_v6 }
  0x29   : > { %v509_v57 = vld [vmem:[%s8181_s28 + $0x70] sm:$0xff]  ;;  %v974_v58 = vld [vmem:[%s10299_s7 + $0xe8] sm:$0xff]  ;;  %v977_v59 = vld [vmem:[%s10299_s7 + $0x100] sm:$0xff]  ;;  %1249 = vst.msk [vmem:[#allocation2 + $0x80] sm:$0xff] %vm1232_vm5, %v8011_v6 }
  0x2a   : > { %6466 = vmatmul.mubr.msk.f32.gmra.mrb[2].mxu0 %vm547_vm4, %v496_v15  ;;  %6568 = vmatmul.mubr.msk.f32.gmra.mrb[2].mxu1 %vm547_vm4, %v530_v16  ;;  %v510_v60 = vld [vmem:[%s8181_s28 + $0x78] sm:$0xff]  ;;  %v979_v62 = vld [vmem:[%s10299_s7 + $0x110] sm:$0xff]  ;;  %v511_v63 = vld [vmem:[%s8181_s28 + $0x80] sm:$0xff]  ;;  %1250 = vst.msk [vmem:[#allocation2 + $0x88] sm:$0xff] %vm1232_vm5, %v8011_v6 }
  0x2b   : > { %6468 = vmatprep.mubr.msk.f32.mxu0 %vm8010_vm1, %v8011_v6  ;;  %6570 = vmatprep.mubr.msk.f32.mxu1 %vm8010_vm1, %v8011_v6  ;;  %v976_v61 = vld [vmem:[%s10299_s7 + $0xf8] sm:$0xff]  ;;  %v978_v0 = vld [vmem:[%s10299_s7 + $0x108] sm:$0xff]  ;;  %v981_v1 = vld [vmem:[%s10299_s7 + $0x120] sm:$0xff]  ;;  %1251 = vst.msk [vmem:[#allocation2 + $0x90] sm:$0xff] %vm1232_vm5, %v8011_v6 }
  0x2c   : > { %1028 = vperm.xlu0 %7880, %v953_v25   ;;  %1033 = vperm.xlu1 %7881, %v954_v26   ;;  %v512_v2 = vld [vmem:[%s8181_s28 + $0x88] sm:$0xff]  ;;  %v980_v4 = vld [vmem:[%s10299_s7 + $0x118] sm:$0xff]  ;;  %v513_v5 = vld [vmem:[%s8181_s28 + $0x90] sm:$0xff]  ;;  %1252 = vst.msk [vmem:[#allocation2 + $0x98] sm:$0xff] %vm1232_vm5, %v8011_v6 }
  0x2d   : > { %v982_v7 = vld [vmem:[%s10299_s7 + $0x128] sm:$0xff]  ;;  %v514_v8 = vld [vmem:[%s8181_s28 + $0x98] sm:$0xff]  ;;  %v515_v9 = vld [vmem:[%s8181_s28 + $0xa0] sm:$0xff]  ;;  %1253 = vst.msk [vmem:[#allocation2 + $0xa0] sm:$0xff] %vm1232_vm5, %v8011_v6 }
  0x2e   : > { %6469 = vmatmul.mubr.msk.f32.gmra.mrb[4].mxu0 %vm547_vm4, %v497_v19  ;;  %6571 = vmatmul.mubr.msk.f32.gmra.mrb[4].mxu1 %vm547_vm4, %v531_v20  ;;  %v516_v10 = vld [vmem:[%s8181_s28 + $0xa8] sm:$0xff]  ;;  %v517_v11 = vld [vmem:[%s8181_s28 + $0xb0] sm:$0xff]  ;;  %1254 = vst.msk [vmem:[#allocation2 + $0xa8] sm:$0xff] %vm1232_vm5, %v8011_v6  ;;  %1255 = vst.msk [vmem:[#allocation2 + $0xb0] sm:$0xff] %vm1232_vm5, %v8011_v6 }
  0x2f   : > { %6471 = vmatprep.mubr.msk.f32.mxu0 %vm8010_vm1, %v8011_v6  ;;  %6573 = vmatprep.mubr.msk.f32.mxu1 %vm8010_vm1, %v8011_v6  ;;  %1256 = vst.msk [vmem:[#allocation2 + $0xb8] sm:$0xff] %vm1232_vm5, %v8011_v6  ;;  %1257 = vst.msk [vmem:[#allocation2 + $0xc0] sm:$0xff] %vm1232_vm5, %v8011_v6  ;;  %v533_v12 = vld [vmem:[%s8181_s28 + $0x130] sm:$0xff]  ;;  %v518_v13 = vld [vmem:[%s8181_s28 + $0xb8] sm:$0xff] }
  0x30   : > { %1038 = vperm.xlu0 %7880, %v955_v28   ;;  %1043 = vperm.xlu1 %7881, %v956_v29   ;;  %1258 = vst.msk [vmem:[#allocation2 + $0xc8] sm:$0xff] %vm1232_vm5, %v8011_v6  ;;  %1259 = vst.msk [vmem:[#allocation2 + $0xd0] sm:$0xff] %vm1232_vm5, %v8011_v6  ;;  %v519_v14 = vld [vmem:[%s8181_s28 + $0xc0] sm:$0xff]  ;;  %v520_v15 = vld [vmem:[%s8181_s28 + $0xc8] sm:$0xff] }
  0x31   : > { %1260 = vst.msk [vmem:[#allocation2 + $0xd8] sm:$0xff] %vm1232_vm5, %v8011_v6  ;;  %1261 = vst.msk [vmem:[#allocation2 + $0xe0] sm:$0xff] %vm1232_vm5, %v8011_v6  ;;  %v521_v16 = vld [vmem:[%s8181_s28 + $0xd0] sm:$0xff]  ;;  %v522_v17 = vld [vmem:[%s8181_s28 + $0xd8] sm:$0xff] }
  0x32   : > { %6472 = vmatmul.mubr.msk.f32.gmra.mrb[6].mxu0 %vm547_vm4, %v498_v23  ;;  %6574 = vmatmul.mubr.msk.f32.gmra.mrb[6].mxu1 %vm547_vm4, %v532_v24  ;;  %1262 = vst.msk [vmem:[#allocation2 + $0xe8] sm:$0xff] %vm1232_vm5, %v8011_v6  ;;  %1263 = vst.msk [vmem:[#allocation2 + $0xf0] sm:$0xff] %vm1232_vm5, %v8011_v6  ;;  %v523_v18 = vld [vmem:[%s8181_s28 + $0xe0] sm:$0xff]  ;;  %v524_v19 = vld [vmem:[%s8181_s28 + $0xe8] sm:$0xff] }
  0x33   : > { %6474 = vmatprep.mubr.msk.f32.mxu0 %vm8010_vm1, %v8011_v6  ;;  %6576 = vmatprep.mubr.msk.f32.mxu1 %vm8010_vm1, %v8011_v6  ;;  %1264 = vst.msk [vmem:[#allocation2 + $0xf8] sm:$0xff] %vm1232_vm5, %v8011_v6  ;;  %1265 = vst.msk [vmem:[#allocation2 + $0x100] sm:$0xff] %vm1232_vm5, %v8011_v6  ;;  %v525_v20 = vld [vmem:[%s8181_s28 + $0xf0] sm:$0xff]  ;;  %v526_v21 = vld [vmem:[%s8181_s28 + $0xf8] sm:$0xff] }
  0x34   : > { %1048 = vperm.xlu0 %7880, %v957_v31   ;;  %1053 = vperm.xlu1 %7881, %v958_v32   ;;  %1266 = vst.msk [vmem:[#allocation2 + $0x108] sm:$0xff] %vm1232_vm5, %v8011_v6  ;;  %1267 = vst.msk [vmem:[#allocation2 + $0x110] sm:$0xff] %vm1232_vm5, %v8011_v6  ;;  %v527_v24 = vld [vmem:[%s8181_s28 + $0x100] sm:$0xff]  ;;  %v528_v25 = vld [vmem:[%s8181_s28 + $0x108] sm:$0xff] }
  0x35   : > { %1268 = vst.msk [vmem:[#allocation2 + $0x118] sm:$0xff] %vm1232_vm5, %v8011_v6  ;;  %1269 = vst.msk [vmem:[#allocation2 + $0x120] sm:$0xff] %vm1232_vm5, %v8011_v6 }
  0x36   : > { %6475 = vmatmul.mubr.msk.f32.gmra.mrb[8].mxu0 %vm547_vm4, %v499_v27  ;;  %1270 = vst.msk [vmem:[#allocation2 + $0x128] sm:$0xff] %vm1232_vm5, %v8011_v6  ;;  %1271 = vst.msk [vmem:[#allocation2 + $0x130] sm:$0xff] %vm1232_vm5, %v8011_v6  ;;  %6577 = vmatmul.mubr.msk.f32.gmra.mrb[8].mxu1 %vm547_vm4, %v533_v12 }
  0x37   : > { %6477 = vmatprep.mubr.msk.f32.mxu0 %vm8010_vm1, %v8011_v6  ;;  %1272 = vst.msk [vmem:[#allocation2 + $0x138] sm:$0xff] %vm1232_vm5, %v8011_v6  ;;  %1273 = vst.msk [vmem:[#allocation2 + $0x140] sm:$0xff] %vm1232_vm5, %v8011_v6  ;;  %6579 = vmatprep.mubr.msk.f32.mxu1 %vm8010_vm1, %v8011_v6 }
  0x38   : > { %1058 = vperm.xlu0 %7880, %v959_v34   ;;  %1063 = vperm.xlu1 %7881, %v960_v35   ;;  %1274 = vst.msk [vmem:[#allocation2 + $0x148] sm:$0xff] %vm1232_vm5, %v8011_v6  ;;  %1275 = vst.msk [vmem:[#allocation2 + $0x150] sm:$0xff] %vm1232_vm5, %v8011_v6 }
  0x39   : > { %1276 = vst.msk [vmem:[#allocation2 + $0x158] sm:$0xff] %vm1232_vm5, %v8011_v6  ;;  %1277 = vst.msk [vmem:[#allocation2 + $0x160] sm:$0xff] %vm1232_vm5, %v8011_v6 }
  0x3a   : > { %6478 = vmatmul.mubr.msk.f32.gmra.mrb[10].mxu0 %vm547_vm4, %v500_v30  ;;  %3535 = vst.msk [vmem:[#allocation3 + $0x68] sm:$0xff] %vm3521_vm14, %v8011_v6  ;;  %3522 = vst.msk [vmem:[#allocation3] sm:$0xff] %vm3521_vm14, %v8011_v6 }
  0x3b   : > { %6480 = vmatprep.mubr.msk.f32.mxu0 %vm8010_vm1, %v8011_v6  ;;  %3523 = vst.msk [vmem:[#allocation3 + $0x8] sm:$0xff] %vm3521_vm14, %v8011_v6  ;;  %3524 = vst.msk [vmem:[#allocation3 + $0x10] sm:$0xff] %vm3521_vm14, %v8011_v6 }
  0x3c   : > { %1068 = vperm.xlu0 %7880, %v961_v37   ;;  %1078 = vperm.xlu1 %7881, %v963_v38   ;;  %3525 = vst.msk [vmem:[#allocation3 + $0x18] sm:$0xff] %vm3521_vm14, %v8011_v6  ;;  %3526 = vst.msk [vmem:[#allocation3 + $0x20] sm:$0xff] %vm3521_vm14, %v8011_v6 }
  0x3d   : > { %3527 = vst.msk [vmem:[#allocation3 + $0x28] sm:$0xff] %vm3521_vm14, %v8011_v6  ;;  %3528 = vst.msk [vmem:[#allocation3 + $0x30] sm:$0xff] %vm3521_vm14, %v8011_v6 }
  0x3e   : > { %6481 = vmatmul.mubr.msk.f32.gmra.mrb[12].mxu0 %vm547_vm4, %v501_v33  ;;  %3529 = vst.msk [vmem:[#allocation3 + $0x38] sm:$0xff] %vm3521_vm14, %v8011_v6  ;;  %3530 = vst.msk [vmem:[#allocation3 + $0x40] sm:$0xff] %vm3521_vm14, %v8011_v6 }
  0x3f   : > { %6483 = vmatprep.mubr.msk.f32.mxu0 %vm8010_vm1, %v8011_v6  ;;  %3531 = vst.msk [vmem:[#allocation3 + $0x48] sm:$0xff] %vm3521_vm14, %v8011_v6  ;;  %3532 = vst.msk [vmem:[#allocation3 + $0x50] sm:$0xff] %vm3521_vm14, %v8011_v6 }
  0x40   : > { %1073 = vperm.xlu0 %7880, %v962_v40   ;;  %1088 = vperm.xlu1 %7881, %v965_v41   ;;  %3533 = vst.msk [vmem:[#allocation3 + $0x58] sm:$0xff] %vm3521_vm14, %v8011_v6  ;;  %3534 = vst.msk [vmem:[#allocation3 + $0x60] sm:$0xff] %vm3521_vm14, %v8011_v6 }
  0x41   : > { %3536 = vst.msk [vmem:[#allocation3 + $0x70] sm:$0xff] %vm3521_vm14, %v8011_v6 }
  0x42   : > { %6484 = vmatmul.mubr.msk.f32.gmra.mrb[14].mxu0 %vm547_vm4, %v502_v36 }
  0x43   : > { %6486 = vmatprep.mubr.msk.f32.mxu0 %vm8010_vm1, %v8011_v6 }
  0x44   : > { %1083 = vperm.xlu0 %7880, %v964_v43   ;;  %1098 = vperm.xlu1 %7881, %v967_v44  }
  0x46   : > { %6487 = vmatmul.mubr.msk.f32.gmra.mrb[16].mxu0 %vm547_vm4, %v503_v39 }
  0x47   : > { %6489 = vmatprep.mubr.msk.f32.mxu0 %vm8010_vm1, %v8011_v6 }
  0x48   : > { %1093 = vperm.xlu0 %7880, %v966_v46   ;;  %1108 = vperm.xlu1 %7881, %v969_v47  }
  0x4a   : > { %6490 = vmatmul.mubr.msk.f32.gmra.mrb[18].mxu0 %vm547_vm4, %v504_v42 }
  0x4b   : > { %6492 = vmatprep.mubr.msk.f32.mxu0 %vm8010_vm1, %v8011_v6 }
  0x4c   : > { %1103 = vperm.xlu0 %7880, %v968_v49   ;;  %1118 = vperm.xlu1 %7881, %v971_v50  }
  0x4e   : > { %6493 = vmatmul.mubr.msk.f32.gmra.mrb[20].mxu0 %vm547_vm4, %v505_v45 }
  0x4f   : > { %6495 = vmatprep.mubr.msk.f32.mxu0 %vm8010_vm1, %v8011_v6 }
  0x50   : > { %1113 = vperm.xlu0 %7880, %v970_v52   ;;  %1128 = vperm.xlu1 %7881, %v973_v53  }
  0x52   : > { %6496 = vmatmul.mubr.msk.f32.gmra.mrb[22].mxu0 %vm547_vm4, %v506_v48 }
  0x53   : > { %6498 = vmatprep.mubr.msk.f32.mxu0 %vm8010_vm1, %v8011_v6 }
  0x54   : > { %1123 = vperm.xlu0 %7880, %v972_v55   ;;  %1138 = vperm.xlu1 %7881, %v975_v56   ;;  %v534_v55 = vld [vmem:[%s8181_s28 + $0x138] sm:$0xff]  ;;  %v1736_v56 = vld [vmem:[%s10321_s3] sm:$0xff] }
  0x55   : > { %6580 = vmatmul.mubr.msk.f32.gmra.mrb[10].mxu1 %vm547_vm4, %v534_v55 }
  0x56   : > { %6499 = vmatmul.mubr.msk.f32.gmra.mrb[24].mxu0 %vm547_vm4, %v507_v51  ;;  %6582 = vmatprep.mubr.msk.f32.mxu1 %vm8010_vm1, %v8011_v6 }
  0x57   : > { %6501 = vmatprep.mubr.msk.f32.mxu0 %vm8010_vm1, %v8011_v6 }
  0x58   : > { %1133 = vperm.xlu0 %7880, %v974_v58   ;;  %1148 = vperm.xlu1 %7881, %v977_v59   ;;  %v535_v59 = vld [vmem:[%s8181_s28 + $0x140] sm:$0xf]  ;;  %s10175_s28 = sshll.u32 %s8117_s17, 4 }
  0x59   : > { %6583 = vmatmul.mubr.msk.f32.gmra.mrb[12].mxu1 %vm547_vm4, %v535_v59 }
  0x5a   : > { %6502 = vmatmul.mubr.msk.f32.gmra.mrb[26].mxu0 %vm547_vm4, %v508_v54  ;;  %6591 = vmatprep.mubr.msk.f32.mxu1 %vm8010_vm1, %v8011_v6 }
  0x5b   : > { %6504 = vmatprep.mubr.msk.f32.mxu0 %vm8010_vm1, %v8011_v6 }
  0x5c   : > { %1143 = vperm.xlu0 %7880, %v976_v61   ;;  %1158 = vperm.xlu1 %7881, %v979_v62   ;;  %v1738_v62 = vld [vmem:[%s10321_s3 + $0x10] sm:$0xff] }
  0x5e   : > { %6505 = vmatmul.mubr.msk.f32.gmra.mrb[28].mxu0 %vm547_vm4, %v509_v57  ;;  %v1737_v57 = vld [vmem:[%s10321_s3 + $0x8] sm:$0xff] }
  0x5f   : > { %6507 = vmatprep.mubr.msk.f32.mxu0 %vm8010_vm1, %v8011_v6  ;;  %v7366_v58 = vpack.c.bf16 %v1737_v57, %v1736_v56 }
  0x60   : > { %1153 = vperm.xlu0 %7880, %v978_v0   ;;  %1168 = vperm.xlu1 %7881, %v981_v1   ;;  %v8627_v0 = vld [vmem:[%s10322_s2] ss:$0 sm:$0xff] }
  0x61   : > { %7367 = vmatpush3.bf16.msra.mxu1 %v7366_v58 }
  0x62   : > { %6508 = vmatmul.mubr.msk.f32.gmra.mrb[30].mxu0 %vm547_vm4, %v510_v60  ;;  %6589 = vmatprep.subr.mxu1 %v8011_v6 }
  0x63   : > { %6510 = vmatprep.mubr.msk.f32.mxu0 %vm8010_vm1, %v8011_v6 }
  0x64   : > { %1163 = vperm.xlu0 %7880, %v980_v4   ;;  %v1696_v4 = vld [vmem:[#allocation2 + $0x8] sm:$0xff] }
  0x65   : > { %6590 = vmatpush3.msra.mxu1 %v1738_v62 }
  0x66   : > { %6511 = vmatmul.mubr.msk.f32.gmra.mrb[32].mxu0 %vm547_vm4, %v511_v63  ;;  %v1695_v63 = vld [vmem:[#allocation2] sm:$0xff]  ;;  %7368 = vmatprep.subr.bf16.mxu1 %v8009_v3 }
  0x67   : > { %6513 = vmatprep.mubr.msk.f32.mxu0 %vm8010_vm1, %v8011_v6  ;;  %6592 = vmatmul.mubr.msk.f32.vlgmr.msra.gmra.mrb[14].mxu1 %vm1232_vm5, %v1695_v63 }
  0x68   : > { %1173 = vperm.xlu0 %7880, %v982_v7   ;;  %6594 = vmatprep.mubr.msk.f32.mxu1 %vm8010_vm1, %v8011_v6 }
  0x6a   : > { %6514 = vmatmul.mubr.msk.f32.gmra.mrb[34].mxu0 %vm547_vm4, %v512_v2 }
  0x6b   : > { %6516 = vmatprep.mubr.msk.f32.mxu0 %vm8010_vm1, %v8011_v6  ;;  %6595 = vmatmul.mubr.msk.f32.gmra.mrb[16].mxu1 %vm1232_vm5, %v1696_v4 }
  0x6c   : > { %6597 = vmatprep.mubr.msk.f32.mxu1 %vm8010_vm1, %v8011_v6 }
  0x6e   : > { %6517 = vmatmul.mubr.msk.f32.gmra.mrb[36].mxu0 %vm547_vm4, %v513_v5 }
  0x6f   : > { %6519 = vmatprep.mubr.msk.f32.mxu0 %vm8010_vm1, %v8011_v6 }
  0x72   : > { %6520 = vmatmul.mubr.msk.f32.gmra.mrb[38].mxu0 %vm547_vm4, %v514_v8 }
  0x73   : > { %6522 = vmatprep.mubr.msk.f32.mxu0 %vm8010_vm1, %v8011_v6 }
  0x76   : > { %6523 = vmatmul.mubr.msk.f32.gmra.mrb[40].mxu0 %vm547_vm4, %v515_v9 }
  0x77   : > { %6525 = vmatprep.mubr.msk.f32.mxu0 %vm8010_vm1, %v8011_v6 }
  0x7a   : > { %6526 = vmatmul.mubr.msk.f32.gmra.mrb[42].mxu0 %vm547_vm4, %v516_v10 }
  0x7b   : > { %6528 = vmatprep.mubr.msk.f32.mxu0 %vm8010_vm1, %v8011_v6 }
  0x7e   : > { %6529 = vmatmul.mubr.msk.f32.gmra.mrb[44].mxu0 %vm547_vm4, %v517_v11 }
  0x7f   : > { %6531 = vmatprep.mubr.msk.f32.mxu0 %vm8010_vm1, %v8011_v6 }
  0x82   : > { %6532 = vmatmul.mubr.msk.f32.gmra.mrb[46].mxu0 %vm547_vm4, %v518_v13 }
  0x83   : > { %6534 = vmatprep.mubr.msk.f32.mxu0 %vm8010_vm1, %v8011_v6 }
  0x86   : > { %6535 = vmatmul.mubr.msk.f32.gmra.mrb[48].mxu0 %vm547_vm4, %v519_v14 }
  0x87   : > { %6537 = vmatprep.mubr.msk.f32.mxu0 %vm8010_vm1, %v8011_v6 }
  0x8a   : > { %6538 = vmatmul.mubr.msk.f32.gmra.mrb[50].mxu0 %vm547_vm4, %v520_v15 }
  0x8b   : > { %6540 = vmatprep.mubr.msk.f32.mxu0 %vm8010_vm1, %v8011_v6 }
  0x8e   : > { %6541 = vmatmul.mubr.msk.f32.gmra.mrb[52].mxu0 %vm547_vm4, %v521_v16 }
  0x8f   : > { %6543 = vmatprep.mubr.msk.f32.mxu0 %vm8010_vm1, %v8011_v6 }
  0x92   : > { %6544 = vmatmul.mubr.msk.f32.gmra.mrb[54].mxu0 %vm547_vm4, %v522_v17 }
  0x93   : > { %6546 = vmatprep.mubr.msk.f32.mxu0 %vm8010_vm1, %v8011_v6 }
  0x96   : > { %6547 = vmatmul.mubr.msk.f32.gmra.mrb[56].mxu0 %vm547_vm4, %v523_v18 }
  0x97   : > { %6549 = vmatprep.mubr.msk.f32.mxu0 %vm8010_vm1, %v8011_v6 }
  0x99   : > { %v8527_v22 = vpop.permute.xlu0 %988  ;;  %v8529_v23 = vpop.permute.xlu1 %998 }
  0x9a   : > { %6550 = vmatmul.mubr.msk.f32.gmra.mrb[58].mxu0 %vm547_vm4, %v524_v19 }
  0x9b   : > { %6552 = vmatprep.mubr.msk.f32.mxu0 %vm8010_vm1, %v8011_v6 }
  0x9d   : > { %v8539_v26 = vpop.permute.xlu0 %993  ;;  %v8541_v27 = vpop.permute.xlu1 %1003 }
  0x9e   : > { %6553 = vmatmul.mubr.msk.f32.gmra.mrb[60].mxu0 %vm547_vm4, %v525_v20 }
  0x9f   : > { %6555 = vmatprep.mubr.msk.f32.mxu0 %vm8010_vm1, %v8011_v6 }
  0xa1   : > { %v8544_v28 = vpop.permute.xlu0 %1008  ;;  %v8546_v29 = vpop.permute.xlu1 %1013 }
  0xa2   : > { %6556 = vmatmul.mubr.msk.f32.gmra.mrb[62].mxu0 %vm547_vm4, %v526_v21 }
  0xa3   : > { %6558 = vmatprep.mubr.msk.f32.mxu0 %vm8010_vm1, %v8011_v6 }
  0xa6   : > { %6559 = vmatmul.mubr.msk.f32.gmra.mrb[64].mxu0 %vm547_vm4, %v527_v24 }
  0xa7   : > { %6561 = vmatprep.mubr.msk.f32.mxu0 %vm8010_vm1, %v8011_v6  ;;  %v8548_v30 = vpop.permute.xlu0 %1018  ;;  %v8550_v31 = vpop.permute.xlu1 %1023 }
  0xaa   : > { %6562 = vmatmul.mubr.msk.f32.gmra.mrb[66].mxu0 %vm547_vm4, %v528_v25  ;;  %vm3617_vm4 = vcmask 257152  }
  0xab   : > { %v8552_v32 = vpop.permute.xlu0 %1028  ;;  %v8554_v33 = vpop.permute.xlu1 %1033 }
  0xaf   : > { %v8556_v34 = vpop.permute.xlu0 %1038  ;;  %v8558_v35 = vpop.permute.xlu1 %1043 }
  0xb3   : > { %v8560_v36 = vpop.permute.xlu0 %1048  ;;  %v8562_v37 = vpop.permute.xlu1 %1053 }
  0xb7   : > { %v8564_v38 = vpop.permute.xlu0 %1058  ;;  %v8566_v39 = vpop.permute.xlu1 %1063 }
  0xbb   : > { %v8568_v40 = vpop.permute.xlu0 %1068  ;;  %v8572_v42 = vpop.permute.xlu1 %1078 }
  0xbf   : > { %v8570_v41 = vpop.permute.xlu0 %1073  ;;  %v8576_v44 = vpop.permute.xlu1 %1088 }
  0xc3   : > { %v8574_v43 = vpop.permute.xlu0 %1083  ;;  %v8580_v46 = vpop.permute.xlu1 %1098 }
  0xc7   : > { %v8578_v45 = vpop.permute.xlu0 %1093  ;;  %v8584_v48 = vpop.permute.xlu1 %1108 }
  0xcb   : > { %v8582_v47 = vpop.permute.xlu0 %1103  ;;  %v8588_v50 = vpop.permute.xlu1 %1118 }
  0xcf   : > { %v8586_v49 = vpop.permute.xlu0 %1113  ;;  %v8592_v52 = vpop.permute.xlu1 %1128 }
  0xd3   : > { %v8590_v51 = vpop.permute.xlu0 %1123  ;;  %v8596_v54 = vpop.permute.xlu1 %1138 }
  0xd7   : > { %v8594_v53 = vpop.permute.xlu0 %1133  ;;  %v8613_v61 = vpop.permute.xlu1 %1148 }
  0xdb   : > { %v8611_v60 = vpop.permute.xlu0 %1143  ;;  %v1159_v2 = vpop.permute.xlu1 %1158 }
  0xdf   : > { %v8629_v1 = vpop.permute.xlu0 %1153  ;;  %v1169_v24 = vpop.permute.xlu1 %1168 }
  0xe3   : > { %v1164_v20 = vpop.permute.xlu0 %1163 }
  0xf9   : > { %v741_v5 = vpop.f32.mrb[0].mxu0  ;;  %v911_v7 = vpop.f32.mrb[0].mxu1 }
  0xfa   : > { %v742_v8 = vadd.f32 %v8627_v0, %v741_v5  ;;  %v6464_v9 = vpop.f32.mrb[1].mxu0  ;;  %v912_v10 = vadd.f32 %v8627_v0, %v911_v7  ;;  %v6566_v11 = vpop.f32.mrb[1].mxu1 }
  0xfc   : > { %v1191_v12 = vmul.f32 %v8527_v22, %v742_v8  ;;  %v8637_v13 = vmul.f32 %v1159_v2, %v912_v10 }
  0xfd   : > { %v746_v14 = vpop.f32.mrb[2].mxu0  ;;  %v916_v15 = vpop.f32.mrb[2].mxu1 }
  0xfe   : > { %v747_v16 = vadd.f32 %v8627_v0, %v746_v14  ;;  %v917_v17 = vadd.f32 %v8627_v0, %v916_v15  ;;  %1362 = vrot.lane.b32.xlu1 %v1191_v12, %s8014_s18  ;;  %v6467_v18 = vpop.f32.mrb[3].mxu0  ;;  %v6569_v19 = vpop.f32.mrb[3].mxu1  ;;  %1279 = vst.msk [vmem:[#allocation2 + $0x13] sm:$0xff] %vm1278_vm6, %v1191_v12  ;;  %1313 = vst.msk [vmem:[#allocation2 + $0x123] sm:$0xff] %vm1278_vm6, %v8637_v13 }
 0x100   : > { %v1192_v21 = vmul.f32 %v8539_v26, %v747_v16  ;;  %v8646_v22 = vmul.f32 %v1164_v20, %v917_v17 }
 0x101   : > { %v751_v25 = vpop.f32.mrb[4].mxu0  ;;  %v921_v55 = vpop.f32.mrb[4].mxu1 }
 0x102   : > { %v752_v56 = vadd.f32 %v8627_v0, %v751_v25  ;;  %v922_v57 = vadd.f32 %v8627_v0, %v921_v55  ;;  %1528 = vrot.lane.b32.xlu1 %v1191_v12, %s10308_s20  ;;  %1364 = vrot.lane.b32.xlu0 %v1192_v21, %s8014_s18  ;;  %v6470_v58 = vpop.f32.mrb[5].mxu0  ;;  %v6572_v59 = vpop.f32.mrb[5].mxu1  ;;  %1280 = vst.msk [vmem:[#allocation2 + $0x1b] sm:$0xff] %vm1278_vm6, %v1192_v21  ;;  %1314 = vst.msk [vmem:[#allocation2 + $0x12b] sm:$0xff] %vm1278_vm6, %v8646_v22 }
 0x104   : > { %v1193_v26 = vmul.f32 %v8529_v23, %v752_v56  ;;  %v8656_v62 = vmul.f32 %v1169_v24, %v922_v57  ;;  %v1174_v23 = vpop.permute.xlu0 %1173 }
 0x105   : > { %v756_v63 = vpop.f32.mrb[6].mxu0  ;;  %v926_v2 = vpop.f32.mrb[6].mxu1 }
 0x106   : > { %v757_v4 = vadd.f32 %v8627_v0, %v756_v63  ;;  %v927_v5 = vadd.f32 %v8627_v0, %v926_v2  ;;  %1530 = vrot.lane.b32.xlu0 %v1192_v21, %s10308_s20  ;;  %1366 = vrot.lane.b32.xlu1 %v1193_v26, %s8014_s18  ;;  %v6473_v7 = vpop.f32.mrb[7].mxu0  ;;  %1281 = vst.msk [vmem:[#allocation2 + $0x23] sm:$0xff] %vm1278_vm6, %v1193_v26  ;;  %1315 = vst.msk [vmem:[#allocation2 + $0x133] sm:$0xff] %vm1278_vm6, %v8656_v62  ;;  %v6575_v8 = vpop.f32.mrb[7].mxu1 }
 0x108   : > { %v1194_v9 = vmul.f32 %v8541_v27, %v757_v4  ;;  %v8666_v10 = vmul.f32 %v1174_v23, %v927_v5 }
 0x109   : > { %v761_v11 = vpop.f32.mrb[8].mxu0 }
 0x10a   : > { %v762_v12 = vadd.f32 %v8627_v0, %v761_v11  ;;  %1532 = vrot.lane.b32.xlu1 %v1193_v26, %s10308_s20  ;;  %1368 = vrot.lane.b32.xlu0 %v1194_v9, %s8014_s18  ;;  %v6476_v14 = vpop.f32.mrb[9].mxu0  ;;  %1282 = vst.msk [vmem:[#allocation2 + $0x2b] sm:$0xff] %vm1278_vm6, %v1194_v9  ;;  %1316 = vst.msk [vmem:[#allocation2 + $0x13b] sm:$0xff] %vm1278_vm6, %v8666_v10 }
 0x10c   : > { %v1195_v15 = vmul.f32 %v8544_v28, %v762_v12 }
 0x10d   : > { %v766_v16 = vpop.f32.mrb[10].mxu0 }
 0x10e   : > { %v767_v27 = vadd.f32 %v8627_v0, %v766_v16  ;;  %1534 = vrot.lane.b32.xlu0 %v1194_v9, %s10308_s20  ;;  %1370 = vrot.lane.b32.xlu1 %v1195_v15, %s8014_s18  ;;  %v6479_v17 = vpop.f32.mrb[11].mxu0  ;;  %1283 = vst.msk [vmem:[#allocation2 + $0x33] sm:$0xff] %vm1278_vm6, %v1195_v15 }
 0x110   : > { %v1196_v18 = vmul.f32 %v8546_v29, %v767_v27 }
 0x111   : > { %v771_v19 = vpop.f32.mrb[12].mxu0 }
 0x112   : > { %v772_v20 = vadd.f32 %v8627_v0, %v771_v19  ;;  %1536 = vrot.lane.b32.xlu1 %v1195_v15, %s10308_s20  ;;  %1372 = vrot.lane.b32.xlu0 %v1196_v18, %s8014_s18  ;;  %v6482_v28 = vpop.f32.mrb[13].mxu0  ;;  %1284 = vst.msk [vmem:[#allocation2 + $0x3b] sm:$0xff] %vm1278_vm6, %v1196_v18 }
 0x114   : > { %v1197_v21 = vmul.f32 %v8548_v30, %v772_v20 }
 0x115   : > { %v776_v24 = vpop.f32.mrb[14].mxu0 }
 0x116   : > { %v777_v25 = vadd.f32 %v8627_v0, %v776_v24  ;;  %1538 = vrot.lane.b32.xlu0 %v1196_v18, %s10308_s20  ;;  %1374 = vrot.lane.b32.xlu1 %v1197_v21, %s8014_s18  ;;  %v6485_v29 = vpop.f32.mrb[15].mxu0  ;;  %1285 = vst.msk [vmem:[#allocation2 + $0x43] sm:$0xff] %vm1278_vm6, %v1197_v21 }
 0x118   : > { %v1198_v55 = vmul.f32 %v8550_v31, %v777_v25 }
 0x119   : > { %v781_v56 = vpop.f32.mrb[16].mxu0 }
 0x11a   : > { %v782_v57 = vadd.f32 %v8627_v0, %v781_v56  ;;  %1540 = vrot.lane.b32.xlu1 %v1197_v21, %s10308_s20  ;;  %1376 = vrot.lane.b32.xlu0 %v1198_v55, %s8014_s18  ;;  %v6488_v30 = vpop.f32.mrb[17].mxu0  ;;  %1286 = vst.msk [vmem:[#allocation2 + $0x4b] sm:$0xff] %vm1278_vm6, %v1198_v55 }
 0x11c   : > { %v1199_v58 = vmul.f32 %v8552_v32, %v782_v57 }
 0x11d   : > { %v786_v59 = vpop.f32.mrb[18].mxu0 }
 0x11e   : > { %v787_v26 = vadd.f32 %v8627_v0, %v786_v59  ;;  %1542 = vrot.lane.b32.xlu0 %v1198_v55, %s10308_s20  ;;  %1378 = vrot.lane.b32.xlu1 %v1199_v58, %s8014_s18  ;;  %v6491_v31 = vpop.f32.mrb[19].mxu0  ;;  %1287 = vst.msk [vmem:[#allocation2 + $0x53] sm:$0xff] %vm1278_vm6, %v1199_v58 }
 0x120   : > { %v1200_v63 = vmul.f32 %v8554_v33, %v787_v26 }
 0x121   : > { %v791_v2 = vpop.f32.mrb[20].mxu0 }
 0x122   : > { %v792_v4 = vadd.f32 %v8627_v0, %v791_v2  ;;  %1544 = vrot.lane.b32.xlu1 %v1199_v58, %s10308_s20  ;;  %1380 = vrot.lane.b32.xlu0 %v1200_v63, %s8014_s18  ;;  %v6494_v32 = vpop.f32.mrb[21].mxu0  ;;  %1288 = vst.msk [vmem:[#allocation2 + $0x5b] sm:$0xff] %vm1278_vm6, %v1200_v63 }
 0x124   : > { %v1201_v5 = vmul.f32 %v8556_v34, %v792_v4 }
 0x125   : > { %v796_v7 = vpop.f32.mrb[22].mxu0 }
 0x126   : > { %v797_v8 = vadd.f32 %v8627_v0, %v796_v7  ;;  %1546 = vrot.lane.b32.xlu0 %v1200_v63, %s10308_s20  ;;  %1382 = vrot.lane.b32.xlu1 %v1201_v5, %s8014_s18  ;;  %v6497_v33 = vpop.f32.mrb[23].mxu0  ;;  %1289 = vst.msk [vmem:[#allocation2 + $0x63] sm:$0xff] %vm1278_vm6, %v1201_v5 }
 0x128   : > { %v1202_v23 = vmul.f32 %v8558_v35, %v797_v8 }
 0x129   : > { %v801_v9 = vpop.f32.mrb[24].mxu0 }
 0x12a   : > { %v802_v11 = vadd.f32 %v8627_v0, %v801_v9  ;;  %1548 = vrot.lane.b32.xlu1 %v1201_v5, %s10308_s20  ;;  %1384 = vrot.lane.b32.xlu0 %v1202_v23, %s8014_s18  ;;  %v6500_v34 = vpop.f32.mrb[25].mxu0  ;;  %1290 = vst.msk [vmem:[#allocation2 + $0x6b] sm:$0xff] %vm1278_vm6, %v1202_v23  ;;  %v983_v9 = vld [vmem:[%s10299_s7 + $0x130] sm:$0xff] }
 0x12c   : > { %v1203_v12 = vmul.f32 %v8560_v36, %v802_v11 }
 0x12d   : > { %v806_v14 = vpop.f32.mrb[26].mxu0 }
 0x12e   : > { %v807_v15 = vadd.f32 %v8627_v0, %v806_v14  ;;  %1550 = vrot.lane.b32.xlu0 %v1202_v23, %s10308_s20  ;;  %1386 = vrot.lane.b32.xlu1 %v1203_v12, %s8014_s18  ;;  %v6503_v35 = vpop.f32.mrb[27].mxu0  ;;  %1291 = vst.msk [vmem:[#allocation2 + $0x73] sm:$0xff] %vm1278_vm6, %v1203_v12  ;;  %v8764_v23 = vpop.f32.mrb[8].mxu1 }
 0x12f   : > { %v6578_v11 = vpop.f32.mrb[9].mxu1 }
 0x130   : > { %v1204_v16 = vmul.f32 %v8562_v37, %v807_v15 }
 0x131   : > { %v811_v27 = vpop.f32.mrb[28].mxu0 }
 0x132   : > { %v812_v17 = vadd.f32 %v8627_v0, %v811_v27  ;;  %1552 = vrot.lane.b32.xlu1 %v1203_v12, %s10308_s20  ;;  %1388 = vrot.lane.b32.xlu0 %v1204_v16, %s8014_s18  ;;  %v6506_v36 = vpop.f32.mrb[29].mxu0  ;;  %1292 = vst.msk [vmem:[#allocation2 + $0x7b] sm:$0xff] %vm1278_vm6, %v1204_v16 }
 0x134   : > { %v1205_v18 = vmul.f32 %v8564_v38, %v812_v17 }
 0x135   : > { %v816_v19 = vpop.f32.mrb[30].mxu0 }
 0x136   : > { %v817_v20 = vadd.f32 %v8627_v0, %v816_v19  ;;  %1554 = vrot.lane.b32.xlu0 %v1204_v16, %s10308_s20  ;;  %1390 = vrot.lane.b32.xlu1 %v1205_v18, %s8014_s18  ;;  %v6509_v37 = vpop.f32.mrb[31].mxu0  ;;  %1293 = vst.msk [vmem:[#allocation2 + $0x83] sm:$0xff] %vm1278_vm6, %v1205_v18 }
 0x138   : > { %v1206_v28 = vmul.f32 %v8566_v39, %v817_v20 }
 0x139   : > { %v821_v21 = vpop.f32.mrb[32].mxu0 }
 0x13a   : > { %v822_v24 = vadd.f32 %v8627_v0, %v821_v21  ;;  %1556 = vrot.lane.b32.xlu1 %v1205_v18, %s10308_s20  ;;  %1392 = vrot.lane.b32.xlu0 %v1206_v28, %s8014_s18  ;;  %v6512_v38 = vpop.f32.mrb[33].mxu0  ;;  %1294 = vst.msk [vmem:[#allocation2 + $0x8b] sm:$0xff] %vm1278_vm6, %v1206_v28 }
 0x13c   : > { %v1207_v25 = vmul.f32 %v8568_v40, %v822_v24 }
 0x13d   : > { %v826_v29 = vpop.f32.mrb[34].mxu0 }
 0x13e   : > { %v827_v55 = vadd.f32 %v8627_v0, %v826_v29  ;;  %1558 = vrot.lane.b32.xlu0 %v1206_v28, %s10308_s20  ;;  %1394 = vrot.lane.b32.xlu1 %v1207_v25, %s8014_s18  ;;  %v6515_v39 = vpop.f32.mrb[35].mxu0  ;;  %1295 = vst.msk [vmem:[#allocation2 + $0x93] sm:$0xff] %vm1278_vm6, %v1207_v25 }
 0x140   : > { %v1208_v56 = vmul.f32 %v8570_v41, %v827_v55 }
 0x141   : > { %v831_v57 = vpop.f32.mrb[36].mxu0 }
 0x142   : > { %v832_v30 = vadd.f32 %v8627_v0, %v831_v57  ;;  %1560 = vrot.lane.b32.xlu1 %v1207_v25, %s10308_s20  ;;  %1396 = vrot.lane.b32.xlu0 %v1208_v56, %s8014_s18  ;;  %v6518_v40 = vpop.f32.mrb[37].mxu0  ;;  %1296 = vst.msk [vmem:[#allocation2 + $0x9b] sm:$0xff] %vm1278_vm6, %v1208_v56 }
 0x144   : > { %v1209_v58 = vmul.f32 %v8572_v42, %v832_v30 }
 0x145   : > { %v836_v59 = vpop.f32.mrb[38].mxu0 }
 0x146   : > { %v837_v26 = vadd.f32 %v8627_v0, %v836_v59  ;;  %1562 = vrot.lane.b32.xlu0 %v1208_v56, %s10308_s20  ;;  %1398 = vrot.lane.b32.xlu1 %v1209_v58, %s8014_s18  ;;  %v6521_v41 = vpop.f32.mrb[39].mxu0  ;;  %1297 = vst.msk [vmem:[#allocation2 + $0xa3] sm:$0xff] %vm1278_vm6, %v1209_v58 }
 0x148   : > { %v1210_v31 = vmul.f32 %v8574_v43, %v837_v26 }
 0x149   : > { %v841_v63 = vpop.f32.mrb[40].mxu0 }
 0x14a   : > { %v842_v2 = vadd.f32 %v8627_v0, %v841_v63  ;;  %1564 = vrot.lane.b32.xlu1 %v1209_v58, %s10308_s20  ;;  %1400 = vrot.lane.b32.xlu0 %v1210_v31, %s8014_s18  ;;  %v6524_v42 = vpop.f32.mrb[41].mxu0  ;;  %1298 = vst.msk [vmem:[#allocation2 + $0xab] sm:$0xff] %vm1278_vm6, %v1210_v31 }
 0x14c   : > { %v1211_v4 = vmul.f32 %v8576_v44, %v842_v2 }
 0x14d   : > { %v846_v32 = vpop.f32.mrb[42].mxu0 }
 0x14e   : > { %v847_v5 = vadd.f32 %v8627_v0, %v846_v32  ;;  %1566 = vrot.lane.b32.xlu0 %v1210_v31, %s10308_s20  ;;  %1402 = vrot.lane.b32.xlu1 %v1211_v4, %s8014_s18  ;;  %v6527_v43 = vpop.f32.mrb[43].mxu0  ;;  %1299 = vst.msk [vmem:[#allocation2 + $0xb3] sm:$0xff] %vm1278_vm6, %v1211_v4 }
 0x150   : > { %v1212_v7 = vmul.f32 %v8578_v45, %v847_v5 }
 0x151   : > { %v851_v8 = vpop.f32.mrb[44].mxu0 }
 0x152   : > { %v852_v33 = vadd.f32 %v8627_v0, %v851_v8  ;;  %1568 = vrot.lane.b32.xlu1 %v1211_v4, %s10308_s20  ;;  %1404 = vrot.lane.b32.xlu0 %v1212_v7, %s8014_s18  ;;  %v6530_v44 = vpop.f32.mrb[45].mxu0  ;;  %1300 = vst.msk [vmem:[#allocation2 + $0xbb] sm:$0xff] %vm1278_vm6, %v1212_v7 }
 0x154   : > { %v1213_v34 = vmul.f32 %v8580_v46, %v852_v33 }
 0x155   : > { %v856_v45 = vpop.f32.mrb[46].mxu0 }
 0x156   : > { %v857_v12 = vadd.f32 %v8627_v0, %v856_v45  ;;  %1178 = vperm.xlu1 %7881, %v983_v9   ;;  %1570 = vrot.lane.b32.xlu0 %v1212_v7, %s10308_s20  ;;  %v6533_v14 = vpop.f32.mrb[47].mxu0  ;;  %1301 = vst.msk [vmem:[#allocation2 + $0xc3] sm:$0xff] %vm1278_vm6, %v1213_v34  ;;  %v5812_v45 = vld [vmem:[%s10321_s3 + $0x18] sm:$0xff] }
 0x158   : > { %v1214_v15 = vmul.f32 %v8582_v47, %v857_v12  ;;  %v5813_v12 = vld [vmem:[%s10321_s3 + $0x20] sm:$0xff] }
 0x159   : > { %v861_v35 = vpop.f32.mrb[48].mxu0  ;;  %v7369_v14 = vpack.c.bf16 %v5813_v12, %v5812_v45  ;;  %v932_v12 = vadd.f32 %v8627_v0, %v8764_v23  ;;  %v984_v23 = vld [vmem:[%s10299_s7 + $0x138] sm:$0xff] }
 0x15a   : > { %v862_v16 = vadd.f32 %v8627_v0, %v861_v35  ;;  %1572 = vrot.lane.b32.xlu0 %v1213_v34, %s10308_s20  ;;  %1406 = vrot.lane.b32.xlu1 %v1213_v34, %s8014_s18  ;;  %v6536_v27 = vpop.f32.mrb[49].mxu0  ;;  %1302 = vst.msk [vmem:[#allocation2 + $0xcb] sm:$0xff] %vm1278_vm6, %v1214_v15 }
 0x15b   : > { %7370 = vmatpush3.bf16.msra.mxu1 %v7369_v14 }
 0x15c   : > { %v1215_v46 = vmul.f32 %v8584_v48, %v862_v16  ;;  %6718 = vmatprep.subr.mxu1 %v8011_v6 }
 0x15d   : > { %v866_v17 = vpop.f32.mrb[50].mxu0 }
 0x15e   : > { %v867_v36 = vadd.f32 %v8627_v0, %v866_v17  ;;  %1574 = vrot.lane.b32.xlu0 %v1214_v15, %s10308_s20  ;;  %1408 = vrot.lane.b32.xlu1 %v1214_v15, %s8014_s18  ;;  %v6539_v47 = vpop.f32.mrb[51].mxu0  ;;  %1303 = vst.msk [vmem:[#allocation2 + $0xd3] sm:$0xff] %vm1278_vm6, %v1215_v46 }
 0x160   : > { %v1216_v18 = vmul.f32 %v8586_v49, %v867_v36 }
 0x161   : > { %v871_v19 = vpop.f32.mrb[52].mxu0 }
 0x162   : > { %v872_v20 = vadd.f32 %v8627_v0, %v871_v19  ;;  %1576 = vrot.lane.b32.xlu0 %v1215_v46, %s10308_s20  ;;  %1410 = vrot.lane.b32.xlu1 %v1215_v46, %s8014_s18  ;;  %v6542_v48 = vpop.f32.mrb[53].mxu0  ;;  %1304 = vst.msk [vmem:[#allocation2 + $0xdb] sm:$0xff] %vm1278_vm6, %v1216_v18 }
 0x164   : > { %v1217_v37 = vmul.f32 %v8588_v50, %v872_v20 }
 0x165   : > { %v876_v28 = vpop.f32.mrb[54].mxu0 }
 0x166   : > { %v877_v21 = vadd.f32 %v8627_v0, %v876_v28  ;;  %1578 = vrot.lane.b32.xlu0 %v1216_v18, %s10308_s20  ;;  %1412 = vrot.lane.b32.xlu1 %v1216_v18, %s8014_s18  ;;  %v6545_v49 = vpop.f32.mrb[55].mxu0  ;;  %1305 = vst.msk [vmem:[#allocation2 + $0xe3] sm:$0xff] %vm1278_vm6, %v1217_v37 }
 0x168   : > { %v1218_v24 = vmul.f32 %v8590_v51, %v877_v21 }
 0x169   : > { %v881_v38 = vpop.f32.mrb[56].mxu0 }
 0x16a   : > { %v882_v25 = vadd.f32 %v8627_v0, %v881_v38  ;;  %1580 = vrot.lane.b32.xlu0 %v1217_v37, %s10308_s20  ;;  %1414 = vrot.lane.b32.xlu1 %v1217_v37, %s8014_s18  ;;  %v6548_v50 = vpop.f32.mrb[57].mxu0  ;;  %1306 = vst.msk [vmem:[#allocation2 + $0xeb] sm:$0xff] %vm1278_vm6, %v1218_v24 }
 0x16c   : > { %v1219_v29 = vmul.f32 %v8592_v52, %v882_v25 }
 0x16d   : > { %v886_v55 = vpop.f32.mrb[58].mxu0 }
 0x16e   : > { %v887_v39 = vadd.f32 %v8627_v0, %v886_v55  ;;  %1582 = vrot.lane.b32.xlu0 %v1218_v24, %s10308_s20  ;;  %1416 = vrot.lane.b32.xlu1 %v1218_v24, %s8014_s18  ;;  %v6551_v51 = vpop.f32.mrb[59].mxu0  ;;  %1307 = vst.msk [vmem:[#allocation2 + $0xf3] sm:$0xff] %vm1278_vm6, %v1219_v29 }
 0x170   : > { %v1220_v56 = vmul.f32 %v8594_v53, %v887_v39  ;;  %v1363_v57 = vpop.permute.xlu1 %1362 }
 0x171   : > { %1486 = vst.msk [vmem:[#allocation2 + $0x12] sm:$0xff] %vm1485_vm7, %v1363_v57  ;;  %v891_v30 = vpop.f32.mrb[60].mxu0 }
 0x172   : > { %1308 = vst.msk [vmem:[#allocation2 + $0xfb] sm:$0xff] %vm1278_vm6, %v1220_v56  ;;  %v892_v52 = vadd.f32 %v8627_v0, %v891_v30  ;;  %1584 = vrot.lane.b32.xlu0 %v1219_v29, %s10308_s20  ;;  %1418 = vrot.lane.b32.xlu1 %v1219_v29, %s8014_s18  ;;  %v6554_v40 = vpop.f32.mrb[61].mxu0 }
 0x174   : > { %v1221_v58 = vmul.f32 %v8596_v54, %v892_v52  ;;  %v1529_v59 = vpop.permute.xlu1 %1528  ;;  %v1365_v26 = vpop.permute.xlu0 %1364 }
 0x175   : > { %1652 = vst.msk [vmem:[#allocation2 + $0x11] sm:$0xff] %vm1651_vm8, %v1529_v59  ;;  %v896_v53 = vpop.f32.mrb[62].mxu0 }
 0x176   : > { %1487 = vst.msk [vmem:[#allocation2 + $0x1a] sm:$0xff] %vm1485_vm7, %v1365_v26  ;;  %v897_v41 = vadd.f32 %v8627_v0, %v896_v53  ;;  %1586 = vrot.lane.b32.xlu0 %v1220_v56, %s10308_s20  ;;  %1420 = vrot.lane.b32.xlu1 %v1220_v56, %s8014_s18  ;;  %v6557_v31 = vpop.f32.mrb[63].mxu0 }
 0x177   : > { %1309 = vst.msk [vmem:[#allocation2 + $0x103] sm:$0xff] %vm1278_vm6, %v1221_v58 }
 0x178   : > { %v1222_v63 = vmul.f32 %v8611_v60, %v897_v41  ;;  %v1531_v2 = vpop.permute.xlu0 %1530  ;;  %v1367_v54 = vpop.permute.xlu1 %1366 }
 0x179   : > { %1653 = vst.msk [vmem:[#allocation2 + $0x19] sm:$0xff] %vm1651_vm8, %v1531_v2  ;;  %v901_v42 = vpop.f32.mrb[64].mxu0 }
 0x17a   : > { %1488 = vst.msk [vmem:[#allocation2 + $0x22] sm:$0xff] %vm1485_vm7, %v1367_v54  ;;  %v902_v4 = vadd.f32 %v8627_v0, %v901_v42  ;;  %1588 = vrot.lane.b32.xlu0 %v1221_v58, %s10308_s20  ;;  %1422 = vrot.lane.b32.xlu1 %v1221_v58, %s8014_s18  ;;  %v6560_v32 = vpop.f32.mrb[65].mxu0 }
 0x17b   : > { %1310 = vst.msk [vmem:[#allocation2 + $0x10b] sm:$0xff] %vm1278_vm6, %v1222_v63 }
 0x17c   : > { %v1223_v5 = vmul.f32 %v8613_v61, %v902_v4  ;;  %v1533_v43 = vpop.permute.xlu1 %1532  ;;  %v1369_v60 = vpop.permute.xlu0 %1368  ;;  %v1697_v7 = vld [vmem:[#allocation2 + $0x10] sm:$0xff] }
 0x17d   : > { %1654 = vst.msk [vmem:[#allocation2 + $0x21] sm:$0xff] %vm1651_vm8, %v1533_v43  ;;  %v906_v8 = vpop.f32.mrb[66].mxu0  ;;  %6598 = vmatmul.mubr.msk.f32.gmra.mrb[18].mxu1 %vm1232_vm5, %v1697_v7 }
 0x17e   : > { %1489 = vst.msk [vmem:[#allocation2 + $0x2a] sm:$0xff] %vm1485_vm7, %v1369_v60  ;;  %v907_v33 = vadd.f32 %v8627_v0, %v906_v8  ;;  %1590 = vrot.lane.b32.xlu0 %v1222_v63, %s10308_s20  ;;  %1424 = vrot.lane.b32.xlu1 %v1222_v63, %s8014_s18  ;;  %v6563_v44 = vpop.f32.mrb[67].mxu0  ;;  %v985_v0 = vld [vmem:[%s10299_s7 + $0x140] sm:$0xf] }
 0x17f   : > { %1311 = vst.msk [vmem:[#allocation2 + $0x113] sm:$0xff] %vm1278_vm6, %v1223_v5  ;;  %6600 = vmatprep.mubr.msk.f32.mxu1 %vm8010_vm1, %v8011_v6 }
 0x180   : > { %v1224_v61 = vmul.f32 %v8629_v1, %v907_v33  ;;  %v1535_v9 = vpop.permute.xlu0 %1534  ;;  %v1371_v11 = vpop.permute.xlu1 %1370  ;;  %v1698_v34 = vld [vmem:[#allocation2 + $0x18] sm:$0xff] }
 0x181   : > { %1655 = vst.msk [vmem:[#allocation2 + $0x29] sm:$0xff] %vm1651_vm8, %v1535_v9  ;;  %6601 = vmatmul.mubr.msk.f32.gmra.mrb[20].mxu1 %vm1232_vm5, %v1698_v34 }
 0x182   : > { %1490 = vst.msk [vmem:[#allocation2 + $0x32] sm:$0xff] %vm1485_vm7, %v1371_v11  ;;  %1592 = vrot.lane.b32.xlu0 %v1223_v5, %s10308_s20  ;;  %1426 = vrot.lane.b32.xlu1 %v1223_v5, %s8014_s18  ;;  %v5814_v11 = vld [vmem:[%s10321_s3 + $0x28] sm:$0xff] }
 0x183   : > { %1312 = vst.msk [vmem:[#allocation2 + $0x11b] sm:$0xff] %vm1278_vm6, %v1224_v61  ;;  %6603 = vmatprep.mubr.msk.f32.mxu1 %vm8010_vm1, %v8011_v6  ;;  %6719 = vmatpush3.msra.mxu1 %v5814_v11 }
 0x184   : > { %v1537_v1 = vpop.permute.xlu1 %1536  ;;  %v1373_v15 = vpop.permute.xlu0 %1372  ;;  %v1699_v35 = vld [vmem:[#allocation2 + $0x20] sm:$0xff]  ;;  %7371 = vmatprep.subr.bf16.mxu1 %v8009_v3 }
 0x185   : > { %1656 = vst.msk [vmem:[#allocation2 + $0x31] sm:$0xff] %vm1651_vm8, %v1537_v1  ;;  %6604 = vmatmul.mubr.msk.f32.gmra.mrb[22].mxu1 %vm1232_vm5, %v1699_v35  ;;  %v8968_v1 = vpop.f32.mrb[10].mxu1 }
 0x186   : > { %1491 = vst.msk [vmem:[#allocation2 + $0x3a] sm:$0xff] %vm1485_vm7, %v1373_v15  ;;  %1594 = vrot.lane.b32.xlu0 %v1224_v61, %s10308_s20  ;;  %1428 = vrot.lane.b32.xlu1 %v1224_v61, %s8014_s18  ;;  %v6581_v35 = vpop.f32.mrb[11].mxu1 }
 0x187   : > { %6606 = vmatprep.mubr.msk.f32.mxu1 %vm8010_vm1, %v8011_v6 }
 0x188   : > { %v1539_v16 = vpop.permute.xlu0 %1538  ;;  %v1375_v27 = vpop.permute.xlu1 %1374  ;;  %v1700_v46 = vld [vmem:[#allocation2 + $0x28] sm:$0xff] }
 0x189   : > { %1657 = vst.msk [vmem:[#allocation2 + $0x39] sm:$0xff] %vm1651_vm8, %v1539_v16  ;;  %6607 = vmatmul.mubr.msk.f32.gmra.mrb[24].mxu1 %vm1232_vm5, %v1700_v46  ;;  %v8973_v46 = vpop.f32.mrb[12].mxu1 }
 0x18a   : > { %1492 = vst.msk [vmem:[#allocation2 + $0x42] sm:$0xff] %vm1485_vm7, %v1375_v27  ;;  %1596 = vrot.lane.b32.xlu0 %v8637_v13, %s10308_s20  ;;  %1430 = vrot.lane.b32.xlu1 %v8637_v13, %s8014_s18 }
 0x18b   : > { %6609 = vmatprep.mubr.msk.f32.mxu1 %vm8010_vm1, %v8011_v6 }
 0x18c   : > { %v1541_v17 = vpop.permute.xlu1 %1540  ;;  %v1377_v36 = vpop.permute.xlu0 %1376  ;;  %v1701_v47 = vld [vmem:[#allocation2 + $0x30] sm:$0xff] }
 0x18d   : > { %1658 = vst.msk [vmem:[#allocation2 + $0x41] sm:$0xff] %vm1651_vm8, %v1541_v17  ;;  %6610 = vmatmul.mubr.msk.f32.gmra.mrb[26].mxu1 %vm1232_vm5, %v1701_v47 }
 0x18e   : > { %1493 = vst.msk [vmem:[#allocation2 + $0x4a] sm:$0xff] %vm1485_vm7, %v1377_v36  ;;  %1598 = vrot.lane.b32.xlu0 %v8646_v22, %s10308_s20  ;;  %1432 = vrot.lane.b32.xlu1 %v8646_v22, %s8014_s18  ;;  %v6584_v36 = vpop.f32.mrb[13].mxu1 }
 0x18f   : > { %6612 = vmatprep.mubr.msk.f32.mxu1 %vm8010_vm1, %v8011_v6 }
 0x190   : > { %v1543_v13 = vpop.permute.xlu0 %1542  ;;  %v1379_v18 = vpop.permute.xlu1 %1378  ;;  %v1702_v19 = vld [vmem:[#allocation2 + $0x38] sm:$0xff] }
 0x191   : > { %1659 = vst.msk [vmem:[#allocation2 + $0x49] sm:$0xff] %vm1651_vm8, %v1543_v13  ;;  %6613 = vmatmul.mubr.msk.f32.gmra.mrb[28].mxu1 %vm1232_vm5, %v1702_v19 }
 0x192   : > { %1494 = vst.msk [vmem:[#allocation2 + $0x52] sm:$0xff] %vm1485_vm7, %v1379_v18  ;;  %1600 = vrot.lane.b32.xlu0 %v8656_v62, %s10308_s20  ;;  %1434 = vrot.lane.b32.xlu1 %v8656_v62, %s8014_s18 }
 0x193   : > { %6615 = vmatprep.mubr.msk.f32.mxu1 %vm8010_vm1, %v8011_v6 }
 0x194   : > { %v1545_v22 = vpop.permute.xlu1 %1544  ;;  %v1381_v20 = vpop.permute.xlu0 %1380  ;;  %v1703_v48 = vld [vmem:[#allocation2 + $0x40] sm:$0xff] }
 0x195   : > { %1660 = vst.msk [vmem:[#allocation2 + $0x51] sm:$0xff] %vm1651_vm8, %v1545_v22  ;;  %6616 = vmatmul.mubr.msk.f32.gmra.mrb[30].mxu1 %vm1232_vm5, %v1703_v48  ;;  %v2184_v36 = vld [vmem:[#allocation2 + $0x3a] sm:$0xff] }
 0x196   : > { %1495 = vst.msk [vmem:[#allocation2 + $0x5a] sm:$0xff] %vm1485_vm7, %v1381_v20  ;;  %1602 = vrot.lane.b32.xlu0 %v8666_v10, %s10308_s20  ;;  %1436 = vrot.lane.b32.xlu1 %v8666_v10, %s8014_s18 }
 0x197   : > { %6618 = vmatprep.mubr.msk.f32.mxu1 %vm8010_vm1, %v8011_v6 }
 0x198   : > { %v1547_v62 = vpop.permute.xlu0 %1546  ;;  %v1383_v37 = vpop.permute.xlu1 %1382  ;;  %v1704_v28 = vld [vmem:[#allocation2 + $0x48] sm:$0xff] }
 0x199   : > { %1661 = vst.msk [vmem:[#allocation2 + $0x59] sm:$0xff] %vm1651_vm8, %v1547_v62  ;;  %6619 = vmatmul.mubr.msk.f32.gmra.mrb[32].mxu1 %vm1232_vm5, %v1704_v28 }
 0x19a   : > { %1496 = vst.msk [vmem:[#allocation2 + $0x62] sm:$0xff] %vm1485_vm7, %v1383_v37  ;;  %6621 = vmatprep.mubr.msk.f32.mxu1 %vm8010_vm1, %v8011_v6 }
 0x19c   : > { %v1549_v21 = vpop.permute.xlu1 %1548  ;;  %v1385_v49 = vpop.permute.xlu0 %1384  ;;  %v1705_v24 = vld [vmem:[#allocation2 + $0x50] sm:$0xff] }
 0x19d   : > { %1662 = vst.msk [vmem:[#allocation2 + $0x61] sm:$0xff] %vm1651_vm8, %v1549_v21  ;;  %6622 = vmatmul.mubr.msk.f32.gmra.mrb[34].mxu1 %vm1232_vm5, %v1705_v24 }
 0x19e   : > { %1497 = vst.msk [vmem:[#allocation2 + $0x6a] sm:$0xff] %vm1485_vm7, %v1385_v49  ;;  %6624 = vmatprep.mubr.msk.f32.mxu1 %vm8010_vm1, %v8011_v6 }
 0x1a0   : > { %v1551_v10 = vpop.permute.xlu0 %1550  ;;  %v1387_v38 = vpop.permute.xlu1 %1386  ;;  %v1706_v25 = vld [vmem:[#allocation2 + $0x58] sm:$0xff] }
 0x1a1   : > { %1663 = vst.msk [vmem:[#allocation2 + $0x69] sm:$0xff] %vm1651_vm8, %v1551_v10  ;;  %6625 = vmatmul.mubr.msk.f32.gmra.mrb[36].mxu1 %vm1232_vm5, %v1706_v25 }
 0x1a2   : > { %1498 = vst.msk [vmem:[#allocation2 + $0x72] sm:$0xff] %vm1485_vm7, %v1387_v38  ;;  %6627 = vmatprep.mubr.msk.f32.mxu1 %vm8010_vm1, %v8011_v6 }
 0x1a4   : > { %v1553_v50 = vpop.permute.xlu1 %1552  ;;  %v1389_v29 = vpop.permute.xlu0 %1388  ;;  %v1707_v55 = vld [vmem:[#allocation2 + $0x60] sm:$0xff] }
 0x1a5   : > { %1664 = vst.msk [vmem:[#allocation2 + $0x71] sm:$0xff] %vm1651_vm8, %v1553_v50  ;;  %6628 = vmatmul.mubr.msk.f32.gmra.mrb[38].mxu1 %vm1232_vm5, %v1707_v55 }
 0x1a6   : > { %1499 = vst.msk [vmem:[#allocation2 + $0x7a] sm:$0xff] %vm1485_vm7, %v1389_v29  ;;  %6630 = vmatprep.mubr.msk.f32.mxu1 %vm8010_vm1, %v8011_v6 }
 0x1a8   : > { %v1555_v39 = vpop.permute.xlu0 %1554  ;;  %v1391_v51 = vpop.permute.xlu1 %1390  ;;  %v1708_v56 = vld [vmem:[#allocation2 + $0x68] sm:$0xff] }
 0x1a9   : > { %1665 = vst.msk [vmem:[#allocation2 + $0x79] sm:$0xff] %vm1651_vm8, %v1555_v39  ;;  %6631 = vmatmul.mubr.msk.f32.gmra.mrb[40].mxu1 %vm1232_vm5, %v1708_v56 }
 0x1aa   : > { %1500 = vst.msk [vmem:[#allocation2 + $0x82] sm:$0xff] %vm1485_vm7, %v1391_v51  ;;  %6633 = vmatprep.mubr.msk.f32.mxu1 %vm8010_vm1, %v8011_v6 }
 0x1ac   : > { %v1557_v57 = vpop.permute.xlu1 %1556  ;;  %v1393_v30 = vpop.permute.xlu0 %1392  ;;  %v1709_v52 = vld [vmem:[#allocation2 + $0x70] sm:$0xff] }
 0x1ad   : > { %1666 = vst.msk [vmem:[#allocation2 + $0x81] sm:$0xff] %vm1651_vm8, %v1557_v57  ;;  %6634 = vmatmul.mubr.msk.f32.gmra.mrb[42].mxu1 %vm1232_vm5, %v1709_v52 }
 0x1ae   : > { %1501 = vst.msk [vmem:[#allocation2 + $0x8a] sm:$0xff] %vm1485_vm7, %v1393_v30  ;;  %6636 = vmatprep.mubr.msk.f32.mxu1 %vm8010_vm1, %v8011_v6 }
 0x1b0   : > { %v1559_v40 = vpop.permute.xlu0 %1558  ;;  %v1395_v58 = vpop.permute.xlu1 %1394  ;;  %v1710_v59 = vld [vmem:[#allocation2 + $0x78] sm:$0xff] }
 0x1b1   : > { %1667 = vst.msk [vmem:[#allocation2 + $0x89] sm:$0xff] %vm1651_vm8, %v1559_v40  ;;  %6637 = vmatmul.mubr.msk.f32.gmra.mrb[44].mxu1 %vm1232_vm5, %v1710_v59 }
 0x1b2   : > { %1502 = vst.msk [vmem:[#allocation2 + $0x92] sm:$0xff] %vm1485_vm7, %v1395_v58  ;;  %6639 = vmatprep.mubr.msk.f32.mxu1 %vm8010_vm1, %v8011_v6 }
 0x1b4   : > { %v1561_v26 = vpop.permute.xlu1 %1560  ;;  %v1397_v53 = vpop.permute.xlu0 %1396  ;;  %v1711_v41 = vld [vmem:[#allocation2 + $0x80] sm:$0xff] }
 0x1b5   : > { %1668 = vst.msk [vmem:[#allocation2 + $0x91] sm:$0xff] %vm1651_vm8, %v1561_v26  ;;  %6640 = vmatmul.mubr.msk.f32.gmra.mrb[46].mxu1 %vm1232_vm5, %v1711_v41 }
 0x1b6   : > { %1503 = vst.msk [vmem:[#allocation2 + $0x9a] sm:$0xff] %vm1485_vm7, %v1397_v53  ;;  %6642 = vmatprep.mubr.msk.f32.mxu1 %vm8010_vm1, %v8011_v6 }
 0x1b8   : > { %v1563_v31 = vpop.permute.xlu0 %1562  ;;  %v1399_v63 = vpop.permute.xlu1 %1398  ;;  %v1712_v2 = vld [vmem:[#allocation2 + $0x88] sm:$0xff] }
 0x1b9   : > { %1669 = vst.msk [vmem:[#allocation2 + $0x99] sm:$0xff] %vm1651_vm8, %v1563_v31  ;;  %6643 = vmatmul.mubr.msk.f32.gmra.mrb[48].mxu1 %vm1232_vm5, %v1712_v2 }
 0x1ba   : > { %1504 = vst.msk [vmem:[#allocation2 + $0xa2] sm:$0xff] %vm1485_vm7, %v1399_v63  ;;  %6645 = vmatprep.mubr.msk.f32.mxu1 %vm8010_vm1, %v8011_v6 }
 0x1bc   : > { %v1565_v54 = vpop.permute.xlu1 %1564  ;;  %v1401_v42 = vpop.permute.xlu0 %1400  ;;  %v1713_v4 = vld [vmem:[#allocation2 + $0x90] sm:$0xff] }
 0x1bd   : > { %1670 = vst.msk [vmem:[#allocation2 + $0xa1] sm:$0xff] %vm1651_vm8, %v1565_v54  ;;  %6646 = vmatmul.mubr.msk.f32.gmra.mrb[50].mxu1 %vm1232_vm5, %v1713_v4 }
 0x1be   : > { %1505 = vst.msk [vmem:[#allocation2 + $0xaa] sm:$0xff] %vm1485_vm7, %v1401_v42  ;;  %6648 = vmatprep.mubr.msk.f32.mxu1 %vm8010_vm1, %v8011_v6 }
 0x1c0   : > { %v1567_v32 = vpop.permute.xlu0 %1566  ;;  %v1403_v5 = vpop.permute.xlu1 %1402  ;;  %v1714_v43 = vld [vmem:[#allocation2 + $0x98] sm:$0xff] }
 0x1c1   : > { %1671 = vst.msk [vmem:[#allocation2 + $0xa9] sm:$0xff] %vm1651_vm8, %v1567_v32  ;;  %6649 = vmatmul.mubr.msk.f32.gmra.mrb[52].mxu1 %vm1232_vm5, %v1714_v43 }
 0x1c2   : > { %1506 = vst.msk [vmem:[#allocation2 + $0xb2] sm:$0xff] %vm1485_vm7, %v1403_v5  ;;  %6651 = vmatprep.mubr.msk.f32.mxu1 %vm8010_vm1, %v8011_v6 }
 0x1c4   : > { %v1569_v60 = vpop.permute.xlu1 %1568  ;;  %v1405_v7 = vpop.permute.xlu0 %1404  ;;  %v1715_v8 = vld [vmem:[#allocation2 + $0xa0] sm:$0xff] }
 0x1c5   : > { %1672 = vst.msk [vmem:[#allocation2 + $0xb1] sm:$0xff] %vm1651_vm8, %v1569_v60  ;;  %6652 = vmatmul.mubr.msk.f32.gmra.mrb[54].mxu1 %vm1232_vm5, %v1715_v8 }
 0x1c6   : > { %1507 = vst.msk [vmem:[#allocation2 + $0xba] sm:$0xff] %vm1485_vm7, %v1405_v7  ;;  %6654 = vmatprep.mubr.msk.f32.mxu1 %vm8010_vm1, %v8011_v6 }
 0x1c8   : > { %v1571_v33 = vpop.permute.xlu0 %1570  ;;  %v1716_v44 = vld [vmem:[#allocation2 + $0xa8] sm:$0xff] }
 0x1c9   : > { %1673 = vst.msk [vmem:[#allocation2 + $0xb9] sm:$0xff] %vm1651_vm8, %v1571_v33  ;;  %6655 = vmatmul.mubr.msk.f32.gmra.mrb[56].mxu1 %vm1232_vm5, %v1716_v44 }
 0x1ca   : > { %6657 = vmatprep.mubr.msk.f32.mxu1 %vm8010_vm1, %v8011_v6 }
 0x1cc   : > { %v1573_v61 = vpop.permute.xlu0 %1572  ;;  %v1717_v9 = vld [vmem:[#allocation2 + $0xb0] sm:$0xff] }
 0x1cd   : > { %6658 = vmatmul.mubr.msk.f32.gmra.mrb[58].mxu1 %vm1232_vm5, %v1717_v9  ;;  %v5857_v9 = vld [vmem:[%s10321_s3 + $0x38] sm:$0xff] }
 0x1ce   : > { %6660 = vmatprep.mubr.msk.f32.mxu1 %vm8010_vm1, %v8011_v6 }
 0x1d0   : > { %v1575_v34 = vpop.permute.xlu0 %1574  ;;  %v1718_v45 = vld [vmem:[#allocation2 + $0xb8] sm:$0xff] }
 0x1d1   : > { %6661 = vmatmul.mubr.msk.f32.gmra.mrb[60].mxu1 %vm1232_vm5, %v1718_v45  ;;  %v2179_v45 = vld [vmem:[#allocation2 + $0x12] sm:$0xff] }
 0x1d2   : > { %6663 = vmatprep.mubr.msk.f32.mxu1 %vm8010_vm1, %v8011_v6 }
 0x1d4   : > { %v1577_v14 = vpop.permute.xlu0 %1576 }
 0x1d5   : > { %v1179_v15 = vpop.permute.xlu1 %1178 }
 0x1d6   : > { %v1229_v16 = vmul.f32 %v1179_v15, %v932_v12  ;;  %v7884_v12 = vld [vmem:[%s10322_s2] ss:$0 sm:$0xff]  ;;  %s5592_s2 = sshll.u32 %s480_s21, 4  ;;  %s5593_s2 = int_to_ptr.vmem [resolvable:$true] %s5592_s2 }
 0x1d7   : > { %v942_v15 = vadd.f32 %v7884_v12, %v8973_v46  ;;  %v2182_v46 = vld [vmem:[#allocation2 + $0x2a] sm:$0xff] }
 0x1d8   : > { %1317 = vst.msk [vmem:[#allocation2 + $0x143] sm:$0xff] %vm1278_vm6, %v1229_v16  ;;  %v1579_v27 = vpop.permute.xlu0 %1578  ;;  %1604 = vrot.lane.b32.xlu0 %v1229_v16, %s10308_s20  ;;  %1438 = vrot.lane.b32.xlu1 %v1229_v16, %s8014_s18 }
 0x1d9   : > { %v1407_v17 = vpop.permute.xlu1 %1406 }
 0x1da   : > { %1508 = vst.msk [vmem:[#allocation2 + $0xc2] sm:$0xff] %vm1485_vm7, %v1407_v17 }
 0x1db   : > { %1674 = vst.msk [vmem:[#allocation2 + $0xc1] sm:$0xff] %vm1651_vm8, %v1573_v61  ;;  %v5856_v61 = vld [vmem:[%s10321_s3 + $0x30] sm:$0xff] }
 0x1dc   : > { %v1581_v47 = vpop.permute.xlu0 %1580  ;;  %1188 = vperm.xlu0 %7880, %v985_v0   ;;  %1183 = vperm.xlu1 %7881, %v984_v23   ;;  %v2183_v23 = vld [vmem:[#allocation2 + $0x32] sm:$0xff] }
 0x1dd   : > { %v1409_v13 = vpop.permute.xlu1 %1408 }
 0x1de   : > { %1509 = vst.msk [vmem:[#allocation2 + $0xca] sm:$0xff] %vm1485_vm7, %v1409_v13  ;;  %v2186_v13 = vld [vmem:[#allocation2 + $0x4a] sm:$0xff] }
 0x1df   : > { %1675 = vst.msk [vmem:[#allocation2 + $0xc9] sm:$0xff] %vm1651_vm8, %v1575_v34  ;;  %v7372_v34 = vpack.c.bf16 %v5857_v9, %v5856_v61  ;;  %v2663_v61 = vld [vmem:[#allocation2 + $0x4c] sm:$0xff]  ;;  %v2664_v9 = vld [vmem:[#allocation2 + $0x54] sm:$0xff] }
 0x1e0   : > { %v1583_v18 = vpop.permute.xlu0 %1582 }
 0x1e1   : > { %v1411_v19 = vpop.permute.xlu1 %1410 }
 0x1e2   : > { %1510 = vst.msk [vmem:[#allocation2 + $0xd2] sm:$0xff] %vm1485_vm7, %v1411_v19  ;;  %v1719_v22 = vld [vmem:[#allocation2 + $0xc0] sm:$0xff]  ;;  %v2187_v19 = vld [vmem:[#allocation2 + $0x52] sm:$0xff] }
 0x1e3   : > { %1676 = vst.msk [vmem:[#allocation2 + $0xd1] sm:$0xff] %vm1651_vm8, %v1577_v14  ;;  %6664 = vmatmul.mubr.msk.f32.gmra.mrb[62].mxu1 %vm1232_vm5, %v1719_v22  ;;  %v937_v14 = vadd.f32 %v7884_v12, %v8968_v1  ;;  %v2181_v1 = vld [vmem:[#allocation2 + $0x22] sm:$0xff]  ;;  %v2188_v22 = vld [vmem:[#allocation2 + $0x5a] sm:$0xff] }
 0x1e4   : > { %v1585_v20 = vpop.permute.xlu0 %1584  ;;  %6666 = vmatprep.mubr.msk.f32.mxu1 %vm8010_vm1, %v8011_v6  ;;  %v2668_v12 = vld [vmem:[#allocation2 + $0x74] sm:$0xff] }
 0x1e5   : > { %v1413_v48 = vpop.permute.xlu1 %1412 }
 0x1e6   : > { %1511 = vst.msk [vmem:[#allocation2 + $0xda] sm:$0xff] %vm1485_vm7, %v1413_v48  ;;  %v1720_v62 = vld [vmem:[#allocation2 + $0xc8] sm:$0xff] }
 0x1e7   : > { %1677 = vst.msk [vmem:[#allocation2 + $0xd9] sm:$0xff] %vm1651_vm8, %v1579_v27  ;;  %6667 = vmatmul.mubr.msk.f32.gmra.mrb[64].mxu1 %vm1232_vm5, %v1720_v62  ;;  %v2180_v27 = vld [vmem:[#allocation2 + $0x1a] sm:$0xff]  ;;  %v2190_v48 = vld [vmem:[#allocation2 + $0x6a] sm:$0xff]  ;;  %v2191_v62 = vld [vmem:[#allocation2 + $0x72] sm:$0xff] }
 0x1e8   : > { %v1587_v37 = vpop.permute.xlu0 %1586  ;;  %6669 = vmatprep.mubr.msk.f32.mxu1 %vm8010_vm1, %v8011_v6 }
 0x1e9   : > { %v1415_v28 = vpop.permute.xlu1 %1414 }
 0x1ea   : > { %1512 = vst.msk [vmem:[#allocation2 + $0xe2] sm:$0xff] %vm1485_vm7, %v1415_v28  ;;  %v1721_v21 = vld [vmem:[#allocation2 + $0xd0] sm:$0xff]  ;;  %v2193_v28 = vld [vmem:[#allocation2 + $0x82] sm:$0xff] }
 0x1eb   : > { %1678 = vst.msk [vmem:[#allocation2 + $0xe1] sm:$0xff] %vm1651_vm8, %v1581_v47  ;;  %6670 = vmatmul.mubr.msk.f32.gmra.mrb[66].mxu1 %vm1232_vm5, %v1721_v21  ;;  %v2185_v47 = vld [vmem:[#allocation2 + $0x42] sm:$0xff]  ;;  %v2194_v21 = vld [vmem:[#allocation2 + $0x8a] sm:$0xff] }
 0x1ec   : > { %v1589_v49 = vpop.permute.xlu0 %1588  ;;  %6672 = vmatprep.mubr.msk.f32.mxu1 %vm8010_vm1, %v8011_v6 }
 0x1ed   : > { %v1417_v24 = vpop.permute.xlu1 %1416 }
 0x1ee   : > { %1513 = vst.msk [vmem:[#allocation2 + $0xea] sm:$0xff] %vm1485_vm7, %v1417_v24  ;;  %v1722_v10 = vld [vmem:[#allocation2 + $0xd8] sm:$0xff] }
 0x1ef   : > { %1679 = vst.msk [vmem:[#allocation2 + $0xe9] sm:$0xff] %vm1651_vm8, %v1583_v18  ;;  %6673 = vmatmul.mubr.msk.f32.gmra.mrb[68].mxu1 %vm1232_vm5, %v1722_v10  ;;  %v5858_v18 = vld [vmem:[%s10321_s3 + $0x40] sm:$0xff]  ;;  %s7885_s3 = scalar_lea.vmem %s5593_s2, 16 }
 0x1f0   : > { %6675 = vmatprep.mubr.msk.f32.mxu1 %vm8010_vm1, %v8011_v6  ;;  %v1591_v25 = vpop.permute.xlu0 %1590  ;;  %v2196_v24 = vld [vmem:[#allocation2 + $0x9a] sm:$0xff]  ;;  %v2197_v10 = vld [vmem:[#allocation2 + $0xa2] sm:$0xff]  ;;  %p7886_p11 = scmp.ne.s32.totalorder %s5593_s2, %s7885_s3 }
 0x1f1   : > { %v1419_v38 = vpop.permute.xlu1 %1418 }
 0x1f2   : > { %1514 = vst.msk [vmem:[#allocation2 + $0xf2] sm:$0xff] %vm1485_vm7, %v1419_v38  ;;  %v1723_v50 = vld [vmem:[#allocation2 + $0xe0] sm:$0xff]  ;;  %v2198_v38 = vld [vmem:[#allocation2 + $0xaa] sm:$0xff]  ;;  %p7887_p12 = pnand %p7886_p11, %p8136_p5 }
 0x1f3   : > { %1680 = vst.msk [vmem:[#allocation2 + $0xf1] sm:$0xff] %vm1651_vm8, %v1585_v20  ;;  %6676 = vmatmul.mubr.msk.f32.gmra.mrb[70].mxu1 %vm1232_vm5, %v1723_v50  ;;  %v2189_v20 = vld [vmem:[#allocation2 + $0x62] sm:$0xff]  ;;  %v2200_v50 = vld [vmem:[#allocation2 + $0xba] sm:$0xff] }
 0x1f4   : > { %6678 = vmatprep.mubr.msk.f32.mxu1 %vm8010_vm1, %v8011_v6  ;;  %v1593_v39 = vpop.permute.xlu0 %1592  ;;  %p7888_p13 = pneg %p7887_p12 }
 0x1f5   : > { %v1421_v29 = vpop.permute.xlu1 %1420 }
 0x1f6   : > { %1515 = vst.msk [vmem:[#allocation2 + $0xfa] sm:$0xff] %vm1485_vm7, %v1421_v29  ;;  %v1724_v55 = vld [vmem:[#allocation2 + $0xe8] sm:$0xff] }
 0x1f7   : > { %1681 = vst.msk [vmem:[#allocation2 + $0xf9] sm:$0xff] %vm1651_vm8, %v1587_v37  ;;  %6679 = vmatmul.mubr.msk.f32.gmra.mrb[72].mxu1 %vm1232_vm5, %v1724_v55  ;;  %v2192_v37 = vld [vmem:[#allocation2 + $0x7a] sm:$0xff]  ;;  %v2201_v29 = vld [vmem:[#allocation2 + $0xc2] sm:$0xff]  ;;  %v2202_v55 = vld [vmem:[#allocation2 + $0xca] sm:$0xff] }
 0x1f8   : > { %6681 = vmatprep.mubr.msk.f32.mxu1 %vm8010_vm1, %v8011_v6  ;;  %v1595_v30 = vpop.permute.xlu0 %1594 }
 0x1f9   : > { %v1423_v51 = vpop.permute.xlu1 %1422 }
 0x1fa   : > { %1516 = vst.msk [vmem:[#allocation2 + $0x102] sm:$0xff] %vm1485_vm7, %v1423_v51  ;;  %v1725_v56 = vld [vmem:[#allocation2 + $0xf0] sm:$0xff]  ;;  %v2204_v51 = vld [vmem:[#allocation2 + $0xda] sm:$0xff] }
 0x1fb   : > { %1682 = vst.msk [vmem:[#allocation2 + $0x101] sm:$0xff] %vm1651_vm8, %v1589_v49  ;;  %6682 = vmatmul.mubr.msk.f32.gmra.mrb[74].mxu1 %vm1232_vm5, %v1725_v56  ;;  %v2195_v49 = vld [vmem:[#allocation2 + $0x92] sm:$0xff]  ;;  %v2205_v56 = vld [vmem:[#allocation2 + $0xe2] sm:$0xff] }
 0x1fc   : > { %6684 = vmatprep.mubr.msk.f32.mxu1 %vm8010_vm1, %v8011_v6  ;;  %v1597_v59 = vpop.permute.xlu0 %1596 }
 0x1fd   : > { %v1425_v57 = vpop.permute.xlu1 %1424 }
 0x1fe   : > { %1517 = vst.msk [vmem:[#allocation2 + $0x10a] sm:$0xff] %vm1485_vm7, %v1425_v57  ;;  %v1726_v52 = vld [vmem:[#allocation2 + $0xf8] sm:$0xff]  ;;  %v2206_v57 = vld [vmem:[#allocation2 + $0xea] sm:$0xff] }
 0x1ff   : > { %1683 = vst.msk [vmem:[#allocation2 + $0x109] sm:$0xff] %vm1651_vm8, %v1591_v25  ;;  %6685 = vmatmul.mubr.msk.f32.gmra.mrb[76].mxu1 %vm1232_vm5, %v1726_v52  ;;  %v2199_v25 = vld [vmem:[#allocation2 + $0xb2] sm:$0xff] }
 0x200   : > { %6687 = vmatprep.mubr.msk.f32.mxu1 %vm8010_vm1, %v8011_v6  ;;  %v1599_v31 = vpop.permute.xlu0 %1598 }
 0x201   : > { %v1427_v40 = vpop.permute.xlu1 %1426 }
 0x202   : > { %1518 = vst.msk [vmem:[#allocation2 + $0x112] sm:$0xff] %vm1485_vm7, %v1427_v40  ;;  %v1727_v58 = vld [vmem:[#allocation2 + $0x100] sm:$0xff] }
 0x203   : > { %1684 = vst.msk [vmem:[#allocation2 + $0x111] sm:$0xff] %vm1651_vm8, %v1593_v39  ;;  %6688 = vmatmul.mubr.msk.f32.gmra.mrb[78].mxu1 %vm1232_vm5, %v1727_v58  ;;  %v2203_v39 = vld [vmem:[#allocation2 + $0xd2] sm:$0xff]  ;;  %v2208_v52 = vld [vmem:[#allocation2 + $0xfa] sm:$0xff] }
 0x204   : > { %6690 = vmatprep.mubr.msk.f32.mxu1 %vm8010_vm1, %v8011_v6  ;;  %v1601_v42 = vpop.permute.xlu0 %1600 }
 0x205   : > { %v1429_v26 = vpop.permute.xlu1 %1428 }
 0x206   : > { %1519 = vst.msk [vmem:[#allocation2 + $0x11a] sm:$0xff] %vm1485_vm7, %v1429_v26  ;;  %v1728_v53 = vld [vmem:[#allocation2 + $0x108] sm:$0xff] }
 0x207   : > { %1685 = vst.msk [vmem:[#allocation2 + $0x119] sm:$0xff] %vm1651_vm8, %v1595_v30  ;;  %6691 = vmatmul.mubr.msk.f32.gmra.mrb[80].mxu1 %vm1232_vm5, %v1728_v53  ;;  %v2207_v30 = vld [vmem:[#allocation2 + $0xf2] sm:$0xff]  ;;  %v2209_v40 = vld [vmem:[#allocation2 + $0x102] sm:$0xff] }
 0x208   : > { %6693 = vmatprep.mubr.msk.f32.mxu1 %vm8010_vm1, %v8011_v6  ;;  %v1603_v43 = vpop.permute.xlu0 %1602 }
 0x209   : > { %v1431_v41 = vpop.permute.xlu1 %1430 }
 0x20a   : > { %1520 = vst.msk [vmem:[#allocation2 + $0x122] sm:$0xff] %vm1485_vm7, %v1431_v41  ;;  %v1729_v63 = vld [vmem:[#allocation2 + $0x110] sm:$0xff] }
 0x20b   : > { %1686 = vst.msk [vmem:[#allocation2 + $0x121] sm:$0xff] %vm1651_vm8, %v1597_v59  ;;  %6694 = vmatmul.mubr.msk.f32.gmra.mrb[82].mxu1 %vm1232_vm5, %v1729_v63  ;;  %v2210_v26 = vld [vmem:[#allocation2 + $0x10a] sm:$0xff] }
 0x20c   : > { %6696 = vmatprep.mubr.msk.f32.mxu1 %vm8010_vm1, %v8011_v6 }
 0x20d   : > { %v1433_v2 = vpop.permute.xlu1 %1432 }
 0x20e   : > { %1521 = vst.msk [vmem:[#allocation2 + $0x12a] sm:$0xff] %vm1485_vm7, %v1433_v2  ;;  %v1730_v54 = vld [vmem:[#allocation2 + $0x118] sm:$0xff] }
 0x20f   : > { %1687 = vst.msk [vmem:[#allocation2 + $0x129] sm:$0xff] %vm1651_vm8, %v1599_v31  ;;  %6697 = vmatmul.mubr.msk.f32.gmra.mrb[84].mxu1 %vm1232_vm5, %v1730_v54  ;;  %v2211_v31 = vld [vmem:[#allocation2 + $0x112] sm:$0xff] }
 0x210   : > { %6699 = vmatprep.mubr.msk.f32.mxu1 %vm8010_vm1, %v8011_v6 }
 0x211   : > { %v1435_v4 = vpop.permute.xlu1 %1434 }
 0x212   : > { %1522 = vst.msk [vmem:[#allocation2 + $0x132] sm:$0xff] %vm1485_vm7, %v1435_v4  ;;  %v1731_v32 = vld [vmem:[#allocation2 + $0x120] sm:$0xff] }
 0x213   : > { %1688 = vst.msk [vmem:[#allocation2 + $0x131] sm:$0xff] %vm1651_vm8, %v1601_v42  ;;  %6700 = vmatmul.mubr.msk.f32.gmra.mrb[86].mxu1 %vm1232_vm5, %v1731_v32  ;;  %v2212_v63 = vld [vmem:[#allocation2 + $0x11a] sm:$0xff] }
 0x214   : > { %6702 = vmatprep.mubr.msk.f32.mxu1 %vm8010_vm1, %v8011_v6 }
 0x215   : > { %v1437_v5 = vpop.permute.xlu1 %1436 }
 0x216   : > { %1523 = vst.msk [vmem:[#allocation2 + $0x13a] sm:$0xff] %vm1485_vm7, %v1437_v5  ;;  %v1732_v60 = vld [vmem:[#allocation2 + $0x128] sm:$0xff] }
 0x217   : > { %1689 = vst.msk [vmem:[#allocation2 + $0x139] sm:$0xff] %vm1651_vm8, %v1603_v43  ;;  %6703 = vmatmul.mubr.msk.f32.gmra.mrb[88].mxu1 %vm1232_vm5, %v1732_v60  ;;  %v2213_v2 = vld [vmem:[#allocation2 + $0x122] sm:$0xff] }
 0x218   : > { %6705 = vmatprep.mubr.msk.f32.mxu1 %vm8010_vm1, %v8011_v6  ;;  %v2658_v60 = vld [vmem:[#allocation2 + $0x24] sm:$0xff] }
 0x21a   : > { %v1733_v7 = vld [vmem:[#allocation2 + $0x130] sm:$0xff] }
 0x21b   : > { %6706 = vmatmul.mubr.msk.f32.gmra.mrb[90].mxu1 %vm1232_vm5, %v1733_v7  ;;  %v2214_v54 = vld [vmem:[#allocation2 + $0x12a] sm:$0xff] }
 0x21c   : > { %6708 = vmatprep.mubr.msk.f32.mxu1 %vm8010_vm1, %v8011_v6  ;;  %v2659_v7 = vld [vmem:[#allocation2 + $0x2c] sm:$0xff] }
 0x21e   : > { %v1734_v8 = vld [vmem:[#allocation2 + $0x138] sm:$0xff] }
 0x21f   : > { %6709 = vmatmul.mubr.msk.f32.gmra.mrb[92].mxu1 %vm1232_vm5, %v1734_v8  ;;  %v2215_v42 = vld [vmem:[#allocation2 + $0x132] sm:$0xff] }
 0x220   : > { %6711 = vmatprep.mubr.msk.f32.mxu1 %vm8010_vm1, %v8011_v6  ;;  %v2660_v8 = vld [vmem:[#allocation2 + $0x34] sm:$0xff] }
 0x24a   : > { %v1605_v33 = vpop.permute.xlu0 %1604  ;;  %v1439_v44 = vpop.permute.xlu1 %1438 }
 0x24b   : > { %1524 = vst.msk [vmem:[#allocation2 + $0x142] sm:$0xff] %vm1485_vm7, %v1439_v44  ;;  %v2662_v44 = vld [vmem:[#allocation2 + $0x44] sm:$0xff] }
 0x24c   : > { %1690 = vst.msk [vmem:[#allocation2 + $0x141] sm:$0xff] %vm1651_vm8, %v1605_v33  ;;  %v2661_v33 = vld [vmem:[#allocation2 + $0x3c] sm:$0xff] }
 0x253   : > { %v1735_v11 = vld [vmem:[#allocation2 + $0x140] sm:$0xf] }
 0x254   : > { %6712 = vmatmul.mubr.msk.f32.gmra.mrb[94].mxu1 %vm1232_vm5, %v1735_v11  ;;  %v2216_v4 = vld [vmem:[#allocation2 + $0x13a] sm:$0xff] }
 0x255   : > { %6720 = vmatprep.mubr.msk.f32.mxu1 %vm8010_vm1, %v8011_v6  ;;  %v2665_v11 = vld [vmem:[#allocation2 + $0x5c] sm:$0xff] }
 0x258   : > { %6721 = vmatmul.mubr.msk.f32.vlgmr.msra.gmra.mrb[14].mxu1 %vm1232_vm5, %v2179_v45  ;;  %v2667_v45 = vld [vmem:[#allocation2 + $0x6c] sm:$0xff] }
 0x259   : > { %6723 = vmatprep.mubr.msk.f32.mxu1 %vm8010_vm1, %v8011_v6  ;;  %7373 = vmatpush3.bf16.msra.mxu1 %v7372_v34  ;;  %v2666_v34 = vld [vmem:[#allocation2 + $0x64] sm:$0xff] }
 0x25a   : > { %6847 = vmatprep.subr.mxu1 %v8011_v6 }
 0x25b   : > { %v1189_v35 = vpop.permute.xlu0 %1188  ;;  %v1184_v16 = vpop.permute.xlu1 %1183 }
 0x25c   : > { %v1231_v17 = vmul.f32 %v1189_v35, %v942_v15  ;;  %v1230_v0 = vmul.f32 %v1184_v16, %v937_v14  ;;  %6724 = vmatmul.mubr.msk.f32.gmra.mrb[16].mxu1 %vm1232_vm5, %v2180_v27  ;;  %v2669_v14 = vld [vmem:[#allocation2 + $0x7c] sm:$0xff]  ;;  %v2670_v15 = vld [vmem:[#allocation2 + $0x84] sm:$0xff]  ;;  %v2671_v35 = vld [vmem:[#allocation2 + $0x8c] sm:$0xff] }
 0x25d   : > { %6726 = vmatprep.mubr.msk.f32.mxu1 %vm8010_vm1, %v8011_v6  ;;  %6848 = vmatpush3.msra.mxu1 %v5858_v18  ;;  %v2672_v16 = vld [vmem:[#allocation2 + $0x94] sm:$0xff]  ;;  %v2673_v27 = vld [vmem:[#allocation2 + $0x9c] sm:$0xff]  ;;  %v2682_v18 = vld [vmem:[#allocation2 + $0xe4] sm:$0xff] }
 0x25e   : > { %1320 = vst.msk [vmem:[#allocation2 + $0x153] sm:$0xf] %vm1319_vm9, %v1231_v17  ;;  %1606 = vrot.lane.b32.xlu0 %v1230_v0, %s10308_s20  ;;  %1440 = vrot.lane.b32.xlu1 %v1230_v0, %s8014_s18 }
 0x25f   : > { %1318 = vst.msk [vmem:[#allocation2 + $0x14b] sm:$0xff] %vm1278_vm6, %v1230_v0  ;;  %v2675_v0 = vld [vmem:[#allocation2 + $0xac] sm:$0xff]  ;;  %vm4270_vm6 = vcmask 261120  }
 0x260   : > { %6727 = vmatmul.mubr.msk.f32.gmra.mrb[18].mxu1 %vm1232_vm5, %v2181_v1  ;;  %v2676_v1 = vld [vmem:[#allocation2 + $0xb4] sm:$0xff] }
 0x261   : > { %6729 = vmatprep.mubr.msk.f32.mxu1 %vm8010_vm1, %v8011_v6 }
 0x262   : > { %1608 = vrot.lane.b32.xlu0 %v1231_v17, %s10308_s20  ;;  %1442 = vrot.lane.b32.xlu1 %v1231_v17, %s8014_s18  ;;  %v2674_v17 = vld [vmem:[#allocation2 + $0xa4] sm:$0xff]  ;;  %s10324_s20 = smov 16   ;;  %s10183_s18 = scalar_lea.sflag [#allocation7], %s5562_s22 }
 0x264   : > { %6730 = vmatmul.mubr.msk.f32.gmra.mrb[20].mxu1 %vm1232_vm5, %v2182_v46  ;;  %v2677_v46 = vld [vmem:[#allocation2 + $0xbc] sm:$0xff] }
 0x265   : > { %6732 = vmatprep.mubr.msk.f32.mxu1 %vm8010_vm1, %v8011_v6 }
 0x268   : > { %6733 = vmatmul.mubr.msk.f32.gmra.mrb[22].mxu1 %vm1232_vm5, %v2183_v23  ;;  %v2678_v23 = vld [vmem:[#allocation2 + $0xc4] sm:$0xff] }
 0x269   : > { %6735 = vmatprep.mubr.msk.f32.mxu1 %vm8010_vm1, %v8011_v6 }
 0x26c   : > { %6736 = vmatmul.mubr.msk.f32.gmra.mrb[24].mxu1 %vm1232_vm5, %v2184_v36  ;;  %v2679_v36 = vld [vmem:[#allocation2 + $0xcc] sm:$0xff] }
 0x26d   : > { %6738 = vmatprep.mubr.msk.f32.mxu1 %vm8010_vm1, %v8011_v6 }
 0x270   : > { %6739 = vmatmul.mubr.msk.f32.gmra.mrb[26].mxu1 %vm1232_vm5, %v2185_v47  ;;  %v2680_v47 = vld [vmem:[#allocation2 + $0xd4] sm:$0xff] }
 0x271   : > { %6741 = vmatprep.mubr.msk.f32.mxu1 %vm8010_vm1, %v8011_v6 }
 0x274   : > { %6742 = vmatmul.mubr.msk.f32.gmra.mrb[28].mxu1 %vm1232_vm5, %v2186_v13  ;;  %v2681_v13 = vld [vmem:[#allocation2 + $0xdc] sm:$0xff] }
 0x275   : > { %6744 = vmatprep.mubr.msk.f32.mxu1 %vm8010_vm1, %v8011_v6 }
 0x278   : > { %6745 = vmatmul.mubr.msk.f32.gmra.mrb[30].mxu1 %vm1232_vm5, %v2187_v19  ;;  %v2683_v19 = vld [vmem:[#allocation2 + $0xec] sm:$0xff] }
 0x279   : > { %6747 = vmatprep.mubr.msk.f32.mxu1 %vm8010_vm1, %v8011_v6 }
 0x27c   : > { %6748 = vmatmul.mubr.msk.f32.gmra.mrb[32].mxu1 %vm1232_vm5, %v2188_v22  ;;  %v2684_v22 = vld [vmem:[#allocation2 + $0xf4] sm:$0xff] }
 0x27d   : > { %6750 = vmatprep.mubr.msk.f32.mxu1 %vm8010_vm1, %v8011_v6 }
 0x280   : > { %6751 = vmatmul.mubr.msk.f32.gmra.mrb[34].mxu1 %vm1232_vm5, %v2189_v20  ;;  %v2685_v20 = vld [vmem:[#allocation2 + $0xfc] sm:$0xff] }
 0x281   : > { %6753 = vmatprep.mubr.msk.f32.mxu1 %vm8010_vm1, %v8011_v6 }
 0x284   : > { %6754 = vmatmul.mubr.msk.f32.gmra.mrb[36].mxu1 %vm1232_vm5, %v2190_v48  ;;  %v2686_v48 = vld [vmem:[#allocation2 + $0x104] sm:$0xff] }
 0x285   : > { %6756 = vmatprep.mubr.msk.f32.mxu1 %vm8010_vm1, %v8011_v6 }
 0x288   : > { %6757 = vmatmul.mubr.msk.f32.gmra.mrb[38].mxu1 %vm1232_vm5, %v2191_v62  ;;  %v2687_v62 = vld [vmem:[#allocation2 + $0x10c] sm:$0xff] }
 0x289   : > { %6759 = vmatprep.mubr.msk.f32.mxu1 %vm8010_vm1, %v8011_v6 }
 0x28c   : > { %6760 = vmatmul.mubr.msk.f32.gmra.mrb[40].mxu1 %vm1232_vm5, %v2192_v37  ;;  %v2688_v37 = vld [vmem:[#allocation2 + $0x114] sm:$0xff] }
 0x28d   : > { %6762 = vmatprep.mubr.msk.f32.mxu1 %vm8010_vm1, %v8011_v6 }
 0x290   : > { %6763 = vmatmul.mubr.msk.f32.gmra.mrb[42].mxu1 %vm1232_vm5, %v2193_v28  ;;  %v2689_v28 = vld [vmem:[#allocation2 + $0x11c] sm:$0xff] }
 0x291   : > { %6765 = vmatprep.mubr.msk.f32.mxu1 %vm8010_vm1, %v8011_v6 }
 0x294   : > { %6766 = vmatmul.mubr.msk.f32.gmra.mrb[44].mxu1 %vm1232_vm5, %v2194_v21  ;;  %v2690_v21 = vld [vmem:[#allocation2 + $0x124] sm:$0xff] }
 0x295   : > { %6768 = vmatprep.mubr.msk.f32.mxu1 %vm8010_vm1, %v8011_v6 }
 0x298   : > { %6769 = vmatmul.mubr.msk.f32.gmra.mrb[46].mxu1 %vm1232_vm5, %v2195_v49  ;;  %v2691_v49 = vld [vmem:[#allocation2 + $0x12c] sm:$0xff] }
 0x299   : > { %6771 = vmatprep.mubr.msk.f32.mxu1 %vm8010_vm1, %v8011_v6 }
 0x29c   : > { %6772 = vmatmul.mubr.msk.f32.gmra.mrb[48].mxu1 %vm1232_vm5, %v2196_v24  ;;  %v2692_v24 = vld [vmem:[#allocation2 + $0x134] sm:$0xff] }
 0x29d   : > { %6774 = vmatprep.mubr.msk.f32.mxu1 %vm8010_vm1, %v8011_v6 }
 0x2a0   : > { %6775 = vmatmul.mubr.msk.f32.gmra.mrb[50].mxu1 %vm1232_vm5, %v2197_v10  ;;  %v2693_v10 = vld [vmem:[#allocation2 + $0x13c] sm:$0xff] }
 0x2a1   : > { %6777 = vmatprep.mubr.msk.f32.mxu1 %vm8010_vm1, %v8011_v6 }
 0x2a4   : > { %6778 = vmatmul.mubr.msk.f32.gmra.mrb[52].mxu1 %vm1232_vm5, %v2198_v38 }
 0x2a5   : > { %6780 = vmatprep.mubr.msk.f32.mxu1 %vm8010_vm1, %v8011_v6 }
 0x2a8   : > { %6781 = vmatmul.mubr.msk.f32.gmra.mrb[54].mxu1 %vm1232_vm5, %v2199_v25 }
 0x2a9   : > { %6783 = vmatprep.mubr.msk.f32.mxu1 %vm8010_vm1, %v8011_v6 }
 0x2ac   : > { %6784 = vmatmul.mubr.msk.f32.gmra.mrb[56].mxu1 %vm1232_vm5, %v2200_v50 }
 0x2ad   : > { %6786 = vmatprep.mubr.msk.f32.mxu1 %vm8010_vm1, %v8011_v6 }
 0x2b0   : > { %6787 = vmatmul.mubr.msk.f32.gmra.mrb[58].mxu1 %vm1232_vm5, %v2201_v29  ;;  %v2697_v29 = vld [vmem:[#allocation2 + $0x15c] sm:$0xff] }
 0x2b1   : > { %6789 = vmatprep.mubr.msk.f32.mxu1 %vm8010_vm1, %v8011_v6 }
 0x2b4   : > { %6790 = vmatmul.mubr.msk.f32.gmra.mrb[60].mxu1 %vm1232_vm5, %v2202_v55  ;;  %v2698_v55 = vld [vmem:[#allocation2 + $0x164] sm:$0xf] }
 0x2b5   : > { %6792 = vmatprep.mubr.msk.f32.mxu1 %vm8010_vm1, %v8011_v6 }
 0x2b8   : > { %6793 = vmatmul.mubr.msk.f32.gmra.mrb[62].mxu1 %vm1232_vm5, %v2203_v39  ;;  %v9335_v39 = vld [vmem:[%s10323_s4] ss:$0 sm:$0xff] }
 0x2b9   : > { %6795 = vmatprep.mubr.msk.f32.mxu1 %vm8010_vm1, %v8011_v6 }
 0x2bc   : > { %6796 = vmatmul.mubr.msk.f32.gmra.mrb[64].mxu1 %vm1232_vm5, %v2204_v51 }
 0x2bd   : > { %6798 = vmatprep.mubr.msk.f32.mxu1 %vm8010_vm1, %v8011_v6 }
 0x2c0   : > { %6799 = vmatmul.mubr.msk.f32.gmra.mrb[66].mxu1 %vm1232_vm5, %v2205_v56 }
 0x2c1   : > { %6801 = vmatprep.mubr.msk.f32.mxu1 %vm8010_vm1, %v8011_v6 }
 0x2c4   : > { %6802 = vmatmul.mubr.msk.f32.gmra.mrb[68].mxu1 %vm1232_vm5, %v2206_v57 }
 0x2c5   : > { %6804 = vmatprep.mubr.msk.f32.mxu1 %vm8010_vm1, %v8011_v6 }
 0x2c8   : > { %6805 = vmatmul.mubr.msk.f32.gmra.mrb[70].mxu1 %vm1232_vm5, %v2207_v30 }
 0x2c9   : > { %6807 = vmatprep.mubr.msk.f32.mxu1 %vm8010_vm1, %v8011_v6 }
 0x2cc   : > { %6808 = vmatmul.mubr.msk.f32.gmra.mrb[72].mxu1 %vm1232_vm5, %v2208_v52 }
 0x2cd   : > { %6810 = vmatprep.mubr.msk.f32.mxu1 %vm8010_vm1, %v8011_v6 }
 0x2d0   : > { %v1607_v58 = vpop.permute.xlu0 %1606  ;;  %v1441_v59 = vpop.permute.xlu1 %1440  ;;  %6811 = vmatmul.mubr.msk.f32.gmra.mrb[74].mxu1 %vm1232_vm5, %v2209_v40 }
 0x2d1   : > { %1525 = vst.msk [vmem:[#allocation2 + $0x14a] sm:$0xff] %vm1485_vm7, %v1441_v59  ;;  %6813 = vmatprep.mubr.msk.f32.mxu1 %vm8010_vm1, %v8011_v6 }
 0x2d2   : > { %1691 = vst.msk [vmem:[#allocation2 + $0x149] sm:$0xff] %vm1651_vm8, %v1607_v58  ;;  %v3179_v58 = vld [vmem:[%s10300_s8 + $0x8] sm:$0xff] }
 0x2d3   : > { %3325 = vmatprep.mubr.f32.mxu0 %v3179_v58 }
 0x2d4   : > { %v1609_v53 = vpop.permute.xlu0 %1608  ;;  %v1443_v41 = vpop.permute.xlu1 %1442  ;;  %6814 = vmatmul.mubr.msk.f32.gmra.mrb[76].mxu1 %vm1232_vm5, %v2210_v26 }
 0x2d5   : > { %1527 = vst.msk [vmem:[#allocation2 + $0x152] sm:$0xf] %vm1526_vm10, %v1443_v41  ;;  %6816 = vmatprep.mubr.msk.f32.mxu1 %vm8010_vm1, %v8011_v6 }
 0x2d6   : > { %1693 = vst.msk [vmem:[#allocation2 + $0x151] sm:$0xf] %vm1692_vm11, %v1609_v53 }
 0x2d8   : > { %6817 = vmatmul.mubr.msk.f32.gmra.mrb[78].mxu1 %vm1232_vm5, %v2211_v31 }
 0x2d9   : > { %6819 = vmatprep.mubr.msk.f32.mxu1 %vm8010_vm1, %v8011_v6  ;;  %v2217_v32 = vld [vmem:[#allocation2 + $0x142] sm:$0xff] }
 0x2da   : > { %v2694_v38 = vld [vmem:[#allocation2 + $0x144] sm:$0xff] }
 0x2dc   : > { %6820 = vmatmul.mubr.msk.f32.gmra.mrb[80].mxu1 %vm1232_vm5, %v2212_v63 }
 0x2dd   : > { %6822 = vmatprep.mubr.msk.f32.mxu1 %vm8010_vm1, %v8011_v6  ;;  %v2218_v5 = vld [vmem:[#allocation2 + $0x14a] sm:$0xff]  ;;  %v2219_v43 = vld [vmem:[#allocation2 + $0x152] sm:$0xf] }
 0x2de   : > { %v2695_v25 = vld [vmem:[#allocation2 + $0x14c] sm:$0xff]  ;;  %v2696_v50 = vld [vmem:[#allocation2 + $0x154] sm:$0xff] }
 0x2e0   : > { %6823 = vmatmul.mubr.msk.f32.gmra.mrb[82].mxu1 %vm1232_vm5, %v2213_v2 }
 0x2e1   : > { %6825 = vmatprep.mubr.msk.f32.mxu1 %vm8010_vm1, %v8011_v6 }
 0x2e4   : > { %6826 = vmatmul.mubr.msk.f32.gmra.mrb[84].mxu1 %vm1232_vm5, %v2214_v54 }
 0x2e5   : > { %6828 = vmatprep.mubr.msk.f32.mxu1 %vm8010_vm1, %v8011_v6 }
 0x2e8   : > { %6829 = vmatmul.mubr.msk.f32.gmra.mrb[86].mxu1 %vm1232_vm5, %v2215_v42 }
 0x2e9   : > { %6831 = vmatprep.mubr.msk.f32.mxu1 %vm8010_vm1, %v8011_v6 }
 0x2ec   : > { %6832 = vmatmul.mubr.msk.f32.gmra.mrb[88].mxu1 %vm1232_vm5, %v2216_v4 }
 0x2ed   : > { %6834 = vmatprep.mubr.msk.f32.mxu1 %vm8010_vm1, %v8011_v6 }
 0x2f0   : > { %6835 = vmatmul.mubr.msk.f32.gmra.mrb[90].mxu1 %vm1232_vm5, %v2217_v32 }
 0x2f1   : > { %6837 = vmatprep.mubr.msk.f32.mxu1 %vm8010_vm1, %v8011_v6 }
 0x2f4   : > { %6838 = vmatmul.mubr.msk.f32.gmra.mrb[92].mxu1 %vm1232_vm5, %v2218_v5 }
 0x2f5   : > { %6840 = vmatprep.mubr.msk.f32.mxu1 %vm8010_vm1, %v8011_v6 }
 0x2f8   : > { %6841 = vmatmul.mubr.msk.f32.gmra.mrb[94].mxu1 %vm1232_vm5, %v2219_v43 }
 0x2f9   : > { %6849 = vmatprep.mubr.msk.f32.mxu1 %vm8010_vm1, %v8011_v6 }
 0x2fc   : > { %6850 = vmatmul.mubr.msk.f32.vlgmr.msra.gmra.mrb[14].mxu1 %vm1232_vm5, %v2658_v60 }
 0x2fd   : > { %6852 = vmatprep.mubr.msk.f32.mxu1 %vm8010_vm1, %v8011_v6 }
 0x300   : > { %6853 = vmatmul.mubr.msk.f32.gmra.mrb[16].mxu1 %vm1232_vm5, %v2659_v7 }
 0x301   : > { %6855 = vmatprep.mubr.msk.f32.mxu1 %vm8010_vm1, %v8011_v6 }
 0x304   : > { %6856 = vmatmul.mubr.msk.f32.gmra.mrb[18].mxu1 %vm1232_vm5, %v2660_v8 }
 0x305   : > { %6858 = vmatprep.mubr.msk.f32.mxu1 %vm8010_vm1, %v8011_v6 }
 0x308   : > { %6859 = vmatmul.mubr.msk.f32.gmra.mrb[20].mxu1 %vm1232_vm5, %v2661_v33 }
 0x309   : > { %6861 = vmatprep.mubr.msk.f32.mxu1 %vm8010_vm1, %v8011_v6 }
 0x30c   : > { %6862 = vmatmul.mubr.msk.f32.gmra.mrb[22].mxu1 %vm1232_vm5, %v2662_v44 }
 0x30d   : > { %6864 = vmatprep.mubr.msk.f32.mxu1 %vm8010_vm1, %v8011_v6 }
 0x310   : > { %6865 = vmatmul.mubr.msk.f32.gmra.mrb[24].mxu1 %vm1232_vm5, %v2663_v61 }
 0x311   : > { %6867 = vmatprep.mubr.msk.f32.mxu1 %vm8010_vm1, %v8011_v6 }
 0x314   : > { %6868 = vmatmul.mubr.msk.f32.gmra.mrb[26].mxu1 %vm1232_vm5, %v2664_v9 }
 0x315   : > { %6870 = vmatprep.mubr.msk.f32.mxu1 %vm8010_vm1, %v8011_v6 }
 0x318   : > { %6871 = vmatmul.mubr.msk.f32.gmra.mrb[28].mxu1 %vm1232_vm5, %v2665_v11 }
 0x319   : > { %6873 = vmatprep.mubr.msk.f32.mxu1 %vm8010_vm1, %v8011_v6 }
 0x31c   : > { %6874 = vmatmul.mubr.msk.f32.gmra.mrb[30].mxu1 %vm1232_vm5, %v2666_v34 }
 0x31d   : > { %6876 = vmatprep.mubr.msk.f32.mxu1 %vm8010_vm1, %v8011_v6 }
 0x320   : > { %6877 = vmatmul.mubr.msk.f32.gmra.mrb[32].mxu1 %vm1232_vm5, %v2667_v45 }
 0x321   : > { %6879 = vmatprep.mubr.msk.f32.mxu1 %vm8010_vm1, %v8011_v6 }
 0x324   : > { %6880 = vmatmul.mubr.msk.f32.gmra.mrb[34].mxu1 %vm1232_vm5, %v2668_v12 }
 0x325   : > { %6882 = vmatprep.mubr.msk.f32.mxu1 %vm8010_vm1, %v8011_v6 }
 0x328   : > { %6883 = vmatmul.mubr.msk.f32.gmra.mrb[36].mxu1 %vm1232_vm5, %v2669_v14 }
 0x329   : > { %6885 = vmatprep.mubr.msk.f32.mxu1 %vm8010_vm1, %v8011_v6 }
 0x32c   : > { %6886 = vmatmul.mubr.msk.f32.gmra.mrb[38].mxu1 %vm1232_vm5, %v2670_v15 }
 0x32d   : > { %6888 = vmatprep.mubr.msk.f32.mxu1 %vm8010_vm1, %v8011_v6 }
 0x330   : > { %6889 = vmatmul.mubr.msk.f32.gmra.mrb[40].mxu1 %vm1232_vm5, %v2671_v35 }
 0x331   : > { %6891 = vmatprep.mubr.msk.f32.mxu1 %vm8010_vm1, %v8011_v6 }
 0x334   : > { %6892 = vmatmul.mubr.msk.f32.gmra.mrb[42].mxu1 %vm1232_vm5, %v2672_v16 }
 0x335   : > { %6894 = vmatprep.mubr.msk.f32.mxu1 %vm8010_vm1, %v8011_v6 }
 0x338   : > { %6895 = vmatmul.mubr.msk.f32.gmra.mrb[44].mxu1 %vm1232_vm5, %v2673_v27 }
 0x339   : > { %6897 = vmatprep.mubr.msk.f32.mxu1 %vm8010_vm1, %v8011_v6 }
 0x33c   : > { %6898 = vmatmul.mubr.msk.f32.gmra.mrb[46].mxu1 %vm1232_vm5, %v2674_v17 }
 0x33d   : > { %6900 = vmatprep.mubr.msk.f32.mxu1 %vm8010_vm1, %v8011_v6 }
 0x340   : > { %6901 = vmatmul.mubr.msk.f32.gmra.mrb[48].mxu1 %vm1232_vm5, %v2675_v0 }
 0x341   : > { %6903 = vmatprep.mubr.msk.f32.mxu1 %vm8010_vm1, %v8011_v6 }
 0x344   : > { %6904 = vmatmul.mubr.msk.f32.gmra.mrb[50].mxu1 %vm1232_vm5, %v2676_v1 }
 0x345   : > { %6906 = vmatprep.mubr.msk.f32.mxu1 %vm8010_vm1, %v8011_v6 }
 0x348   : > { %6907 = vmatmul.mubr.msk.f32.gmra.mrb[52].mxu1 %vm1232_vm5, %v2677_v46 }
 0x349   : > { %6909 = vmatprep.mubr.msk.f32.mxu1 %vm8010_vm1, %v8011_v6 }
 0x34c   : > { %6910 = vmatmul.mubr.msk.f32.gmra.mrb[54].mxu1 %vm1232_vm5, %v2678_v23 }
 0x34d   : > { %6912 = vmatprep.mubr.msk.f32.mxu1 %vm8010_vm1, %v8011_v6 }
 0x350   : > { %6913 = vmatmul.mubr.msk.f32.gmra.mrb[56].mxu1 %vm1232_vm5, %v2679_v36 }
 0x351   : > { %6915 = vmatprep.mubr.msk.f32.mxu1 %vm8010_vm1, %v8011_v6 }
 0x354   : > { %6916 = vmatmul.mubr.msk.f32.gmra.mrb[58].mxu1 %vm1232_vm5, %v2680_v47 }
 0x355   : > { %6918 = vmatprep.mubr.msk.f32.mxu1 %vm8010_vm1, %v8011_v6 }
 0x358   : > { %6919 = vmatmul.mubr.msk.f32.gmra.mrb[60].mxu1 %vm1232_vm5, %v2681_v13 }
 0x359   : > { %6921 = vmatprep.mubr.msk.f32.mxu1 %vm8010_vm1, %v8011_v6 }
 0x35c   : > { %6922 = vmatmul.mubr.msk.f32.gmra.mrb[62].mxu1 %vm1232_vm5, %v2682_v18 }
 0x35d   : > { %6924 = vmatprep.mubr.msk.f32.mxu1 %vm8010_vm1, %v8011_v6 }
 0x360   : > { %6925 = vmatmul.mubr.msk.f32.gmra.mrb[64].mxu1 %vm1232_vm5, %v2683_v19 }
 0x361   : > { %6927 = vmatprep.mubr.msk.f32.mxu1 %vm8010_vm1, %v8011_v6 }
 0x364   : > { %6928 = vmatmul.mubr.msk.f32.gmra.mrb[66].mxu1 %vm1232_vm5, %v2684_v22 }
 0x365   : > { %6930 = vmatprep.mubr.msk.f32.mxu1 %vm8010_vm1, %v8011_v6 }
 0x368   : > { %6931 = vmatmul.mubr.msk.f32.gmra.mrb[68].mxu1 %vm1232_vm5, %v2685_v20 }
 0x369   : > { %6933 = vmatprep.mubr.msk.f32.mxu1 %vm8010_vm1, %v8011_v6 }
 0x36c   : > { %6934 = vmatmul.mubr.msk.f32.gmra.mrb[70].mxu1 %vm1232_vm5, %v2686_v48 }
 0x36d   : > { %6936 = vmatprep.mubr.msk.f32.mxu1 %vm8010_vm1, %v8011_v6 }
 0x370   : > { %6937 = vmatmul.mubr.msk.f32.gmra.mrb[72].mxu1 %vm1232_vm5, %v2687_v62 }
 0x371   : > { %6939 = vmatprep.mubr.msk.f32.mxu1 %vm8010_vm1, %v8011_v6 }
 0x374   : > { %6940 = vmatmul.mubr.msk.f32.gmra.mrb[74].mxu1 %vm1232_vm5, %v2688_v37 }
 0x375   : > { %6942 = vmatprep.mubr.msk.f32.mxu1 %vm8010_vm1, %v8011_v6 }
 0x378   : > { %6943 = vmatmul.mubr.msk.f32.gmra.mrb[76].mxu1 %vm1232_vm5, %v2689_v28 }
 0x379   : > { %6945 = vmatprep.mubr.msk.f32.mxu1 %vm8010_vm1, %v8011_v6 }
 0x37c   : > { %6946 = vmatmul.mubr.msk.f32.gmra.mrb[78].mxu1 %vm1232_vm5, %v2690_v21 }
 0x37d   : > { %6948 = vmatprep.mubr.msk.f32.mxu1 %vm8010_vm1, %v8011_v6 }
 0x380   : > { %6949 = vmatmul.mubr.msk.f32.gmra.mrb[80].mxu1 %vm1232_vm5, %v2691_v49 }
 0x381   : > { %6951 = vmatprep.mubr.msk.f32.mxu1 %vm8010_vm1, %v8011_v6 }
 0x384   : > { %6952 = vmatmul.mubr.msk.f32.gmra.mrb[82].mxu1 %vm1232_vm5, %v2692_v24 }
 0x385   : > { %6954 = vmatprep.mubr.msk.f32.mxu1 %vm8010_vm1, %v8011_v6 }
 0x388   : > { %6955 = vmatmul.mubr.msk.f32.gmra.mrb[84].mxu1 %vm1232_vm5, %v2693_v10 }
 0x389   : > { %6957 = vmatprep.mubr.msk.f32.mxu1 %vm8010_vm1, %v8011_v6 }
 0x38c   : > { %6958 = vmatmul.mubr.msk.f32.gmra.mrb[86].mxu1 %vm1232_vm5, %v2694_v38 }
 0x38d   : > { %6960 = vmatprep.mubr.msk.f32.mxu1 %vm8010_vm1, %v8011_v6 }
 0x390   : > { %6961 = vmatmul.mubr.msk.f32.gmra.mrb[88].mxu1 %vm1232_vm5, %v2695_v25 }
 0x391   : > { %6963 = vmatprep.mubr.msk.f32.mxu1 %vm8010_vm1, %v8011_v6 }
 0x394   : > { %6964 = vmatmul.mubr.msk.f32.gmra.mrb[90].mxu1 %vm1232_vm5, %v2696_v50 }
 0x395   : > { %6966 = vmatprep.mubr.msk.f32.mxu1 %vm8010_vm1, %v8011_v6 }
 0x398   : > { %6967 = vmatmul.mubr.msk.f32.gmra.mrb[92].mxu1 %vm1232_vm5, %v2697_v29 }
 0x399   : > { %6969 = vmatprep.mubr.msk.f32.mxu1 %vm8010_vm1, %v8011_v6 }
 0x39c   : > { %6970 = vmatmul.mubr.msk.f32.gmra.mrb[94].mxu1 %vm1232_vm5, %v2698_v55  ;;  %vm3671_vm5 = vcmask 388352  }
 0x3cf   : > { %v2892_v51 = vpop.f32.mrb[14].mxu1 }
 0x3d0   : > { %v6851_v56 = vpop.f32.mrb[15].mxu1  ;;  %v7545_v57 = vadd.f32 %v9335_v39, %v2892_v51 }
 0x3d2   : > { %v3137_v59 = vmax.f32 %v7545_v57, 0.0 }
 0x3d3   : > { %v2897_v30 = vpop.f32.mrb[16].mxu1 }
 0x3d4   : > { %v7546_v52 = vadd.f32 %v9335_v39, %v2897_v30  ;;  %v6854_v40 = vpop.f32.mrb[17].mxu1 }
 0x3d6   : > { %v3138_v26 = vmax.f32 %v7546_v52, 0.0 }
 0x3d7   : > { %v2902_v53 = vpop.f32.mrb[18].mxu1 }
 0x3d8   : > { %v9342_v41 = vpack.c.bf16 %v3138_v26, %v3137_v59  ;;  %v6857_v31 = vpop.f32.mrb[19].mxu1  ;;  %v7547_v63 = vadd.f32 %v9335_v39, %v2902_v53 }
 0x3da   : > { %v3139_v4 = vmax.f32 %v7547_v63, 0.0 }
 0x3db   : > { %v2907_v2 = vpop.f32.mrb[20].mxu1 }
 0x3dc   : > { %v7548_v54 = vadd.f32 %v9335_v39, %v2907_v2  ;;  %v6860_v42 = vpop.f32.mrb[21].mxu1 }
 0x3de   : > { %v3140_v32 = vmax.f32 %v7548_v54, 0.0 }
 0x3df   : > { %v2912_v5 = vpop.f32.mrb[22].mxu1 }
 0x3e0   : > { %v9346_v43 = vpack.c.bf16 %v3140_v32, %v3139_v4  ;;  %v6863_v60 = vpop.f32.mrb[23].mxu1  ;;  %v7549_v7 = vadd.f32 %v9335_v39, %v2912_v5 }
 0x3e2   : > { %v3141_v61 = vmax.f32 %v7549_v7, 0.0 }
 0x3e3   : > { %v2917_v8 = vpop.f32.mrb[24].mxu1 }
 0x3e4   : > { %v7550_v33 = vadd.f32 %v9335_v39, %v2917_v8  ;;  %v6866_v44 = vpop.f32.mrb[25].mxu1 }
 0x3e6   : > { %v3142_v9 = vmax.f32 %v7550_v33, 0.0 }
 0x3e7   : > { %v2922_v11 = vpop.f32.mrb[26].mxu1 }
 0x3e8   : > { %v9350_v34 = vpack.c.bf16 %v3142_v9, %v3141_v61  ;;  %v6869_v45 = vpop.f32.mrb[27].mxu1  ;;  %v7551_v12 = vadd.f32 %v9335_v39, %v2922_v11 }
 0x3ea   : > { %v3143_v16 = vmax.f32 %v7551_v12, 0.0 }
 0x3eb   : > { %v2927_v14 = vpop.f32.mrb[28].mxu1 }
 0x3ec   : > { %v7552_v15 = vadd.f32 %v9335_v39, %v2927_v14  ;;  %v6872_v35 = vpop.f32.mrb[29].mxu1 }
 0x3ee   : > { %v3144_v27 = vmax.f32 %v7552_v15, 0.0 }
 0x3ef   : > { %v2932_v17 = vpop.f32.mrb[30].mxu1 }
 0x3f0   : > { %v9354_v0 = vpack.c.bf16 %v3144_v27, %v3143_v16  ;;  %v6875_v1 = vpop.f32.mrb[31].mxu1  ;;  %v7553_v46 = vadd.f32 %v9335_v39, %v2932_v17 }
 0x3f2   : > { %v3145_v13 = vmax.f32 %v7553_v46, 0.0 }
 0x3f3   : > { %v2937_v23 = vpop.f32.mrb[32].mxu1 }
 0x3f4   : > { %v7554_v36 = vadd.f32 %v9335_v39, %v2937_v23  ;;  %v6878_v47 = vpop.f32.mrb[33].mxu1 }
 0x3f6   : > { %v3146_v18 = vmax.f32 %v7554_v36, 0.0 }
 0x3f7   : > { %v2942_v19 = vpop.f32.mrb[34].mxu1 }
 0x3f8   : > { %v9358_v22 = vpack.c.bf16 %v3146_v18, %v3145_v13  ;;  %v6881_v20 = vpop.f32.mrb[35].mxu1  ;;  %v7555_v48 = vadd.f32 %v9335_v39, %v2942_v19 }
 0x3fa   : > { %v3147_v21 = vmax.f32 %v7555_v48, 0.0 }
 0x3fb   : > { %v2947_v62 = vpop.f32.mrb[36].mxu1 }
 0x3fc   : > { %v7556_v37 = vadd.f32 %v9335_v39, %v2947_v62  ;;  %v6884_v28 = vpop.f32.mrb[37].mxu1 }
 0x3fe   : > { %v3148_v49 = vmax.f32 %v7556_v37, 0.0 }
 0x3ff   : > { %v2952_v24 = vpop.f32.mrb[38].mxu1 }
 0x400   : > { %v9362_v10 = vpack.c.bf16 %v3148_v49, %v3147_v21  ;;  %v6887_v38 = vpop.f32.mrb[39].mxu1  ;;  %v7557_v25 = vadd.f32 %v9335_v39, %v2952_v24 }
 0x402   : > { %v3149_v51 = vmax.f32 %v7557_v25, 0.0 }
 0x403   : > { %v2957_v50 = vpop.f32.mrb[40].mxu1 }
 0x404   : > { %v7558_v29 = vadd.f32 %v9335_v39, %v2957_v50  ;;  %v6890_v55 = vpop.f32.mrb[41].mxu1 }
 0x406   : > { %v3150_v56 = vmax.f32 %v7558_v29, 0.0 }
 0x407   : > { %v2962_v57 = vpop.f32.mrb[42].mxu1 }
 0x408   : > { %v9366_v30 = vpack.c.bf16 %v3150_v56, %v3149_v51  ;;  %v6893_v52 = vpop.f32.mrb[43].mxu1  ;;  %v7559_v40 = vadd.f32 %v9335_v39, %v2962_v57 }
 0x40a   : > { %v3151_v53 = vmax.f32 %v7559_v40, 0.0 }
 0x40b   : > { %v2967_v58 = vpop.f32.mrb[44].mxu1 }
 0x40c   : > { %v7560_v59 = vadd.f32 %v9335_v39, %v2967_v58  ;;  %v6896_v26 = vpop.f32.mrb[45].mxu1 }
 0x40e   : > { %v3152_v31 = vmax.f32 %v7560_v59, 0.0 }
 0x40f   : > { %v2972_v63 = vpop.f32.mrb[46].mxu1 }
 0x410   : > { %v9370_v2 = vpack.c.bf16 %v3152_v31, %v3151_v53  ;;  %v6899_v54 = vpop.f32.mrb[47].mxu1  ;;  %v7561_v42 = vadd.f32 %v9335_v39, %v2972_v63 }
 0x412   : > { %v3153_v60 = vmax.f32 %v7561_v42, 0.0 }
 0x413   : > { %v2977_v4 = vpop.f32.mrb[48].mxu1 }
 0x414   : > { %v7562_v32 = vadd.f32 %v9335_v39, %v2977_v4  ;;  %v6902_v5 = vpop.f32.mrb[49].mxu1 }
 0x416   : > { %v3154_v7 = vmax.f32 %v7562_v32, 0.0 }
 0x417   : > { %v2982_v8 = vpop.f32.mrb[50].mxu1 }
 0x418   : > { %v7374_v33 = vpack.c.bf16 %v3154_v7, %v3153_v60  ;;  %v6905_v44 = vpop.f32.mrb[51].mxu1  ;;  %v7563_v61 = vadd.f32 %v9335_v39, %v2982_v8 }
 0x41a   : > { %7375 = vmatprep.subr.bf16.mxu0 %v7374_v33  ;;  %v3155_v12 = vmax.f32 %v7563_v61, 0.0 }
 0x41b   : > { %v2987_v9 = vpop.f32.mrb[52].mxu1  ;;  %7377 = vmatpush3.bf16.msra.mxu0 %v9342_v41 }
 0x41c   : > { %v7564_v11 = vadd.f32 %v9335_v39, %v2987_v9  ;;  %v6908_v45 = vpop.f32.mrb[53].mxu1 }
 0x41e   : > { %v3156_v14 = vmax.f32 %v7564_v11, 0.0 }
 0x41f   : > { %v2992_v15 = vpop.f32.mrb[54].mxu1 }
 0x420   : > { %v7378_v35 = vpack.c.bf16 %v3156_v14, %v3155_v12  ;;  %v6911_v16 = vpop.f32.mrb[55].mxu1  ;;  %v7565_v27 = vadd.f32 %v9335_v39, %v2992_v15  ;;  %v3178_v15 = vld [vmem:[%s10300_s8] sm:$0xff] }
 0x421   : > { %v3182_v16 = vld [vmem:[%s10300_s8 + $0x20] sm:$0xff] }
 0x422   : > { %7379 = vmatprep.subr.bf16.mxu0 %v7378_v35  ;;  %v3157_v23 = vmax.f32 %v7565_v27, 0.0 }
 0x423   : > { %v2997_v17 = vpop.f32.mrb[56].mxu1  ;;  %7381 = vmatpush3.bf16.msra.mxu0 %v9346_v43 }
 0x424   : > { %v7566_v1 = vadd.f32 %v9335_v39, %v2997_v17  ;;  %v6914_v46 = vpop.f32.mrb[57].mxu1 }
 0x426   : > { %v3158_v36 = vmax.f32 %v7566_v1, 0.0 }
 0x427   : > { %v3002_v41 = vpop.f32.mrb[58].mxu1 }
 0x428   : > { %v7382_v47 = vpack.c.bf16 %v3158_v36, %v3157_v23  ;;  %v6917_v13 = vpop.f32.mrb[59].mxu1  ;;  %v7567_v18 = vadd.f32 %v9335_v39, %v3002_v41  ;;  %v3185_v36 = vld [vmem:[%s10300_s8 + $0x38] sm:$0xff] }
 0x429   : > { %v3184_v13 = vld [vmem:[%s10300_s8 + $0x30] sm:$0xff] }
 0x42a   : > { %7383 = vmatprep.subr.bf16.mxu0 %v7382_v47  ;;  %v3159_v62 = vmax.f32 %v7567_v18, 0.0 }
 0x42b   : > { %v3007_v19 = vpop.f32.mrb[60].mxu1  ;;  %7385 = vmatpush3.bf16.msra.mxu0 %v9350_v34 }
 0x42c   : > { %v7568_v20 = vadd.f32 %v9335_v39, %v3007_v19  ;;  %v6920_v48 = vpop.f32.mrb[61].mxu1 }
 0x42e   : > { %v3160_v37 = vmax.f32 %v7568_v20, 0.0  ;;  %v3188_v20 = vld [vmem:[%s10300_s8 + $0x50] sm:$0xff] }
 0x42f   : > { %v3012_v43 = vpop.f32.mrb[62].mxu1 }
 0x430   : > { %v7386_v28 = vpack.c.bf16 %v3160_v37, %v3159_v62  ;;  %v6923_v21 = vpop.f32.mrb[63].mxu1  ;;  %v7569_v49 = vadd.f32 %v9335_v39, %v3012_v43  ;;  %v3187_v43 = vld [vmem:[%s10300_s8 + $0x48] sm:$0xff] }
 0x432   : > { %7387 = vmatprep.subr.bf16.mxu0 %v7386_v28  ;;  %v3161_v50 = vmax.f32 %v7569_v49, 0.0  ;;  %v3191_v49 = vld [vmem:[%s10300_s8 + $0x68] sm:$0xff] }
 0x433   : > { %v3017_v24 = vpop.f32.mrb[64].mxu1  ;;  %7389 = vmatpush3.bf16.msra.mxu0 %v9354_v0 }
 0x434   : > { %v7570_v38 = vadd.f32 %v9335_v39, %v3017_v24  ;;  %v6926_v25 = vpop.f32.mrb[65].mxu1 }
 0x435   : > { %v3190_v25 = vld [vmem:[%s10300_s8 + $0x60] sm:$0xff] }
 0x436   : > { %v3162_v29 = vmax.f32 %v7570_v38, 0.0 }
 0x437   : > { %v3022_v34 = vpop.f32.mrb[66].mxu1 }
 0x438   : > { %v7390_v55 = vpack.c.bf16 %v3162_v29, %v3161_v50  ;;  %v6929_v51 = vpop.f32.mrb[67].mxu1  ;;  %v7571_v56 = vadd.f32 %v9335_v39, %v3022_v34  ;;  %v3194_v34 = vld [vmem:[%s10300_s8 + $0x80] sm:$0xff] }
 0x43a   : > { %7391 = vmatprep.subr.bf16.mxu0 %v7390_v55  ;;  %v3163_v58 = vmax.f32 %v7571_v56, 0.0 }
 0x43b   : > { %v3027_v57 = vpop.f32.mrb[68].mxu1  ;;  %7393 = vmatpush3.bf16.msra.mxu0 %v9358_v22 }
 0x43c   : > { %v7572_v52 = vadd.f32 %v9335_v39, %v3027_v57  ;;  %v6932_v40 = vpop.f32.mrb[69].mxu1  ;;  %v3193_v57 = vld [vmem:[%s10300_s8 + $0x78] sm:$0xff] }
 0x43e   : > { %v3164_v59 = vmax.f32 %v7572_v52, 0.0 }
 0x43f   : > { %v3032_v0 = vpop.f32.mrb[70].mxu1 }
 0x440   : > { %v7394_v26 = vpack.c.bf16 %v3164_v59, %v3163_v58  ;;  %v6935_v53 = vpop.f32.mrb[71].mxu1  ;;  %v7573_v31 = vadd.f32 %v9335_v39, %v3032_v0  ;;  %v3197_v58 = vld [vmem:[%s10300_s8 + $0x98] sm:$0xff] }
 0x442   : > { %7395 = vmatprep.subr.bf16.mxu0 %v7394_v26  ;;  %v3165_v4 = vmax.f32 %v7573_v31, 0.0  ;;  %v3196_v26 = vld [vmem:[%s10300_s8 + $0x90] sm:$0xff] }
 0x443   : > { %v3037_v63 = vpop.f32.mrb[72].mxu1  ;;  %7397 = vmatpush3.bf16.msra.mxu0 %v9362_v10 }
 0x444   : > { %v7574_v54 = vadd.f32 %v9335_v39, %v3037_v63  ;;  %v6938_v42 = vpop.f32.mrb[73].mxu1  ;;  %v3200_v63 = vld [vmem:[%s10300_s8 + $0xb0] sm:$0xff] }
 0x446   : > { %v3166_v32 = vmax.f32 %v7574_v54, 0.0 }
 0x447   : > { %v3042_v22 = vpop.f32.mrb[74].mxu1 }
 0x448   : > { %v7398_v5 = vpack.c.bf16 %v3166_v32, %v3165_v4  ;;  %v6941_v60 = vpop.f32.mrb[75].mxu1  ;;  %v7575_v7 = vadd.f32 %v9335_v39, %v3042_v22  ;;  %v3199_v32 = vld [vmem:[%s10300_s8 + $0xa8] sm:$0xff] }
 0x449   : > { %v3203_v60 = vld [vmem:[%s10300_s8 + $0xc8] sm:$0xff] }
 0x44a   : > { %7399 = vmatprep.subr.bf16.mxu0 %v7398_v5  ;;  %v3167_v61 = vmax.f32 %v7575_v7, 0.0 }
 0x44b   : > { %v3047_v8 = vpop.f32.mrb[76].mxu1  ;;  %7401 = vmatpush3.bf16.msra.mxu0 %v9366_v30 }
 0x44c   : > { %v7576_v33 = vadd.f32 %v9335_v39, %v3047_v8  ;;  %v6944_v44 = vpop.f32.mrb[77].mxu1  ;;  %v3202_v8 = vld [vmem:[%s10300_s8 + $0xc0] sm:$0xff] }
 0x44e   : > { %v3168_v9 = vmax.f32 %v7576_v33, 0.0  ;;  %v3206_v33 = vld [vmem:[%s10300_s8 + $0xe0] sm:$0xff] }
 0x44f   : > { %v3052_v10 = vpop.f32.mrb[78].mxu1 }
 0x450   : > { %v7402_v11 = vpack.c.bf16 %v3168_v9, %v3167_v61  ;;  %v6947_v45 = vpop.f32.mrb[79].mxu1  ;;  %v7577_v12 = vadd.f32 %v9335_v39, %v3052_v10  ;;  %v3209_v61 = vld [vmem:[%s10300_s8 + $0xf8] sm:$0xff]  ;;  %v3208_v9 = vld [vmem:[%s10300_s8 + $0xf0] sm:$0xff] }
 0x451   : > { %v3212_v10 = vld [vmem:[%s10300_s8 + $0x110] sm:$0xff]  ;;  %v3215_v45 = vld [vmem:[%s10300_s8 + $0x128] sm:$0xf] }
 0x452   : > { %7403 = vmatprep.subr.bf16.mxu0 %v7402_v11  ;;  %v3169_v27 = vmax.f32 %v7577_v12, 0.0  ;;  %v3211_v11 = vld [vmem:[%s10300_s8 + $0x108] sm:$0xff]  ;;  %v3214_v12 = vld [vmem:[%s10300_s8 + $0x120] sm:$0xf] }
 0x453   : > { %v3057_v14 = vpop.f32.mrb[80].mxu1  ;;  %7405 = vmatpush3.bf16.msra.mxu0 %v9370_v2  ;;  %v3181_v2 = vld [vmem:[%s10300_s8 + $0x18] sm:$0xff] }
 0x454   : > { %v7578_v30 = vadd.f32 %v9335_v39, %v3057_v14  ;;  %v6950_v35 = vpop.f32.mrb[81].mxu1  ;;  %7406 = vmatprep.subr.bf16.mxu0 %v8009_v3  ;;  %v3180_v14 = vld [vmem:[%s10300_s8 + $0x10] sm:$0xff] }
 0x455   : > { %v3189_v35 = vld [vmem:[%s10300_s8 + $0x58] sm:$0xff] }
 0x456   : > { %v3170_v17 = vmax.f32 %v7578_v30, 0.0  ;;  %3326 = vmatmul.mubr.f32.vlgmr.msra.gmra.mrb[68].mxu0 %v3178_v15  ;;  %v3183_v15 = vld [vmem:[%s10300_s8 + $0x28] sm:$0xff]  ;;  %v3186_v30 = vld [vmem:[%s10300_s8 + $0x40] sm:$0xff] }
 0x457   : > { %v3062_v1 = vpop.f32.mrb[82].mxu1  ;;  %3330 = vmatprep.mubr.f32.mxu0 %v3182_v16  ;;  %v3192_v16 = vld [vmem:[%s10300_s8 + $0x70] sm:$0xff] }
 0x458   : > { %v7407_v46 = vpack.c.bf16 %v3170_v17, %v3169_v27  ;;  %v6953_v23 = vpop.f32.mrb[83].mxu1  ;;  %v7579_v41 = vadd.f32 %v9335_v39, %v3062_v1  ;;  %v3195_v27 = vld [vmem:[%s10300_s8 + $0x88] sm:$0xff]  ;;  %v3198_v17 = vld [vmem:[%s10300_s8 + $0xa0] sm:$0xff]  ;;  %v3201_v1 = vld [vmem:[%s10300_s8 + $0xb8] sm:$0xff] }
 0x459   : > { %v3210_v23 = vld [vmem:[%s10300_s8 + $0x100] sm:$0xff] }
 0x45a   : > { %3331 = vmatmul.mubr.f32.gmra.mrb[70].mxu0 %v3181_v2  ;;  %v3171_v48 = vmax.f32 %v7579_v41, 0.0  ;;  %v3204_v2 = vld [vmem:[%s10300_s8 + $0xd0] sm:$0xff] }
 0x45b   : > { %7408 = vmatpush3.bf16.msra.mxu0 %v7407_v46  ;;  %v3067_v47 = vpop.f32.mrb[84].mxu1  ;;  %3335 = vmatprep.mubr.f32.mxu0 %v3185_v36  ;;  %v3207_v46 = vld [vmem:[%s10300_s8 + $0xe8] sm:$0xff]  ;;  %v3213_v36 = vld [vmem:[%s10300_s8 + $0x118] sm:$0xff]  ;;  %v3216_v41 = vld [vmem:[%s10300_s8 + $0x130] sm:$0xf] }
 0x45c   : > { %v7580_v18 = vadd.f32 %v9335_v39, %v3067_v47  ;;  %v6956_v19 = vpop.f32.mrb[85].mxu1  ;;  %7409 = vmatprep.subr.bf16.mxu0 %v8009_v3  ;;  %v3687_v47 = vld [vmem:[%s10297_s5] sm:$0xff] }
 0x45e   : > { %v3172_v62 = vmax.f32 %v7580_v18, 0.0  ;;  %3336 = vmatmul.mubr.f32.gmra.mrb[72].mxu0 %v3184_v13  ;;  %v3688_v13 = vld [vmem:[%s10297_s5 + $0x8] sm:$0xff]  ;;  %v3689_v18 = vld [vmem:[%s10297_s5 + $0x10] sm:$0xff] }
 0x45f   : > { %v3072_v37 = vpop.f32.mrb[86].mxu1  ;;  %3340 = vmatprep.mubr.f32.mxu0 %v3188_v20  ;;  %v7419_v19 = vpack.c.bf16 %v3688_v13, %v3687_v47  ;;  %v3690_v20 = vld [vmem:[%s10297_s5 + $0x18] sm:$0xff] }
 0x460   : > { %v7410_v28 = vpack.c.bf16 %v3172_v62, %v3171_v48  ;;  %v6959_v21 = vpop.f32.mrb[87].mxu1  ;;  %v7581_v24 = vadd.f32 %v9335_v39, %v3072_v37  ;;  %v7422_v48 = vpack.c.bf16 %v3690_v20, %v3689_v18 }
 0x462   : > { %3341 = vmatmul.mubr.f32.gmra.mrb[74].mxu0 %v3187_v43  ;;  %v3173_v55 = vmax.f32 %v7581_v24, 0.0 }
 0x463   : > { %7411 = vmatpush3.bf16.msra.mxu0 %v7410_v28  ;;  %v3077_v38 = vpop.f32.mrb[88].mxu1  ;;  %3345 = vmatprep.mubr.f32.mxu0 %v3191_v49 }
 0x464   : > { %v7582_v50 = vadd.f32 %v9335_v39, %v3077_v38  ;;  %v6962_v29 = vpop.f32.mrb[89].mxu1  ;;  %7412 = vmatprep.subr.bf16.mxu0 %v8009_v3 }
 0x466   : > { %v3174_v51 = vmax.f32 %v7582_v50, 0.0  ;;  %3346 = vmatmul.mubr.f32.gmra.mrb[76].mxu0 %v3190_v25 }
 0x467   : > { %v3082_v56 = vpop.f32.mrb[90].mxu1  ;;  %3350 = vmatprep.mubr.f32.mxu0 %v3194_v34 }
 0x468   : > { %v7413_v52 = vpack.c.bf16 %v3174_v51, %v3173_v55  ;;  %v6965_v40 = vpop.f32.mrb[91].mxu1  ;;  %v7583_v59 = vadd.f32 %v9335_v39, %v3082_v56 }
 0x46a   : > { %3351 = vmatmul.mubr.f32.gmra.mrb[78].mxu0 %v3193_v57  ;;  %v3175_v54 = vmax.f32 %v7583_v59, 0.0 }
 0x46b   : > { %7414 = vmatpush3.bf16.msra.mxu0 %v7413_v52  ;;  %v3087_v0 = vpop.f32.mrb[92].mxu1  ;;  %3355 = vmatprep.mubr.f32.mxu0 %v3197_v58 }
 0x46c   : > { %v7584_v53 = vadd.f32 %v9335_v39, %v3087_v0  ;;  %v6968_v31 = vpop.f32.mrb[93].mxu1  ;;  %7415 = vmatprep.subr.bf16.mxu0 %v8009_v3 }
 0x46e   : > { %v3176_v42 = vmax.f32 %v7584_v53, 0.0  ;;  %3356 = vmatmul.mubr.f32.gmra.mrb[80].mxu0 %v3196_v26 }
 0x46f   : > { %v3092_v4 = vpop.f32.mrb[94].mxu1  ;;  %3360 = vmatprep.mubr.f32.mxu0 %v3200_v63 }
 0x470   : > { %v7416_v22 = vpack.c.bf16 %v3176_v42, %v3175_v54  ;;  %v6971_v5 = vpop.f32.mrb[95].mxu1  ;;  %v7585_v7 = vadd.f32 %v9335_v39, %v3092_v4  ;;  %v3205_v39 = vld [vmem:[%s10300_s8 + $0xd8] sm:$0xff] }
 0x472   : > { %3361 = vmatmul.mubr.f32.gmra.mrb[82].mxu0 %v3199_v32  ;;  %v3177_v44 = vmax.f32 %v7585_v7, 0.0  ;;  %v3691_v7 = vld [vmem:[%s10297_s5 + $0x20] sm:$0xff] }
 0x473   : > { %7417 = vmatpush3.bf16.msra.mxu0 %v7416_v22  ;;  %3365 = vmatprep.mubr.f32.mxu0 %v3203_v60 }
 0x474   : > { %6988 = vmatprep.subr.mxu0 %v8011_v6 }
 0x476   : > { %3366 = vmatmul.mubr.f32.gmra.mrb[84].mxu0 %v3202_v8  ;;  %v3692_v8 = vld [vmem:[%s10297_s5 + $0x28] sm:$0xff] }
 0x477   : > { %6989 = vmatpush3.msk.msra.mxu0 %vm3257_vm12, %v3177_v44  ;;  %3370 = vmatprep.mubr.f32.mxu0 %v3206_v33  ;;  %v7425_v44 = vpack.c.bf16 %v3692_v8, %v3691_v7 }
 0x478   : > { %7418 = vmatprep.subr.bf16.mxu0 %v8009_v3 }
 0x47a   : > { %3371 = vmatmul.mubr.f32.gmra.mrb[86].mxu0 %v3205_v39 }
 0x47b   : > { %3375 = vmatprep.mubr.f32.mxu0 %v3209_v61 }
 0x47e   : > { %3376 = vmatmul.mubr.f32.gmra.mrb[88].mxu0 %v3208_v9 }
 0x47f   : > { %3380 = vmatprep.mubr.f32.mxu0 %v3212_v10  ;;  %v3674_v10 = vld [vmem:[#allocation3] sm:$0xff] }
 0x482   : > { %3381 = vmatmul.mubr.f32.gmra.mrb[90].mxu0 %v3211_v11 }
 0x483   : > { %3385 = vmatprep.mubr.f32.mxu0 %v3215_v45 }
 0x486   : > { %3386 = vmatmul.mubr.f32.gmra.mrb[92].mxu0 %v3214_v12 }
 0x487   : > { %6990 = vmatprep.mubr.msk.f32.mxu0 %vm8010_vm1, %v8011_v6 }
 0x48a   : > { %6991 = vmatmul.mubr.msk.f32.vlgmr.msra.gmra.mrb[94].mxu0 %vm3217_vm13, %v3180_v14 }
 0x48b   : > { %6993 = vmatprep.mubr.msk.f32.mxu0 %vm8010_vm1, %v8011_v6  ;;  %7420 = vmatpush3.bf16.msra.mxu0 %v7419_v19 }
 0x48c   : > { %7421 = vmatprep.subr.bf16.mxu0 %v8009_v3 }
 0x48e   : > { %6994 = vmatmul.mubr.msk.f32.gmra.mrb[96].mxu0 %vm3217_vm13, %v3183_v15 }
 0x48f   : > { %6996 = vmatprep.mubr.msk.f32.mxu0 %vm8010_vm1, %v8011_v6  ;;  %7423 = vmatpush3.bf16.msra.mxu0 %v7422_v48 }
 0x490   : > { %7424 = vmatprep.subr.bf16.mxu0 %v8009_v3 }
 0x492   : > { %6997 = vmatmul.mubr.msk.f32.gmra.mrb[98].mxu0 %vm3217_vm13, %v3186_v30 }
 0x493   : > { %6999 = vmatprep.mubr.msk.f32.mxu0 %vm8010_vm1, %v8011_v6  ;;  %7426 = vmatpush3.bf16.msra.mxu0 %v7425_v44 }
 0x494   : > { %7427 = vmatprep.subr.bf16.mxu0 %v8009_v3 }
 0x496   : > { %7000 = vmatmul.mubr.msk.f32.gmra.mrb[100].mxu0 %vm3217_vm13, %v3189_v35 }
 0x497   : > { %7002 = vmatprep.mubr.msk.f32.mxu0 %vm8010_vm1, %v8011_v6 }
 0x49a   : > { %7003 = vmatmul.mubr.msk.f32.gmra.mrb[102].mxu0 %vm3217_vm13, %v3192_v16 }
 0x49b   : > { %7005 = vmatprep.mubr.msk.f32.mxu0 %vm8010_vm1, %v8011_v6 }
 0x49e   : > { %7006 = vmatmul.mubr.msk.f32.gmra.mrb[104].mxu0 %vm3217_vm13, %v3195_v27 }
 0x49f   : > { %7008 = vmatprep.mubr.msk.f32.mxu0 %vm8010_vm1, %v8011_v6 }
 0x4a2   : > { %7009 = vmatmul.mubr.msk.f32.gmra.mrb[106].mxu0 %vm3217_vm13, %v3198_v17 }
 0x4a3   : > { %7011 = vmatprep.mubr.msk.f32.mxu0 %vm8010_vm1, %v8011_v6 }
 0x4a6   : > { %7012 = vmatmul.mubr.msk.f32.gmra.mrb[108].mxu0 %vm3217_vm13, %v3201_v1 }
 0x4a7   : > { %7014 = vmatprep.mubr.msk.f32.mxu0 %vm8010_vm1, %v8011_v6 }
 0x4aa   : > { %7015 = vmatmul.mubr.msk.f32.gmra.mrb[110].mxu0 %vm3217_vm13, %v3204_v2 }
 0x4ab   : > { %7017 = vmatprep.mubr.msk.f32.mxu0 %vm8010_vm1, %v8011_v6 }
 0x4ae   : > { %7018 = vmatmul.mubr.msk.f32.gmra.mrb[112].mxu0 %vm3217_vm13, %v3207_v46 }
 0x4af   : > { %7020 = vmatprep.mubr.msk.f32.mxu0 %vm8010_vm1, %v8011_v6 }
 0x4b2   : > { %7021 = vmatmul.mubr.msk.f32.gmra.mrb[114].mxu0 %vm3217_vm13, %v3210_v23 }
 0x4b3   : > { %7023 = vmatprep.mubr.msk.f32.mxu0 %vm8010_vm1, %v8011_v6 }
 0x4b6   : > { %7024 = vmatmul.mubr.msk.f32.gmra.mrb[116].mxu0 %vm3217_vm13, %v3213_v36 }
 0x4b7   : > { %7026 = vmatprep.mubr.msk.f32.mxu0 %vm8010_vm1, %v8011_v6 }
 0x4ba   : > { %7027 = vmatmul.mubr.msk.f32.gmra.mrb[118].mxu0 %vm3217_vm13, %v3216_v41 }
 0x4bb   : > { %7041 = vmatprep.mubr.msk.f32.mxu0 %vm8010_vm1, %v8011_v6 }
 0x4be   : > { %7042 = vmatmul.mubr.msk.f32.vlgmr.msra.gmra.mrb[120].mxu0 %vm3521_vm14, %v3674_v10 }
 0x4bf   : > { %7044 = vmatprep.mubr.msk.f32.mxu0 %vm8010_vm1, %v8011_v6 }
 0x529   : > { %v6256_v62 = vpop.f32.mrb[68].mxu0 }
 0x52a   : > { %v6257_v37 = vpop.f32.mrb[69].mxu0 }
 0x52b   : > { %v6258_v43 = vadd.f32 %v6257_v37, %v6256_v62 }
 0x52d   : > { %v6259_v28 = vpop.f32.mrb[70].mxu0 }
 0x52e   : > { %v6260_v21 = vpop.f32.mrb[71].mxu0 }
 0x52f   : > { %v6261_v49 = vadd.f32 %v6260_v21, %v6259_v28 }
 0x531   : > { %v6262_v24 = vpop.f32.mrb[72].mxu0 }
 0x532   : > { %v6263_v38 = vpop.f32.mrb[73].mxu0 }
 0x533   : > { %v6264_v25 = vadd.f32 %v6263_v38, %v6262_v24 }
 0x535   : > { %v6265_v50 = vpop.f32.mrb[74].mxu0 }
 0x536   : > { %v6266_v29 = vpop.f32.mrb[75].mxu0 }
 0x537   : > { %v6267_v34 = vadd.f32 %v6266_v29, %v6265_v50  ;;  %v5929_v50 = vld [vmem:[%s10297_s5 + $0x38] sm:$0xff] }
 0x539   : > { %v6268_v55 = vpop.f32.mrb[76].mxu0 }
 0x53a   : > { %v6269_v51 = vpop.f32.mrb[77].mxu0 }
 0x53b   : > { %v6270_v56 = vadd.f32 %v6269_v51, %v6268_v55 }
 0x53d   : > { %v6271_v57 = vpop.f32.mrb[78].mxu0 }
 0x53e   : > { %v6272_v52 = vpop.f32.mrb[79].mxu0 }
 0x53f   : > { %v9610_v40 = vadd.f32 %v6272_v52, %v6271_v57  ;;  %v5931_v57 = vld [vmem:[%s10297_s5 + $0x48] sm:$0xff] }
 0x541   : > { %v6274_v58 = vpop.f32.mrb[80].mxu0 }
 0x542   : > { %v6275_v59 = vpop.f32.mrb[81].mxu0 }
 0x543   : > { %v9612_v0 = vadd.f32 %v6275_v59, %v6274_v58 }
 0x545   : > { %v6277_v26 = vpop.f32.mrb[82].mxu0 }
 0x546   : > { %v6278_v53 = vpop.f32.mrb[83].mxu0 }
 0x547   : > { %v9614_v31 = vadd.f32 %v6278_v53, %v6277_v26  ;;  %v5933_v26 = vld [vmem:[%s10297_s5 + $0x58] sm:$0xff] }
 0x549   : > { %v6280_v63 = vpop.f32.mrb[84].mxu0 }
 0x54a   : > { %v6281_v54 = vpop.f32.mrb[85].mxu0 }
 0x54b   : > { %v9616_v42 = vadd.f32 %v6281_v54, %v6280_v63 }
 0x54d   : > { %v6283_v4 = vpop.f32.mrb[86].mxu0 }
 0x54e   : > { %v6284_v32 = vpop.f32.mrb[87].mxu0 }
 0x54f   : > { %v9618_v22 = vadd.f32 %v6284_v32, %v6283_v4 }
 0x551   : > { %v6286_v5 = vpop.f32.mrb[88].mxu0 }
 0x552   : > { %v6287_v60 = vpop.f32.mrb[89].mxu0 }
 0x553   : > { %v9626_v33 = vadd.f32 %v6287_v60, %v6286_v5 }
 0x555   : > { %v6289_v39 = vpop.f32.mrb[90].mxu0 }
 0x556   : > { %v6290_v61 = vpop.f32.mrb[91].mxu0 }
 0x557   : > { %v9629_v9 = vadd.f32 %v6290_v61, %v6289_v39 }
 0x559   : > { %v6292_v11 = vpop.f32.mrb[92].mxu0 }
 0x55a   : > { %v6293_v45 = vpop.f32.mrb[93].mxu0 }
 0x55b   : > { %v9634_v12 = vadd.f32 %v6293_v45, %v6292_v11 }
 0x55d   : > { %v3457_v14 = vpop.f32.mrb[94].mxu0 }
 0x55e   : > { %v3458_v15 = vadd.f32 %v6258_v43, %v3457_v14  ;;  %v6992_v30 = vpop.f32.mrb[95].mxu0 }
 0x560   : > { %3565 = vrot.lane.b32.xlu1 %v3458_v15, %s10324_s20  ;;  %3619 = vrot.lane.b32.xlu0 %v3458_v15, %s8016_s25  ;;  %3538 = vst.msk [vmem:[#allocation3 + $0xb] sm:$0xff] %vm3537_vm15, %v3458_v15 }
 0x561   : > { %v3462_v35 = vpop.f32.mrb[96].mxu0 }
 0x562   : > { %v3463_v16 = vadd.f32 %v6261_v49, %v3462_v35  ;;  %v6995_v27 = vpop.f32.mrb[97].mxu0 }
 0x564   : > { %3567 = vrot.lane.b32.xlu1 %v3463_v16, %s10324_s20  ;;  %3621 = vrot.lane.b32.xlu0 %v3463_v16, %s8016_s25  ;;  %3539 = vst.msk [vmem:[#allocation3 + $0x13] sm:$0xff] %vm3537_vm15, %v3463_v16 }
 0x565   : > { %v3467_v17 = vpop.f32.mrb[98].mxu0 }
 0x566   : > { %v3468_v1 = vadd.f32 %v6264_v25, %v3467_v17  ;;  %v6998_v2 = vpop.f32.mrb[99].mxu0  ;;  %v5928_v25 = vld [vmem:[%s10297_s5 + $0x30] sm:$0xff] }
 0x567   : > { %v7428_v29 = vpack.c.bf16 %v5929_v50, %v5928_v25  ;;  %v5949_v25 = vld [vmem:[%s10297_s5 + $0x70] sm:$0xff]  ;;  %v5950_v50 = vld [vmem:[%s10297_s5 + $0x78] sm:$0xff] }
 0x568   : > { %3569 = vrot.lane.b32.xlu1 %v3468_v1, %s10324_s20  ;;  %3623 = vrot.lane.b32.xlu0 %v3468_v1, %s8016_s25  ;;  %3540 = vst.msk [vmem:[#allocation3 + $0x1b] sm:$0xff] %vm3537_vm15, %v3468_v1 }
 0x569   : > { %v3472_v46 = vpop.f32.mrb[100].mxu0  ;;  %7429 = vmatpush3.bf16.msra.mxu0 %v7428_v29 }
 0x56a   : > { %v3473_v23 = vadd.f32 %v6267_v34, %v3472_v46  ;;  %v7001_v36 = vpop.f32.mrb[101].mxu0  ;;  %7430 = vmatprep.subr.bf16.mxu0 %v8009_v3 }
 0x56c   : > { %3571 = vrot.lane.b32.xlu1 %v3473_v23, %s10324_s20  ;;  %3625 = vrot.lane.b32.xlu0 %v3473_v23, %s8016_s25  ;;  %3541 = vst.msk [vmem:[#allocation3 + $0x23] sm:$0xff] %vm3537_vm15, %v3473_v23 }
 0x56d   : > { %v3477_v41 = vpop.f32.mrb[102].mxu0 }
 0x56e   : > { %v3478_v47 = vadd.f32 %v6270_v56, %v3477_v41  ;;  %v7004_v13 = vpop.f32.mrb[103].mxu0  ;;  %v5930_v56 = vld [vmem:[%s10297_s5 + $0x40] sm:$0xff] }
 0x56f   : > { %v7431_v52 = vpack.c.bf16 %v5931_v57, %v5930_v56 }
 0x570   : > { %3573 = vrot.lane.b32.xlu1 %v3478_v47, %s10324_s20  ;;  %3627 = vrot.lane.b32.xlu0 %v3478_v47, %s8016_s25  ;;  %3542 = vst.msk [vmem:[#allocation3 + $0x2b] sm:$0xff] %vm3537_vm15, %v3478_v47 }
 0x571   : > { %v3482_v18 = vpop.f32.mrb[104].mxu0  ;;  %7432 = vmatpush3.bf16.msra.mxu0 %v7431_v52 }
 0x572   : > { %v3483_v19 = vadd.f32 %v9610_v40, %v3482_v18  ;;  %v7007_v20 = vpop.f32.mrb[105].mxu0  ;;  %7433 = vmatprep.subr.bf16.mxu0 %v8009_v3 }
 0x574   : > { %3575 = vrot.lane.b32.xlu1 %v3483_v19, %s10324_s20  ;;  %3629 = vrot.lane.b32.xlu0 %v3483_v19, %s8016_s25  ;;  %3543 = vst.msk [vmem:[#allocation3 + $0x33] sm:$0xff] %vm3537_vm15, %v3483_v19 }
 0x575   : > { %v3487_v48 = vpop.f32.mrb[106].mxu0 }
 0x576   : > { %v3488_v62 = vadd.f32 %v9612_v0, %v3487_v48  ;;  %v7010_v37 = vpop.f32.mrb[107].mxu0  ;;  %v5932_v0 = vld [vmem:[%s10297_s5 + $0x50] sm:$0xff] }
 0x577   : > { %v7434_v53 = vpack.c.bf16 %v5933_v26, %v5932_v0 }
 0x578   : > { %3577 = vrot.lane.b32.xlu1 %v3488_v62, %s10324_s20  ;;  %3631 = vrot.lane.b32.xlu0 %v3488_v62, %s8016_s25  ;;  %3544 = vst.msk [vmem:[#allocation3 + $0x3b] sm:$0xff] %vm3537_vm15, %v3488_v62 }
 0x579   : > { %v3492_v43 = vpop.f32.mrb[108].mxu0  ;;  %7435 = vmatpush3.bf16.msra.mxu0 %v7434_v53 }
 0x57a   : > { %v3493_v28 = vadd.f32 %v9614_v31, %v3492_v43  ;;  %v7013_v21 = vpop.f32.mrb[109].mxu0  ;;  %7436 = vmatprep.subr.bf16.mxu0 %v8009_v3 }
 0x57b   : > { %v5947_v21 = vld [vmem:[%s10297_s5 + $0x60] sm:$0xff] }
 0x57c   : > { %3579 = vrot.lane.b32.xlu1 %v3493_v28, %s10324_s20  ;;  %3633 = vrot.lane.b32.xlu0 %v3493_v28, %s8016_s25  ;;  %3545 = vst.msk [vmem:[#allocation3 + $0x43] sm:$0xff] %vm3537_vm15, %v3493_v28 }
 0x57d   : > { %v3497_v49 = vpop.f32.mrb[110].mxu0 }
 0x57e   : > { %v3498_v24 = vadd.f32 %v9616_v42, %v3497_v49  ;;  %v7016_v38 = vpop.f32.mrb[111].mxu0  ;;  %v5948_v49 = vld [vmem:[%s10297_s5 + $0x68] sm:$0xff] }
 0x57f   : > { %v7437_v38 = vpack.c.bf16 %v5948_v49, %v5947_v21 }
 0x580   : > { %3581 = vrot.lane.b32.xlu1 %v3498_v24, %s10324_s20  ;;  %3635 = vrot.lane.b32.xlu0 %v3498_v24, %s8016_s25  ;;  %3546 = vst.msk [vmem:[#allocation3 + $0x4b] sm:$0xff] %vm3537_vm15, %v3498_v24 }
 0x581   : > { %v3502_v34 = vpop.f32.mrb[112].mxu0 }
 0x582   : > { %v3503_v55 = vadd.f32 %v9618_v22, %v3502_v34  ;;  %v7019_v51 = vpop.f32.mrb[113].mxu0  ;;  %v7440_v34 = vpack.c.bf16 %v5950_v50, %v5949_v25 }
 0x583   : > { %v5952_v51 = vld [vmem:[%s10297_s5 + $0x88] sm:$0xff] }
 0x584   : > { %3583 = vrot.lane.b32.xlu1 %v3503_v55, %s10324_s20  ;;  %3637 = vrot.lane.b32.xlu0 %v3503_v55, %s8016_s25  ;;  %3547 = vst.msk [vmem:[#allocation3 + $0x53] sm:$0xff] %vm3537_vm15, %v3503_v55  ;;  %v5951_v55 = vld [vmem:[%s10297_s5 + $0x80] sm:$0xff] }
 0x585   : > { %v3507_v40 = vpop.f32.mrb[114].mxu0  ;;  %v7443_v57 = vpack.c.bf16 %v5952_v51, %v5951_v55 }
 0x586   : > { %v3508_v58 = vadd.f32 %v9626_v33, %v3507_v40  ;;  %v7022_v59 = vpop.f32.mrb[115].mxu0 }
 0x588   : > { %3585 = vrot.lane.b32.xlu1 %v3508_v58, %s10324_s20  ;;  %3639 = vrot.lane.b32.xlu0 %v3508_v58, %s8016_s25  ;;  %3548 = vst.msk [vmem:[#allocation3 + $0x5b] sm:$0xff] %vm3537_vm15, %v3508_v58 }
 0x589   : > { %v3512_v31 = vpop.f32.mrb[116].mxu0 }
 0x58a   : > { %v3513_v63 = vadd.f32 %v9629_v9, %v3512_v31  ;;  %v7025_v54 = vpop.f32.mrb[117].mxu0 }
 0x58c   : > { %3587 = vrot.lane.b32.xlu1 %v3513_v63, %s10324_s20  ;;  %3641 = vrot.lane.b32.xlu0 %v3513_v63, %s8016_s25  ;;  %3549 = vst.msk [vmem:[#allocation3 + $0x63] sm:$0xff] %vm3537_vm15, %v3513_v63 }
 0x58d   : > { %v3517_v42 = vpop.f32.mrb[118].mxu0 }
 0x58e   : > { %v3518_v4 = vadd.f32 %v9634_v12, %v3517_v42  ;;  %v7028_v32 = vpop.f32.mrb[119].mxu0 }
 0x590   : > { %3551 = vst.msk [vmem:[#allocation3 + $0x6b] sm:$0xf] %vm3550_vm0, %v3518_v4  ;;  %3589 = vrot.lane.b32.xlu1 %v3518_v4, %s10324_s20  ;;  %3643 = vrot.lane.b32.xlu0 %v3518_v4, %s8016_s25  ;;  %s10181_s25 = scalar_lea.hbm %s10305_s13, %s10175_s28 }
 0x591   : > { %v3798_v31 = vpop.f32.mrb[120].mxu0 }
 0x592   : > { %v7043_v63 = vpop.f32.mrb[121].mxu0  ;;  %v5973_v31 = vld [vmem:[%s10301_s9 + $0x48] sm:$0xff] }
 0x5d2   : > { %v3566_v22 = vpop.permute.xlu1 %3565  ;;  %v3620_v5 = vpop.permute.xlu0 %3619 }
 0x5d3   : > { %3605 = vst.msk [vmem:[#allocation3 + $0xa] sm:$0xff] %vm3604_vm2, %v3566_v22 }
 0x5d4   : > { %3659 = vst.msk [vmem:[#allocation3 + $0x9] sm:$0xff] %vm3658_vm3, %v3620_v5 }
 0x5d6   : > { %v3568_v60 = vpop.permute.xlu1 %3567  ;;  %v3622_v7 = vpop.permute.xlu0 %3621 }
 0x5d7   : > { %3606 = vst.msk [vmem:[#allocation3 + $0x12] sm:$0xff] %vm3604_vm2, %v3568_v60 }
 0x5d8   : > { %3660 = vst.msk [vmem:[#allocation3 + $0x11] sm:$0xff] %vm3658_vm3, %v3622_v7 }
 0x5da   : > { %v3570_v8 = vpop.permute.xlu1 %3569  ;;  %v3624_v33 = vpop.permute.xlu0 %3623 }
 0x5db   : > { %3607 = vst.msk [vmem:[#allocation3 + $0x1a] sm:$0xff] %vm3604_vm2, %v3570_v8  ;;  %v3675_v44 = vld [vmem:[#allocation3 + $0x8] sm:$0xff] }
 0x5dc   : > { %3661 = vst.msk [vmem:[#allocation3 + $0x19] sm:$0xff] %vm3658_vm3, %v3624_v33  ;;  %7045 = vmatmul.mubr.msk.f32.gmra.mrb[122].mxu0 %vm3521_vm14, %v3675_v44 }
 0x5dd   : > { %7047 = vmatprep.mubr.msk.f32.mxu0 %vm8010_vm1, %v8011_v6 }
 0x5de   : > { %v3572_v39 = vpop.permute.xlu1 %3571  ;;  %v3626_v61 = vpop.permute.xlu0 %3625 }
 0x5df   : > { %3608 = vst.msk [vmem:[#allocation3 + $0x22] sm:$0xff] %vm3604_vm2, %v3572_v39  ;;  %v3676_v9 = vld [vmem:[#allocation3 + $0x10] sm:$0xff] }
 0x5e0   : > { %3662 = vst.msk [vmem:[#allocation3 + $0x21] sm:$0xff] %vm3658_vm3, %v3626_v61  ;;  %7048 = vmatmul.mubr.msk.f32.gmra.mrb[124].mxu0 %vm3521_vm14, %v3676_v9  ;;  %v3871_v29 = vld [vmem:[#allocation3 + $0xa] sm:$0xff] }
 0x5e1   : > { %7050 = vmatprep.mubr.msk.f32.mxu0 %vm8010_vm1, %v8011_v6 }
 0x5e2   : > { %v3574_v10 = vpop.permute.xlu1 %3573  ;;  %v3628_v11 = vpop.permute.xlu0 %3627 }
 0x5e3   : > { %3609 = vst.msk [vmem:[#allocation3 + $0x2a] sm:$0xff] %vm3604_vm2, %v3574_v10  ;;  %v3677_v45 = vld [vmem:[#allocation3 + $0x18] sm:$0xff] }
 0x5e4   : > { %3663 = vst.msk [vmem:[#allocation3 + $0x29] sm:$0xff] %vm3658_vm3, %v3628_v11  ;;  %7051 = vmatmul.mubr.msk.f32.gmra.mrb[126].mxu0 %vm3521_vm14, %v3677_v45  ;;  %v3872_v56 = vld [vmem:[#allocation3 + $0x12] sm:$0xff] }
 0x5e5   : > { %7053 = vmatprep.mubr.msk.f32.mxu0 %vm8010_vm1, %v8011_v6  ;;  %v4063_v22 = vld [vmem:[#allocation3 + $0x14] sm:$0xff] }
 0x5e6   : > { %v3576_v12 = vpop.permute.xlu1 %3575  ;;  %v3630_v14 = vpop.permute.xlu0 %3629  ;;  %v4264_v45 = vld [vmem:[%s10301_s9] sm:$0xff] }
 0x5e7   : > { %3610 = vst.msk [vmem:[#allocation3 + $0x32] sm:$0xff] %vm3604_vm2, %v3576_v12  ;;  %v3678_v15 = vld [vmem:[#allocation3 + $0x20] sm:$0xff] }
 0x5e8   : > { %3664 = vst.msk [vmem:[#allocation3 + $0x31] sm:$0xff] %vm3658_vm3, %v3630_v14  ;;  %7054 = vmatmul.mubr.msk.f32.gmra.mrb[128].mxu0 %vm3521_vm14, %v3678_v15  ;;  %v3873_v52 = vld [vmem:[#allocation3 + $0x1a] sm:$0xff]  ;;  %v4075_v15 = vld [vmem:[#allocation3 + $0x74] sm:$0xf] }
 0x5e9   : > { %7056 = vmatprep.mubr.msk.f32.mxu0 %vm8010_vm1, %v8011_v6  ;;  %v4064_v5 = vld [vmem:[#allocation3 + $0x1c] sm:$0xff] }
 0x5ea   : > { %v3578_v30 = vpop.permute.xlu1 %3577  ;;  %v3632_v35 = vpop.permute.xlu0 %3631  ;;  %v4265_v12 = vld [vmem:[%s10301_s9 + $0x8] sm:$0xff] }
 0x5eb   : > { %3611 = vst.msk [vmem:[#allocation3 + $0x3a] sm:$0xff] %vm3604_vm2, %v3578_v30  ;;  %v3679_v16 = vld [vmem:[#allocation3 + $0x28] sm:$0xff]  ;;  %v7446_v14 = vpack.c.bf16 %v4265_v12, %v4264_v45  ;;  %v5980_v12 = vld [vmem:[%s10301_s9 + $0x78] sm:$0xff] }
 0x5ec   : > { %3665 = vst.msk [vmem:[#allocation3 + $0x39] sm:$0xff] %vm3658_vm3, %v3632_v35  ;;  %7057 = vmatmul.mubr.msk.f32.gmra.mrb[130].mxu0 %vm3521_vm14, %v3679_v16  ;;  %v3874_v40 = vld [vmem:[#allocation3 + $0x22] sm:$0xff]  ;;  %v4267_v35 = vld [vmem:[%s10301_s9 + $0x18] sm:$0xff] }
 0x5ed   : > { %7059 = vmatprep.mubr.msk.f32.mxu0 %vm8010_vm1, %v8011_v6  ;;  %v4065_v60 = vld [vmem:[#allocation3 + $0x24] sm:$0xff] }
 0x5ee   : > { %v3580_v27 = vpop.permute.xlu1 %3579  ;;  %v3634_v17 = vpop.permute.xlu0 %3633  ;;  %v4266_v30 = vld [vmem:[%s10301_s9 + $0x10] sm:$0xff] }
 0x5ef   : > { %3612 = vst.msk [vmem:[#allocation3 + $0x42] sm:$0xff] %vm3604_vm2, %v3580_v27  ;;  %v3680_v1 = vld [vmem:[#allocation3 + $0x30] sm:$0xff]  ;;  %v7449_v16 = vpack.c.bf16 %v4267_v35, %v4266_v30  ;;  %v5979_v45 = vld [vmem:[%s10301_s9 + $0x70] sm:$0xff] }
 0x5f0   : > { %3666 = vst.msk [vmem:[#allocation3 + $0x41] sm:$0xff] %vm3658_vm3, %v3634_v17  ;;  %7060 = vmatmul.mubr.msk.f32.gmra.mrb[132].mxu0 %vm3521_vm14, %v3680_v1  ;;  %v3875_v58 = vld [vmem:[#allocation3 + $0x2a] sm:$0xff] }
 0x5f1   : > { %7062 = vmatprep.mubr.msk.f32.mxu0 %vm8010_vm1, %v8011_v6  ;;  %v4066_v7 = vld [vmem:[#allocation3 + $0x2c] sm:$0xff] }
 0x5f2   : > { %v3582_v2 = vpop.permute.xlu1 %3581  ;;  %v3636_v46 = vpop.permute.xlu0 %3635 }
 0x5f3   : > { %3613 = vst.msk [vmem:[#allocation3 + $0x4a] sm:$0xff] %vm3604_vm2, %v3582_v2  ;;  %v3681_v23 = vld [vmem:[#allocation3 + $0x38] sm:$0xff] }
 0x5f4   : > { %3667 = vst.msk [vmem:[#allocation3 + $0x49] sm:$0xff] %vm3658_vm3, %v3636_v46  ;;  %7063 = vmatmul.mubr.msk.f32.gmra.mrb[134].mxu0 %vm3521_vm14, %v3681_v23  ;;  %v3876_v59 = vld [vmem:[#allocation3 + $0x32] sm:$0xff] }
 0x5f5   : > { %7065 = vmatprep.mubr.msk.f32.mxu0 %vm8010_vm1, %v8011_v6  ;;  %v4067_v8 = vld [vmem:[#allocation3 + $0x34] sm:$0xff] }
 0x5f6   : > { %v3584_v36 = vpop.permute.xlu1 %3583  ;;  %v3638_v41 = vpop.permute.xlu0 %3637 }
 0x5f7   : > { %3614 = vst.msk [vmem:[#allocation3 + $0x52] sm:$0xff] %vm3604_vm2, %v3584_v36  ;;  %v3682_v47 = vld [vmem:[#allocation3 + $0x40] sm:$0xff] }
 0x5f8   : > { %3668 = vst.msk [vmem:[#allocation3 + $0x51] sm:$0xff] %vm3658_vm3, %v3638_v41  ;;  %7066 = vmatmul.mubr.msk.f32.gmra.mrb[136].mxu0 %vm3521_vm14, %v3682_v47  ;;  %v3877_v0 = vld [vmem:[#allocation3 + $0x3a] sm:$0xff] }
 0x5f9   : > { %7068 = vmatprep.mubr.msk.f32.mxu0 %vm8010_vm1, %v8011_v6  ;;  %v4068_v33 = vld [vmem:[#allocation3 + $0x3c] sm:$0xff] }
 0x5fa   : > { %v3586_v13 = vpop.permute.xlu1 %3585  ;;  %v3640_v18 = vpop.permute.xlu0 %3639 }
 0x5fb   : > { %3615 = vst.msk [vmem:[#allocation3 + $0x5a] sm:$0xff] %vm3604_vm2, %v3586_v13  ;;  %v3683_v19 = vld [vmem:[#allocation3 + $0x48] sm:$0xff] }
 0x5fc   : > { %3669 = vst.msk [vmem:[#allocation3 + $0x59] sm:$0xff] %vm3658_vm3, %v3640_v18  ;;  %7069 = vmatmul.mubr.msk.f32.gmra.mrb[138].mxu0 %vm3521_vm14, %v3683_v19  ;;  %v3878_v26 = vld [vmem:[#allocation3 + $0x42] sm:$0xff] }
 0x5fd   : > { %7071 = vmatprep.mubr.msk.f32.mxu0 %vm8010_vm1, %v8011_v6  ;;  %v4069_v44 = vld [vmem:[#allocation3 + $0x44] sm:$0xff] }
 0x5fe   : > { %v3588_v20 = vpop.permute.xlu1 %3587  ;;  %v3642_v48 = vpop.permute.xlu0 %3641 }
 0x5ff   : > { %3616 = vst.msk [vmem:[#allocation3 + $0x62] sm:$0xff] %vm3604_vm2, %v3588_v20  ;;  %v3684_v62 = vld [vmem:[#allocation3 + $0x50] sm:$0xff] }
 0x600   : > { %3670 = vst.msk [vmem:[#allocation3 + $0x61] sm:$0xff] %vm3658_vm3, %v3642_v48  ;;  %7072 = vmatmul.mubr.msk.f32.gmra.mrb[140].mxu0 %vm3521_vm14, %v3684_v62  ;;  %v3879_v53 = vld [vmem:[#allocation3 + $0x4a] sm:$0xff] }
 0x601   : > { %7074 = vmatprep.mubr.msk.f32.mxu0 %vm8010_vm1, %v8011_v6  ;;  %v4070_v39 = vld [vmem:[#allocation3 + $0x4c] sm:$0xff] }
 0x602   : > { %v3590_v37 = vpop.permute.xlu1 %3589  ;;  %v3644_v43 = vpop.permute.xlu0 %3643 }
 0x603   : > { %3618 = vst.msk [vmem:[#allocation3 + $0x6a] sm:$0xf] %vm3617_vm4, %v3590_v37  ;;  %v3685_v28 = vld [vmem:[#allocation3 + $0x58] sm:$0xff] }
 0x604   : > { %3672 = vst.msk [vmem:[#allocation3 + $0x69] sm:$0xf] %vm3671_vm5, %v3644_v43  ;;  %7075 = vmatmul.mubr.msk.f32.gmra.mrb[142].mxu0 %vm3521_vm14, %v3685_v28  ;;  %v3880_v54 = vld [vmem:[#allocation3 + $0x52] sm:$0xff] }
 0x605   : > { %7077 = vmatprep.mubr.msk.f32.mxu0 %vm8010_vm1, %v8011_v6  ;;  %v4071_v61 = vld [vmem:[#allocation3 + $0x54] sm:$0xff] }
 0x607   : > { %v3686_v24 = vld [vmem:[#allocation3 + $0x60] sm:$0xf] }
 0x608   : > { %7078 = vmatmul.mubr.msk.f32.gmra.mrb[144].mxu0 %vm3521_vm14, %v3686_v24  ;;  %v3881_v42 = vld [vmem:[#allocation3 + $0x5a] sm:$0xff]  ;;  %v9879_v24 = vld [vmem:[%s10298_s6] ss:$0 sm:$0xff] }
 0x609   : > { %7092 = vmatprep.mubr.msk.f32.mxu0 %vm8010_vm1, %v8011_v6  ;;  %v4072_v9 = vld [vmem:[#allocation3 + $0x5c] sm:$0xff] }
 0x60b   : > { %v3882_v4 = vld [vmem:[#allocation3 + $0x62] sm:$0xff]  ;;  %v3883_v32 = vld [vmem:[#allocation3 + $0x6a] sm:$0xf] }
 0x60c   : > { %7093 = vmatmul.mubr.msk.f32.vlgmr.msra.gmra.mrb[146].mxu0 %vm3521_vm14, %v3871_v29  ;;  %v4073_v10 = vld [vmem:[#allocation3 + $0x64] sm:$0xff]  ;;  %v4074_v11 = vld [vmem:[#allocation3 + $0x6c] sm:$0xff]  ;;  %v5967_v29 = vld [vmem:[%s10301_s9 + $0x20] sm:$0xff] }
 0x60d   : > { %7095 = vmatprep.mubr.msk.f32.mxu0 %vm8010_vm1, %v8011_v6  ;;  %7438 = vmatpush3.bf16.msra.mxu0 %v7437_v38 }
 0x60e   : > { %7439 = vmatprep.subr.bf16.mxu0 %v8009_v3 }
 0x610   : > { %7096 = vmatmul.mubr.msk.f32.gmra.mrb[122].mxu0 %vm3521_vm14, %v3872_v56 }
 0x611   : > { %7098 = vmatprep.mubr.msk.f32.mxu0 %vm8010_vm1, %v8011_v6  ;;  %7441 = vmatpush3.bf16.msra.mxu0 %v7440_v34  ;;  %v5968_v34 = vld [vmem:[%s10301_s9 + $0x28] sm:$0xff] }
 0x612   : > { %7442 = vmatprep.subr.bf16.mxu0 %v8009_v3  ;;  %v7452_v56 = vpack.c.bf16 %v5968_v34, %v5967_v29  ;;  %v5990_v29 = vld [vmem:[%s10301_s9 + $0xb8] sm:$0xff] }
 0x614   : > { %7099 = vmatmul.mubr.msk.f32.gmra.mrb[124].mxu0 %vm3521_vm14, %v3873_v52 }
 0x615   : > { %7101 = vmatprep.mubr.msk.f32.mxu0 %vm8010_vm1, %v8011_v6  ;;  %7444 = vmatpush3.bf16.msra.mxu0 %v7443_v57 }
 0x616   : > { %7445 = vmatprep.subr.bf16.mxu0 %v8009_v3 }
 0x618   : > { %7102 = vmatmul.mubr.msk.f32.gmra.mrb[126].mxu0 %vm3521_vm14, %v3874_v40  ;;  %v5969_v40 = vld [vmem:[%s10301_s9 + $0x30] sm:$0xff] }
 0x619   : > { %7104 = vmatprep.mubr.msk.f32.mxu0 %vm8010_vm1, %v8011_v6 }
 0x61c   : > { %7105 = vmatmul.mubr.msk.f32.gmra.mrb[128].mxu0 %vm3521_vm14, %v3875_v58  ;;  %v5970_v58 = vld [vmem:[%s10301_s9 + $0x38] sm:$0xff] }
 0x61d   : > { %7107 = vmatprep.mubr.msk.f32.mxu0 %vm8010_vm1, %v8011_v6 }
 0x620   : > { %7108 = vmatmul.mubr.msk.f32.gmra.mrb[148].mxu0 %vm3521_vm14, %v3876_v59 }
 0x621   : > { %7110 = vmatprep.mubr.msk.f32.mxu0 %vm8010_vm1, %v8011_v6 }
 0x624   : > { %7111 = vmatmul.mubr.msk.f32.gmra.mrb[132].mxu0 %vm3521_vm14, %v3877_v0  ;;  %v7455_v0 = vpack.c.bf16 %v5970_v58, %v5969_v40  ;;  %v5994_v58 = vld [vmem:[%s10301_s9 + $0xd0] sm:$0xff] }
 0x625   : > { %7113 = vmatprep.mubr.msk.f32.mxu0 %vm8010_vm1, %v8011_v6 }
 0x628   : > { %7114 = vmatmul.mubr.msk.f32.gmra.mrb[134].mxu0 %vm3521_vm14, %v3878_v26 }
 0x629   : > { %7116 = vmatprep.mubr.msk.f32.mxu0 %vm8010_vm1, %v8011_v6 }
 0x62c   : > { %7117 = vmatmul.mubr.msk.f32.gmra.mrb[136].mxu0 %vm3521_vm14, %v3879_v53  ;;  %v5972_v53 = vld [vmem:[%s10301_s9 + $0x40] sm:$0xff] }
 0x62d   : > { %7119 = vmatprep.mubr.msk.f32.mxu0 %vm8010_vm1, %v8011_v6 }
 0x630   : > { %7120 = vmatmul.mubr.msk.f32.gmra.mrb[138].mxu0 %vm3521_vm14, %v3880_v54  ;;  %v7458_v54 = vpack.c.bf16 %v5973_v31, %v5972_v53  ;;  %v5998_v53 = vld [vmem:[%s10301_s9 + $0xe8] sm:$0xff] }
 0x631   : > { %7122 = vmatprep.mubr.msk.f32.mxu0 %vm8010_vm1, %v8011_v6 }
 0x634   : > { %7123 = vmatmul.mubr.msk.f32.gmra.mrb[150].mxu0 %vm3521_vm14, %v3881_v42 }
 0x635   : > { %7125 = vmatprep.mubr.msk.f32.mxu0 %vm8010_vm1, %v8011_v6 }
 0x638   : > { %7126 = vmatmul.mubr.msk.f32.gmra.mrb[152].mxu0 %vm3521_vm14, %v3882_v4 }
 0x639   : > { %7128 = vmatprep.mubr.msk.f32.mxu0 %vm8010_vm1, %v8011_v6 }
 0x63c   : > { %7129 = vmatmul.mubr.msk.f32.gmra.mrb[154].mxu0 %vm3521_vm14, %v3883_v32  ;;  %v5974_v32 = vld [vmem:[%s10301_s9 + $0x50] sm:$0xff] }
 0x63d   : > { %7143 = vmatprep.mubr.msk.f32.mxu0 %vm8010_vm1, %v8011_v6 }
 0x640   : > { %7144 = vmatmul.mubr.msk.f32.vlgmr.msra.gmra.mrb[156].mxu0 %vm3521_vm14, %v4063_v22  ;;  %v5975_v22 = vld [vmem:[%s10301_s9 + $0x58] sm:$0xff] }
 0x641   : > { %7146 = vmatprep.mubr.msk.f32.mxu0 %vm8010_vm1, %v8011_v6  ;;  %7447 = vmatpush3.bf16.msra.mxu0 %v7446_v14 }
 0x642   : > { %7448 = vmatprep.subr.bf16.mxu0 %v8009_v3 }
 0x644   : > { %7147 = vmatmul.mubr.msk.f32.gmra.mrb[122].mxu0 %vm3521_vm14, %v4064_v5 }
 0x645   : > { %7149 = vmatprep.mubr.msk.f32.mxu0 %vm8010_vm1, %v8011_v6  ;;  %7450 = vmatpush3.bf16.msra.mxu0 %v7449_v16 }
 0x646   : > { %7451 = vmatprep.subr.bf16.mxu0 %v8009_v3 }
 0x648   : > { %7150 = vmatmul.mubr.msk.f32.gmra.mrb[124].mxu0 %vm3521_vm14, %v4065_v60  ;;  %v7461_v60 = vpack.c.bf16 %v5975_v22, %v5974_v32  ;;  %v6002_v32 = vld [vmem:[%s10301_s9 + $0x100] sm:$0xff]  ;;  %v6003_v22 = vld [vmem:[%s10301_s9 + $0x108] sm:$0xff] }
 0x649   : > { %7152 = vmatprep.mubr.msk.f32.mxu0 %vm8010_vm1, %v8011_v6 }
 0x64c   : > { %7153 = vmatmul.mubr.msk.f32.gmra.mrb[126].mxu0 %vm3521_vm14, %v4066_v7 }
 0x64d   : > { %7155 = vmatprep.mubr.msk.f32.mxu0 %vm8010_vm1, %v8011_v6 }
 0x650   : > { %7156 = vmatmul.mubr.msk.f32.gmra.mrb[128].mxu0 %vm3521_vm14, %v4067_v8  ;;  %v5977_v8 = vld [vmem:[%s10301_s9 + $0x60] sm:$0xff] }
 0x651   : > { %7158 = vmatprep.mubr.msk.f32.mxu0 %vm8010_vm1, %v8011_v6 }
 0x654   : > { %7159 = vmatmul.mubr.msk.f32.gmra.mrb[158].mxu0 %vm3521_vm14, %v4068_v33  ;;  %v5978_v33 = vld [vmem:[%s10301_s9 + $0x68] sm:$0xff] }
 0x655   : > { %7161 = vmatprep.mubr.msk.f32.mxu0 %vm8010_vm1, %v8011_v6 }
 0x658   : > { %7162 = vmatmul.mubr.msk.f32.gmra.mrb[132].mxu0 %vm3521_vm14, %v4069_v44 }
 0x659   : > { %7164 = vmatprep.mubr.msk.f32.mxu0 %vm8010_vm1, %v8011_v6 }
 0x65c   : > { %7165 = vmatmul.mubr.msk.f32.gmra.mrb[134].mxu0 %vm3521_vm14, %v4070_v39  ;;  %v7464_v39 = vpack.c.bf16 %v5978_v33, %v5977_v8  ;;  %v6005_v8 = vld [vmem:[%s10301_s9 + $0x118] sm:$0xff] }
 0x65d   : > { %7167 = vmatprep.mubr.msk.f32.mxu0 %vm8010_vm1, %v8011_v6 }
 0x660   : > { %7168 = vmatmul.mubr.msk.f32.gmra.mrb[136].mxu0 %vm3521_vm14, %v4071_v61 }
 0x661   : > { %7170 = vmatprep.mubr.msk.f32.mxu0 %vm8010_vm1, %v8011_v6 }
 0x664   : > { %7171 = vmatmul.mubr.msk.f32.gmra.mrb[138].mxu0 %vm3521_vm14, %v4072_v9 }
 0x665   : > { %7173 = vmatprep.mubr.msk.f32.mxu0 %vm8010_vm1, %v8011_v6 }
 0x668   : > { %7174 = vmatmul.mubr.msk.f32.gmra.mrb[160].mxu0 %vm3521_vm14, %v4073_v10 }
 0x669   : > { %7176 = vmatprep.mubr.msk.f32.mxu0 %vm8010_vm1, %v8011_v6 }
 0x66c   : > { %7177 = vmatmul.mubr.msk.f32.gmra.mrb[162].mxu0 %vm3521_vm14, %v4074_v11 }
 0x66d   : > { %7179 = vmatprep.mubr.msk.f32.mxu0 %vm8010_vm1, %v8011_v6 }
 0x670   : > { %7180 = vmatmul.mubr.msk.f32.gmra.mrb[164].mxu0 %vm3521_vm14, %v4075_v15  ;;  %v7467_v15 = vpack.c.bf16 %v5980_v12, %v5979_v45  ;;  %v6009_v45 = vld [vmem:[%s10301_s9 + $0x130] sm:$0xff] }
 0x671   : > { %7190 = vmatprep.mubr.msk.f32.mxu0 %vm8010_vm1, %v8011_v6 }
 0x6bf   : > { %v3822_v27 = vpop.f32.mrb[130].mxu0 }
 0x6c0   : > { %v7058_v17 = vpop.f32.mrb[131].mxu0  ;;  %v5982_v27 = vld [vmem:[%s10301_s9 + $0x80] sm:$0xff] }
 0x6c1   : > { %v5983_v17 = vld [vmem:[%s10301_s9 + $0x88] sm:$0xff] }
 0x6d3   : > { %v3846_v1 = vpop.f32.mrb[140].mxu0 }
 0x6d4   : > { %v7073_v2 = vpop.f32.mrb[141].mxu0 }
 0x6d5   : > { %v7470_v2 = vpack.c.bf16 %v5983_v17, %v5982_v27  ;;  %v6014_v27 = vld [vmem:[%s10301_s9 + $0x150] sm:$0xff]  ;;  %v6015_v17 = vld [vmem:[%s10301_s9 + $0x158] sm:$0xff] }
 0x6d7   : > { %v3850_v46 = vpop.f32.mrb[142].mxu0 }
 0x6d8   : > { %v7076_v23 = vpop.f32.mrb[143].mxu0 }
 0x6db   : > { %v3854_v36 = vpop.f32.mrb[144].mxu0 }
 0x6dc   : > { %v7079_v41 = vpop.f32.mrb[145].mxu0 }
 0x6df   : > { %v3996_v47 = vpop.f32.mrb[146].mxu0 }
 0x6e0   : > { %v7094_v13 = vpop.f32.mrb[147].mxu0  ;;  %v5984_v47 = vld [vmem:[%s10301_s9 + $0x90] sm:$0xff] }
 0x6e1   : > { %v5985_v13 = vld [vmem:[%s10301_s9 + $0x98] sm:$0xff] }
 0x6f3   : > { %v4020_v18 = vpop.f32.mrb[148].mxu0 }
 0x6f4   : > { %v7109_v19 = vpop.f32.mrb[149].mxu0 }
 0x6f5   : > { %v7473_v19 = vpack.c.bf16 %v5985_v13, %v5984_v47  ;;  %v6019_v47 = vld [vmem:[%s10301_s9 + $0x170] sm:$0xff]  ;;  %v6020_v13 = vld [vmem:[%s10301_s9 + $0x178] sm:$0xff] }
 0x707   : > { %v4044_v20 = vpop.f32.mrb[150].mxu0 }
 0x708   : > { %v7124_v48 = vpop.f32.mrb[151].mxu0 }
 0x70b   : > { %v4048_v62 = vpop.f32.mrb[152].mxu0 }
 0x70c   : > { %v7127_v37 = vpop.f32.mrb[153].mxu0 }
 0x70d   : > { %v5987_v37 = vld [vmem:[%s10301_s9 + $0xa0] sm:$0xff] }
 0x70f   : > { %v4052_v43 = vpop.f32.mrb[154].mxu0 }
 0x710   : > { %v7130_v28 = vpop.f32.mrb[155].mxu0  ;;  %v5988_v43 = vld [vmem:[%s10301_s9 + $0xa8] sm:$0xff] }
 0x713   : > { %v4188_v21 = vpop.f32.mrb[156].mxu0 }
 0x714   : > { %v7145_v49 = vpop.f32.mrb[157].mxu0  ;;  %v7476_v21 = vpack.c.bf16 %v5988_v43, %v5987_v37  ;;  %v6022_v37 = vld [vmem:[%s10301_s9 + $0x180] sm:$0xff]  ;;  %v6023_v43 = vld [vmem:[%s10301_s9 + $0x188] sm:$0xff] }
 0x717   : > { %v4192_v38 = vpop.f32.mrb[122].mxu0 }
 0x718   : > { %v7586_v25 = vadd.f32 %v9879_v24, %v4192_v38  ;;  %v7148_v50 = vpop.f32.mrb[123].mxu0 }
 0x719   : > { %v5989_v50 = vld [vmem:[%s10301_s9 + $0xb0] sm:$0xff] }
 0x71a   : > { %v4255_v55 = vmax.f32 %v7586_v25, 0.0 }
 0x71b   : > { %v4197_v51 = vpop.f32.mrb[124].mxu0 }
 0x71c   : > { %v4269_v57 = vrot.slane %v4255_v55, 3  ;;  %v7151_v52 = vpop.f32.mrb[125].mxu0  ;;  %v4349_v42 = vrot.slane %v4255_v55, 5  ;;  %v4428_v61 = vrot.slane %v4255_v55, 7  ;;  %v7587_v9 = vadd.f32 %v9879_v24, %v4197_v51 }
 0x71d   : > { %v7479_v55 = vpack.c.bf16 %v5990_v29, %v5989_v50  ;;  %v6027_v50 = vld [vmem:[%s10301_s9 + $0x1a0] sm:$0xff]  ;;  %v6028_v29 = vld [vmem:[%s10301_s9 + $0x1a8] sm:$0xff] }
 0x71e   : > { %7191 = vmatmul.mubr.msk.f32.vlgmr.msra.gmra.mrb[166].mxu0 %vm4270_vm6, %v4269_v57  ;;  %v4256_v30 = vmax.f32 %v7587_v9, 0.0  ;;  %v5993_v57 = vld [vmem:[%s10301_s9 + $0xc8] sm:$0xff] }
 0x71f   : > { %v4202_v59 = vpop.f32.mrb[126].mxu0  ;;  %7453 = vmatpush3.bf16.msra.mxu0 %v7452_v56  ;;  %7201 = vmatprep.mubr.msk.f32.mxu0 %vm8010_vm1, %v8011_v6  ;;  %v5992_v56 = vld [vmem:[%s10301_s9 + $0xc0] sm:$0xff] }
 0x720   : > { %v7154_v26 = vpop.f32.mrb[127].mxu0  ;;  %7454 = vmatprep.subr.bf16.mxu0 %v8009_v3  ;;  %v4508_v46 = vrot.slane %v4256_v30, 1  ;;  %v7588_v23 = vadd.f32 %v9879_v24, %v4202_v59  ;;  %v7482_v52 = vpack.c.bf16 %v5993_v57, %v5992_v56  ;;  %v5995_v59 = vld [vmem:[%s10301_s9 + $0xd8] sm:$0xff]  ;;  %v6032_v57 = vld [vmem:[%s10301_s9 + $0x1c0] sm:$0xff] }
 0x721   : > { %v5997_v26 = vld [vmem:[%s10301_s9 + $0xe0] sm:$0xff] }
 0x722   : > { %v4257_v20 = vmax.f32 %v7588_v23, 0.0  ;;  %v7488_v31 = vpack.c.bf16 %v5998_v53, %v5997_v26  ;;  %v6037_v26 = vld [vmem:[%s10301_s9 + $0x1e0] sm:$0xff]  ;;  %v6038_v53 = vld [vmem:[%s10301_s9 + $0x1e8] sm:$0xff] }
 0x723   : > { %v9904_v63 = vpop.f32.mrb[128].mxu0  ;;  %7456 = vmatpush3.bf16.msra.mxu0 %v7455_v0  ;;  %v7485_v0 = vpack.c.bf16 %v5995_v59, %v5994_v58  ;;  %v6034_v59 = vld [vmem:[%s10301_s9 + $0x1d0] sm:$0xff] }
 0x724   : > { %v7157_v4 = vpop.f32.mrb[129].mxu0  ;;  %7457 = vmatprep.subr.bf16.mxu0 %v8009_v3  ;;  %v4588_v49 = vrot.slane %v4257_v20, 7  ;;  %v7589_v38 = vadd.f32 %v9879_v24, %v9904_v63  ;;  %v7515_v20 = vpack.c.bf16 %v6020_v13, %v6019_v47 }
 0x726   : > { %7202 = vmatmul.mubr.msk.f32.vlgmr.msra.gmra.mrb[166].mxu0 %vm4270_vm6, %v4349_v42  ;;  %v6000_v42 = vld [vmem:[%s10301_s9 + $0xf8] sm:$0xff] }
 0x727   : > { %v4212_v5 = vpop.f32.mrb[158].mxu0  ;;  %7459 = vmatpush3.bf16.msra.mxu0 %v7458_v54  ;;  %7212 = vmatprep.mubr.msk.f32.mxu0 %vm8010_vm1, %v8011_v6  ;;  %v5999_v54 = vld [vmem:[%s10301_s9 + $0xf0] sm:$0xff] }
 0x728   : > { %v7160_v7 = vpop.f32.mrb[159].mxu0  ;;  %7460 = vmatprep.subr.bf16.mxu0 %v8009_v3  ;;  %v7491_v4 = vpack.c.bf16 %v6000_v42, %v5999_v54  ;;  %v7494_v5 = vpack.c.bf16 %v6003_v22, %v6002_v32  ;;  %v6039_v54 = vld [vmem:[%s10301_s9 + $0x1f0] sm:$0xff]  ;;  %v6040_v42 = vld [vmem:[%s10301_s9 + $0x1f8] sm:$0xff]  ;;  %v5550_v22 = vlaneseq }
 0x729   : > { %v6004_v7 = vld [vmem:[%s10301_s9 + $0x110] sm:$0xff] }
 0x72a   : > { %v7497_v33 = vpack.c.bf16 %v6005_v8, %v6004_v7 }
 0x72b   : > { %v4216_v44 = vpop.f32.mrb[132].mxu0  ;;  %7462 = vmatpush3.bf16.msra.mxu0 %v7461_v60 }
 0x72c   : > { %v9925_v10 = vadd.f32 %v9879_v24, %v4216_v44  ;;  %v7163_v11 = vpop.f32.mrb[133].mxu0  ;;  %7463 = vmatprep.subr.bf16.mxu0 %v8009_v3 }
 0x72e   : > { %7213 = vmatmul.mubr.msk.f32.vlgmr.msra.gmra.mrb[166].mxu0 %vm4270_vm6, %v4428_v61  ;;  %v4259_v44 = vmax.f32 %v9925_v10, 0.0  ;;  %v6008_v61 = vld [vmem:[%s10301_s9 + $0x128] sm:$0xff]  ;;  %v6010_v10 = vld [vmem:[%s10301_s9 + $0x138] sm:$0xff] }
 0x72f   : > { %v4221_v14 = vpop.f32.mrb[134].mxu0  ;;  %7465 = vmatpush3.bf16.msra.mxu0 %v7464_v39  ;;  %7223 = vmatprep.mubr.msk.f32.mxu0 %vm8010_vm1, %v8011_v6  ;;  %v6007_v39 = vld [vmem:[%s10301_s9 + $0x120] sm:$0xff]  ;;  %v7503_v12 = vpack.c.bf16 %v6010_v10, %v6009_v45 }
 0x730   : > { %v9938_v35 = vadd.f32 %v9879_v24, %v4221_v14  ;;  %v7166_v16 = vpop.f32.mrb[135].mxu0  ;;  %7466 = vmatprep.subr.bf16.mxu0 %v8009_v3  ;;  %v7500_v9 = vpack.c.bf16 %v6008_v61, %v6007_v39  ;;  %v4906_v11 = vrot.slane %v4259_v44, 3  ;;  %v6012_v14 = vld [vmem:[%s10301_s9 + $0x140] sm:$0xff] }
 0x731   : > { %v4985_v16 = vrot.slane %v4259_v44, 5 }
 0x733   : > { %v4226_v1 = vpop.f32.mrb[136].mxu0  ;;  %7468 = vmatpush3.bf16.msra.mxu0 %v7467_v15  ;;  %v6013_v15 = vld [vmem:[%s10301_s9 + $0x148] sm:$0xff] }
 0x734   : > { %v9949_v36 = vadd.f32 %v9879_v24, %v4226_v1  ;;  %v7169_v41 = vpop.f32.mrb[137].mxu0  ;;  %7469 = vmatprep.subr.bf16.mxu0 %v8009_v3  ;;  %v7506_v30 = vpack.c.bf16 %v6013_v15, %v6012_v14  ;;  %v7509_v1 = vpack.c.bf16 %v6015_v17, %v6014_v27 }
 0x735   : > { %v5064_v41 = vrot.slane %v4259_v44, 7 }
 0x736   : > { %7224 = vmatmul.mubr.msk.f32.vlgmr.msra.gmra.mrb[166].mxu0 %vm4270_vm6, %v4508_v46  ;;  %v6018_v46 = vld [vmem:[%s10301_s9 + $0x168] sm:$0xff] }
 0x737   : > { %v4231_v18 = vpop.f32.mrb[138].mxu0  ;;  %7471 = vmatpush3.bf16.msra.mxu0 %v7470_v2  ;;  %7234 = vmatprep.mubr.msk.f32.mxu0 %vm8010_vm1, %v8011_v6  ;;  %v6017_v2 = vld [vmem:[%s10301_s9 + $0x160] sm:$0xff] }
 0x738   : > { %v9962_v48 = vadd.f32 %v9879_v24, %v4231_v18  ;;  %v7172_v62 = vpop.f32.mrb[139].mxu0  ;;  %7472 = vmatprep.subr.bf16.mxu0 %v8009_v3  ;;  %v4258_v24 = vmax.f32 %v7589_v38, 0.0  ;;  %v7512_v23 = vpack.c.bf16 %v6018_v46, %v6017_v2 }
 0x739   : > { %v4260_v62 = vmax.f32 %v9938_v35, 0.0  ;;  %v6025_v35 = vld [vmem:[%s10301_s9 + $0x198] sm:$0xff] }
 0x73a   : > { %v4668_v40 = vrot.slane %v4258_v24, 1  ;;  %v4747_v63 = vrot.slane %v4258_v24, 3  ;;  %v4826_v60 = vrot.slane %v4258_v24, 5  ;;  %v6029_v24 = vld [vmem:[%s10301_s9 + $0x1b0] sm:$0xff]  ;;  %v4262_v56 = vmax.f32 %v9962_v48, 0.0  ;;  %v6035_v48 = vld [vmem:[%s10301_s9 + $0x1d8] sm:$0xff] }
 0x73b   : > { %v4236_v28 = vpop.f32.mrb[160].mxu0  ;;  %7474 = vmatpush3.bf16.msra.mxu0 %v7473_v19 }
 0x73c   : > { %v7175_v25 = vpop.f32.mrb[161].mxu0  ;;  %7475 = vmatprep.subr.bf16.mxu0 %v8009_v3  ;;  %v7518_v28 = vpack.c.bf16 %v6023_v43, %v6022_v37  ;;  %v5304_v58 = vrot.slane %v4262_v56, 1  ;;  %v5462_v32 = vrot.slane %v4262_v56, 5 }
 0x73d   : > { %v4261_v25 = vmax.f32 %v9949_v36, 0.0  ;;  %v6030_v36 = vld [vmem:[%s10301_s9 + $0x1b8] sm:$0xff] }
 0x73e   : > { %7235 = vmatmul.mubr.msk.f32.vlgmr.msra.gmra.mrb[166].mxu0 %vm4270_vm6, %v4588_v49  ;;  %v6024_v49 = vld [vmem:[%s10301_s9 + $0x190] sm:$0xff] }
 0x73f   : > { %v4240_v34 = vpop.f32.mrb[162].mxu0  ;;  %7477 = vmatpush3.bf16.msra.mxu0 %v7476_v21  ;;  %7245 = vmatprep.mubr.msk.f32.mxu0 %vm8010_vm1, %v8011_v6  ;;  %v5144_v21 = vrot.slane %v4260_v62, 1  ;;  %v7521_v38 = vpack.c.bf16 %v6025_v35, %v6024_v49 }
 0x740   : > { %v7178_v51 = vpop.f32.mrb[163].mxu0  ;;  %7478 = vmatprep.subr.bf16.mxu0 %v8009_v3  ;;  %v7524_v34 = vpack.c.bf16 %v6028_v29, %v6027_v50 }
 0x741   : > { %v7527_v51 = vpack.c.bf16 %v6030_v36, %v6029_v24 }
 0x743   : > { %7480 = vmatpush3.bf16.msra.mxu0 %v7479_v55  ;;  %v4244_v18 = vpop.f32.mrb[164].mxu0  ;;  %v5224_v55 = vrot.slane %v4261_v25, 7 }
 0x744   : > { %7481 = vmatprep.subr.bf16.mxu0 %v8009_v3  ;;  %v7181_v19 = vpop.f32.mrb[165].mxu0 }
 0x746   : > { %7246 = vmatmul.mubr.msk.f32.vlgmr.msra.gmra.mrb[166].mxu0 %vm4270_vm6, %v4668_v40 }
 0x747   : > { %7483 = vmatpush3.bf16.msra.mxu0 %v7482_v52  ;;  %7256 = vmatprep.mubr.msk.f32.mxu0 %vm8010_vm1, %v8011_v6  ;;  %v6033_v52 = vld [vmem:[%s10301_s9 + $0x1c8] sm:$0xff] }
 0x748   : > { %7484 = vmatprep.subr.bf16.mxu0 %v8009_v3  ;;  %v7530_v40 = vpack.c.bf16 %v6033_v52, %v6032_v57 }
 0x74b   : > { %7486 = vmatpush3.bf16.msra.mxu0 %v7485_v0  ;;  %v7533_v0 = vpack.c.bf16 %v6035_v48, %v6034_v59 }
 0x74c   : > { %7487 = vmatprep.subr.bf16.mxu0 %v8009_v3 }
 0x74e   : > { %7257 = vmatmul.mubr.msk.f32.vlgmr.msra.gmra.mrb[166].mxu0 %vm4270_vm6, %v4747_v63  ;;  %v5383_v63 = vrot.slane %v4262_v56, 3 }
 0x74f   : > { %7489 = vmatpush3.bf16.msra.mxu0 %v7488_v31  ;;  %7267 = vmatprep.mubr.msk.f32.mxu0 %vm8010_vm1, %v8011_v6  ;;  %v7536_v31 = vpack.c.bf16 %v6038_v53, %v6037_v26 }
 0x750   : > { %7490 = vmatprep.subr.bf16.mxu0 %v8009_v3 }
 0x753   : > { %7492 = vmatpush3.bf16.msra.mxu0 %v7491_v4  ;;  %v7539_v4 = vpack.c.bf16 %v6040_v42, %v6039_v54 }
 0x754   : > { %7493 = vmatprep.subr.bf16.mxu0 %v8009_v3 }
 0x756   : > { %7268 = vmatmul.mubr.msk.f32.vlgmr.msra.gmra.mrb[166].mxu0 %vm4270_vm6, %v4826_v60  ;;  %v4263_v60 = vld [vmem:[%s10302_s10] sm:$0x1] }
 0x757   : > { %7495 = vmatpush3.bf16.msra.mxu0 %v7494_v5  ;;  %7278 = vmatprep.mubr.msk.f32.mxu0 %vm8010_vm1, %v8011_v6  ;;  %v5551_v5 = vshrl.u32 %v5550_v22, 7 }
 0x758   : > { %7496 = vmatprep.subr.bf16.mxu0 %v8009_v3 }
 0x759   : > { %v5552_v7 = vsub.s32 0, %v5551_v5 }
 0x75b   : > { %7498 = vmatpush3.bf16.msra.mxu0 %v7497_v33 }
 0x75c   : > { %7499 = vmatprep.subr.bf16.mxu0 %v8009_v3 }
 0x75e   : > { %7279 = vmatmul.mubr.msk.f32.vlgmr.msra.gmra.mrb[166].mxu0 %vm4270_vm6, %v4906_v11 }
 0x75f   : > { %7501 = vmatpush3.bf16.msra.mxu0 %v7500_v9  ;;  %7289 = vmatprep.mubr.msk.f32.mxu0 %vm8010_vm1, %v8011_v6 }
 0x760   : > { %7502 = vmatprep.subr.bf16.mxu0 %v8009_v3 }
 0x763   : > { %7504 = vmatpush3.bf16.msra.mxu0 %v7503_v12 }
 0x764   : > { %7505 = vmatprep.subr.bf16.mxu0 %v8009_v3 }
 0x766   : > { %7290 = vmatmul.mubr.msk.f32.vlgmr.msra.gmra.mrb[166].mxu0 %vm4270_vm6, %v4985_v16 }
 0x767   : > { %7507 = vmatpush3.bf16.msra.mxu0 %v7506_v30  ;;  %7300 = vmatprep.mubr.msk.f32.mxu0 %vm8010_vm1, %v8011_v6 }
 0x768   : > { %7508 = vmatprep.subr.bf16.mxu0 %v8009_v3 }
 0x76b   : > { %7510 = vmatpush3.bf16.msra.mxu0 %v7509_v1 }
 0x76c   : > { %7511 = vmatprep.subr.bf16.mxu0 %v8009_v3 }
 0x76e   : > { %7301 = vmatmul.mubr.msk.f32.vlgmr.msra.gmra.mrb[166].mxu0 %vm4270_vm6, %v5064_v41 }
 0x76f   : > { %7513 = vmatpush3.bf16.msra.mxu0 %v7512_v23  ;;  %7311 = vmatprep.mubr.msk.f32.mxu0 %vm8010_vm1, %v8011_v6 }
 0x770   : > { %7514 = vmatprep.subr.bf16.mxu0 %v8009_v3 }
 0x773   : > { %7516 = vmatpush3.bf16.msra.mxu0 %v7515_v20 }
 0x774   : > { %7517 = vmatprep.subr.bf16.mxu0 %v8009_v3 }
 0x776   : > { %7312 = vmatmul.mubr.msk.f32.vlgmr.msra.gmra.mrb[166].mxu0 %vm4270_vm6, %v5144_v21 }
 0x777   : > { %7519 = vmatpush3.bf16.msra.mxu0 %v7518_v28  ;;  %7322 = vmatprep.mubr.msk.f32.mxu0 %vm8010_vm1, %v8011_v6 }
 0x778   : > { %7520 = vmatprep.subr.bf16.mxu0 %v8009_v3 }
 0x77b   : > { %7522 = vmatpush3.bf16.msra.mxu0 %v7521_v38 }
 0x77c   : > { %7523 = vmatprep.subr.bf16.mxu0 %v8009_v3 }
 0x77e   : > { %7323 = vmatmul.mubr.msk.f32.vlgmr.msra.gmra.mrb[166].mxu0 %vm4270_vm6, %v5224_v55 }
 0x77f   : > { %7525 = vmatpush3.bf16.msra.mxu0 %v7524_v34  ;;  %7333 = vmatprep.mubr.msk.f32.mxu0 %vm8010_vm1, %v8011_v6 }
 0x780   : > { %7526 = vmatprep.subr.bf16.mxu0 %v8009_v3 }
 0x783   : > { %7528 = vmatpush3.bf16.msra.mxu0 %v7527_v51 }
 0x784   : > { %7529 = vmatprep.subr.bf16.mxu0 %v8009_v3 }
 0x786   : > { %7334 = vmatmul.mubr.msk.f32.vlgmr.msra.gmra.mrb[166].mxu0 %vm4270_vm6, %v5304_v58 }
 0x787   : > { %7531 = vmatpush3.bf16.msra.mxu0 %v7530_v40  ;;  %7344 = vmatprep.mubr.msk.f32.mxu0 %vm8010_vm1, %v8011_v6 }
 0x788   : > { %7532 = vmatprep.subr.bf16.mxu0 %v8009_v3 }
 0x78b   : > { %7534 = vmatpush3.bf16.msra.mxu0 %v7533_v0 }
 0x78c   : > { %7535 = vmatprep.subr.bf16.mxu0 %v8009_v3 }
 0x78e   : > { %7345 = vmatmul.mubr.msk.f32.vlgmr.msra.gmra.mrb[166].mxu0 %vm4270_vm6, %v5383_v63 }
 0x78f   : > { %7537 = vmatpush3.bf16.msra.mxu0 %v7536_v31  ;;  %7355 = vmatprep.mubr.msk.f32.mxu0 %vm8010_vm1, %v8011_v6  ;;  %vm5546_vm1 = vcmask 253952  }
 0x790   : > { %7538 = vmatprep.subr.bf16.mxu0 %v8009_v3 }
 0x793   : > { %7540 = vmatpush3.bf16.msra.mxu0 %v7539_v4 }
 0x796   : > { %7356 = vmatmul.mubr.msk.f32.vlgmr.msra.gmra.mrb[166].mxu0 %vm4270_vm6, %v5462_v32 }
 0x869   : > { %v5531_v8 = vpop.f32.mrb[166].mxu0 }
 0x86a   : > { %v10165_v6 = vadd.f32 %v5531_v8, %v4263_v60  ;;  %v7357_v3 = vpop.f32.mrb[167].mxu0 }
 0x86c   : > { %v5537_v33 = vmul.f32 0.5, %v10165_v6  ;;  %v5553_v44 = vrot.slane %v10165_v6, %v5552_v7  ;;  %5548 = vst.msk [vmem:[%s480_s21] sm:$0x1] %vm5546_vm1, %v10165_v6 }
 0x86e   : > { %v5538_v39 = vmul.f32 1.442695, %v5537_v33  ;;  %5554 = vrot.lane.b32.xlu0 %v5553_v44, %s10310_s1  ;;  %s8018_s1 = smov [#allocation6]  }
 0x86f   : > { %s7889_s4 = sshll.u32 %s8018_s1, 4  ;;  %s7890_s4 = int_to_ptr.vmem [resolvable:$false] %s7889_s4 }
 0x870   : > { %7882 = vpow2.f32 %v5538_v39  ;;  %s7891_s17 = scalar_lea.vmem %s7890_s4, 32  ;;  %p7892_p0 = scmp.lt.s32.totalorder %s5593_s2, %s7890_s4 }
 0x871   : > { %p7893_p1 = scmp.lt.s32.totalorder %s7891_s17, %s7885_s3 }
 0x873   : > { %p7894_p2 = por %p7893_p1, %p7892_p0 }
 0x875   : > { %p7895_p3 = pnand %p7894_p2, %p7888_p13 }
 0x877   : > { %7898 = shalt.err (!%p7895_p3)
}
 0x878   : > { %s7899_s21 = scalar_lea.hbm %s10181_s25, 16  ;;  %s7903_s1 = scalar_lea.hbm %s10305_s13, 32 }
 0x879   : > { %p7900_p4 = scmp.ne.s32.totalorder %s10181_s25, %s7899_s21  ;;  %p7904_p9 = scmp.lt.u32.totalorder %s10181_s25, %s10305_s13 }
 0x87a   : > { %p7905_p10 = scmp.lt.u32.totalorder %s7903_s1, %s7899_s21  ;;  %p7907_p12 = scmp.lt.u32.totalorder %s7899_s21, %s10181_s25 }
 0x87b   : > { %p7901_p7 = pnand %p7900_p4, %p8136_p5 }
 0x87c   : > { %p7906_p11 = por %p7905_p10, %p7904_p9 }
 0x87d   : > { %p7902_p8 = pneg %p7901_p7 }
 0x87e   : > { %p7908_p13 = por %p7907_p12, %p7906_p11 }
 0x880   : > { %p7909_p0 = pnand %p7908_p13, %p7902_p8 }
 0x882   : > { %7912 = shalt.err (!%p7909_p0)
}
 0x883   : > { %7823 = dma.vmem_to_hbm [thread:$0]  (%p8136_p5), %s5593_s2, 16, %s10181_s25, %s10183_s18   ;;  %v7883_v61 = vpop.eup %7882 }
 0x884   : > { %s10325_s3 = smov 96   ;;  %s486_s17 = scalar_lea.vmem [#allocation8], %s10160_s0 }
 0x885   : > { %5541 = vrot.lane.b32.xlu1 %v7883_v61, %s10325_s3  ;;  %s5605_s22 = sshll.u32 %s486_s17, 4  ;;  %s10211_s1 = scalar_lea.hbm %s10306_s14, %s10175_s28  ;;  %s10205_s22 = int_to_ptr.vmem [resolvable:$true] %s5605_s22 }
 0x886   : > { %s7913_s20 = scalar_lea.vmem %s10205_s22, 16  ;;  %s8019_s25 = smov [#allocation8]  }
 0x887   : > { %p7914_p1 = scmp.ne.s32.totalorder %s10205_s22, %s7913_s20  ;;  %s7917_s2 = sshll.u32 %s8019_s25, 4  ;;  %s7918_s2 = int_to_ptr.vmem [resolvable:$false] %s7917_s2 }
 0x888   : > { %s7919_s4 = scalar_lea.vmem %s7918_s2, 32  ;;  %p7920_p4 = scmp.lt.s32.totalorder %s10205_s22, %s7918_s2 }
 0x889   : > { %p7915_p2 = pnand %p7914_p1, %p8136_p5  ;;  %p7921_p7 = scmp.lt.s32.totalorder %s7919_s4, %s7913_s20 }
 0x88b   : > { %p7916_p3 = pneg %p7915_p2  ;;  %p7922_p8 = por %p7921_p7, %p7920_p4 }
 0x88d   : > { %p7923_p9 = pnand %p7922_p8, %p7916_p3 }
 0x8e0   : > { %v5555_v9 = vpop.permute.xlu0 %5554 }
 0x8e1   : > { %5557 = vst.msk [vmem:[%s486_s17] sm:$0x1] %vm5546_vm1, %v5555_v9 }
 0x8e2   : > { %7926 = shalt.err (!%p7923_p9)
}
 0x8e3   : > { %s7927_s3 = scalar_lea.hbm %s10211_s1, 16  ;;  %s7931_s21 = scalar_lea.hbm %s10306_s14, 32 }
 0x8e4   : > { %p7928_p10 = scmp.ne.s32.totalorder %s10211_s1, %s7927_s3  ;;  %p7932_p13 = scmp.lt.u32.totalorder %s10211_s1, %s10306_s14 }
 0x8e5   : > { %p7933_p0 = scmp.lt.u32.totalorder %s7931_s21, %s7927_s3  ;;  %p7935_p2 = scmp.lt.u32.totalorder %s7927_s3, %s10211_s1 }
 0x8e6   : > { %p7929_p11 = pnand %p7928_p10, %p8136_p5 }
 0x8e7   : > { %p7934_p1 = por %p7933_p0, %p7932_p13 }
 0x8e8   : > { %p7930_p12 = pneg %p7929_p11 }
 0x8e9   : > { %p7936_p3 = por %p7935_p2, %p7934_p1 }
 0x8eb   : > { %p7937_p4 = pnand %p7936_p3, %p7930_p12 }
 0x8ed   : > { %7940 = shalt.err (!%p7937_p4)
}
 0x8ee   : > { %7824 = dma.vmem_to_hbm [thread:$0]  (%p8136_p5), %s10205_s22, 16, %s10211_s1, %s10183_s18  }
 0x8ef   : > { %s494_s17 = scalar_lea.vmem %s10303_s11, %s8166_s26  ;;  %s474_s3 = scalar_lea.vmem [#allocation4], %s10160_s0 }
 0x8f0   : > { %v5536_v11 = vld [vmem:[%s494_s17] sm:$0x1]  ;;  %s5579_s27 = sshll.u32 %s474_s3, 4  ;;  %s10246_s2 = scalar_lea.hbm %s10304_s12, %s10175_s28  ;;  %s10248_s27 = int_to_ptr.vmem [resolvable:$true] %s5579_s27 }
 0x8f1   : > { %s5559_s26 = scalar_lea.sflag [#allocation5], %s10160_s0  ;;  %s7941_s18 = scalar_lea.vmem %s10248_s27, 16 }
 0x8f2   : > { %p7942_p7 = scmp.ne.s32.totalorder %s10248_s27, %s7941_s18  ;;  %s8020_s22 = smov [#allocation4]  }
 0x8f3   : > { %s7945_s1 = sshll.u32 %s8020_s22, 4  ;;  %s7946_s1 = int_to_ptr.vmem [resolvable:$false] %s7945_s1 }
 0x8f4   : > { %p7943_p8 = pnand %p7942_p7, %p8136_p5  ;;  %s7947_s20 = scalar_lea.vmem %s7946_s1, 32 }
 0x8f5   : > { %p7948_p10 = scmp.lt.s32.totalorder %s10248_s27, %s7946_s1  ;;  %p7949_p11 = scmp.lt.s32.totalorder %s7947_s20, %s7941_s18 }
 0x8f6   : > { %p7944_p9 = pneg %p7943_p8 }
 0x8f7   : > { %v5542_v45 = vpop.permute.xlu1 %5541  ;;  %p7950_p12 = por %p7949_p11, %p7948_p10 }
 0x8f8   : > { %v5544_v10 = vmul.f32 %v5542_v45, %v5536_v11 }
 0x8f9   : > { %p7951_p13 = pnand %p7950_p12, %p7944_p9 }
 0x8fa   : > { %v5545_v12 = vadd.f32 %v10165_v6, %v5544_v10 }
 0x8fc   : > { %5547 = vst.msk [vmem:[%s474_s3] sm:$0x1] %vm5546_vm1, %v5545_v12 }
 0x8fd   : > { %7954 = shalt.err (!%p7951_p13)
}
 0x8fe   : > { %s7955_s0 = scalar_lea.hbm %s10246_s2, 16  ;;  %s7959_s17 = scalar_lea.hbm %s10304_s12, 32 }
 0x8ff   : > { %p7956_p0 = scmp.ne.s32.totalorder %s10246_s2, %s7955_s0  ;;  %p7960_p3 = scmp.lt.u32.totalorder %s10246_s2, %s10304_s12 }
 0x900   : > { %p7961_p4 = scmp.lt.u32.totalorder %s7959_s17, %s7955_s0  ;;  %p7963_p8 = scmp.lt.u32.totalorder %s7955_s0, %s10246_s2 }
 0x901   : > { %p7957_p1 = pnand %p7956_p0, %p8136_p5 }
 0x902   : > { %p7962_p7 = por %p7961_p4, %p7960_p3 }
 0x903   : > { %p7958_p2 = pneg %p7957_p1 }
 0x904   : > { %p7964_p9 = por %p7963_p8, %p7962_p7 }
 0x906   : > { %p7965_p10 = pnand %p7964_p9, %p7958_p2 }
 0x908   : > { %7968 = shalt.err (!%p7965_p10)
}
 0x909   : > { %7822 = dma.vmem_to_hbm [thread:$0]  (%p8136_p5), %s10248_s27, 16, %s10246_s2, %s5559_s26  }
 0x90a PF: > { %p7838_p11 = scmp.ge.s32.totalorder %s8007_s16, 2  ;;  %s5617_s25 = sand.u32 1, %s7995_s29  }
 0x90b   : > { %s5618_s18 = scalar_lea.sflag [#allocation5], %s5617_s25 }
 0x90c   : > { %p7829_p12 = pnand %p7838_p11, %p8140_p6 }
 0x90e   : > { %7986 = dma.done.wait (!%p7829_p12), %s5618_s18, 16  }
 0x90f   : > { %7988 = vsyncadd (!%p7829_p12), %s5618_s18, 4294967280  ;;  %s10326_s22 = sadd.s32 4294967294, %s8007_s16  }
 0x910   : > { %s5625_s1 = sand.u32 1, %s10326_s22  }
 0x911   : > { %s5626_s20 = scalar_lea.sflag [#allocation7], %s5625_s1 }
 0x912   : > { %7990 = dma.done.wait (!%p7829_p12), %s5626_s20, 32  }
 0x913   : > { %7992 = vsyncadd (!%p7829_p12), %s5626_s20, 4294967264  ;;  %s10327_s23 = sld [smem:[#allocation11_spill]]  ;;  %p28_p5 = scmp.ge.s32.totalorder %s8121_s19, 4  }
 0x914   : > { %s10328_s29 = smov %s7999_s30  ;;  %s10329_s30 = smov %s8003_s15 }
 0x915   : > { %s10331_s16 = smov %s8121_s19  ;;  %30 = sbr.rel (!%p28_p5) target bundleno = 11 (0xb), region = 157 }
 0x919   : > { %s10330_s15 = smov %s10327_s23 }
 0x91c   :  { %5638 = vsyncpa [#allocation5], 1 }
 0x91d   :  { %5640 = vsyncpa [#allocation5 + $0x1], 1 }
 0x91e   :  { %5641 = vsyncpa [#allocation7], 1 }
 0x91f   :  { %5643 = vsyncpa [#allocation7 + $0x1], 1 }

</bundles_post_ra>
